<compile_context>
chip_gen: v6e
topology: v6e:2x2x1
jax: 0.10.0
libtpu: 0.0.40
codegen_flags: <defaults>
</compile_context>

<pallas_src>
import functools

import jax
import jax.numpy as jnp
from jax import lax
from jax.experimental import pallas as pl
from jax.experimental.pallas import tpu as pltpu

BN_EPS = 1e-5  # PyTorch BatchNorm3d default


def _conv1_stats_kernel(x_ref, w_ref, b1_ref, y_ref, s1_ref, s2_ref, acc_ref,
                        *, wp, w_valid, nb):
    # Grid: (n, d, kd).
    #   x_ref:  (1, 1, Hp*Wp, Cin)  padded depth-plane of sample n at depth d+kd
    #   w_ref:  (1, 25, Cin, C)     conv1 taps for this kd
    #   b1_ref: (1, C)              conv1 bias
    #   y_ref:  (1, 1, nb, C)       pre-BN conv1 output rows (incl. junk columns w >= W)
    #   s1/s2:  (1, 1, 1, C)        per-(n,d) partial sum / sum-of-squares over valid voxels
    #   acc_ref: (nb, C) f32        accumulator carried across the kd grid axis
    kd = pl.program_id(2)

    @pl.when(kd == 0)
    def _init():
        acc_ref[...] = jnp.zeros_like(acc_ref)

    contrib = jnp.zeros(acc_ref.shape, jnp.float32)
    for idx in range(25):                           # unrolled (kh, kw) taps
        off = (idx // 5) * wp + (idx % 5)           # row shift in the flattened padded plane
        xs = x_ref[0, 0, off:off + nb, :].astype(jnp.bfloat16)
        wk = w_ref[0, idx, :, :]                    # (Cin, C) bf16
        contrib = contrib + jnp.dot(xs, wk, preferred_element_type=jnp.float32)
    acc_ref[...] += contrib

    @pl.when(kd == pl.num_programs(2) - 1)
    def _finalize():
        y = acc_ref[...] + b1_ref[...]              # (nb, C) conv1 output (+ bias)
        y_ref[0, 0, :, :] = y
        # Partial BatchNorm statistics over the valid voxels of this (n, d) plane only.
        r = lax.broadcasted_iota(jnp.int32, (nb, 1), 0)
        valid = (r % wp) < w_valid
        s1_ref[0, 0, :, :] = jnp.sum(jnp.where(valid, y, 0.0), axis=0, keepdims=True)
        s2_ref[0, 0, :, :] = jnp.sum(jnp.where(valid, y * y, 0.0), axis=0, keepdims=True)


def _bn_elu_conv2_kernel(y_ref, scale_ref, shift_ref, coef_ref, b2_ref, o_ref, *, shifts):
    # Lane-interleaved layout: lane = (voxel_in_group * C + channel); blocks are (rows, 128).
    z = y_ref[...] * scale_ref[...] + shift_ref[...]      # folded BatchNorm affine (global stats)
    z = jnp.where(z > 0.0, z, jnp.expm1(z))               # ELU (alpha = 1)
    acc = None
    for t, s in enumerate(shifts):                        # 1x1 conv as roll-based lane mixing (VPU)
        zr = z if s == 0 else pltpu.roll(z, shift=s, axis=1)
        term = zr * coef_ref[t:t + 1, :]
        acc = term if acc is None else acc + term
    o_ref[...] = (acc + b2_ref[...]).astype(o_ref.dtype)


def output_transition_forward(x_ncdhw, w1, b1, gamma, beta, w2, b2, *, row_tile=512):
    """x_ncdhw: [N, Cin, D, H, W] (PyTorch layout). Returns [N, classes, D, H, W]."""
    N, Cin, D, H, W = x_ncdhw.shape
    C = w1.shape[0]                                  # classes
    Dp, Hp, Wp = D + 4, H + 4, W + 4
    HpWp = Hp * Wp
    NB = H * Wp - 4                                  # rows computed per plane (incl. junk cols)
    f32 = jnp.float32

    # ---- glue: NCDHW -> NDHWC, pad=2, flatten each padded (Hp, Wp) plane ----
    x = jnp.transpose(x_ncdhw, (0, 2, 3, 4, 1))
    xpad = jnp.pad(x, ((0, 0), (2, 2), (2, 2), (2, 2), (0, 0)))
    xpadf = xpad.reshape(N, Dp, HpWp, Cin).astype(f32)

    # conv1 weight: torch (C, Cin, 5,5,5) -> (kd, kh, kw, Cin, C) -> (5, 25, Cin, C); bf16 for MXU
    w1r = jnp.transpose(w1, (2, 3, 4, 1, 0)).reshape(5, 25, Cin, C).astype(jnp.bfloat16)
    b1m = b1.reshape(1, C).astype(f32)

    kernel1 = functools.partial(_conv1_stats_kernel, wp=Wp, w_valid=W, nb=NB)
    y_pre, s1, s2 = pl.pallas_call(
        kernel1,
        out_shape=(
            jax.ShapeDtypeStruct((N, D, NB, C), f32),
            jax.ShapeDtypeStruct((N, D, 1, C), f32),
            jax.ShapeDtypeStruct((N, D, 1, C), f32),
        ),
        grid=(N, D, 5),
        in_specs=[
            pl.BlockSpec((1, 1, HpWp, Cin), lambda n, d, kd: (n, d + kd, 0, 0)),
            pl.BlockSpec((1, 25, Cin, C), lambda n, d, kd: (kd, 0, 0, 0)),
            pl.BlockSpec((1, C), lambda n, d, kd: (0, 0)),
        ],
        out_specs=(
            pl.BlockSpec((1, 1, NB, C), lambda n, d, kd: (n, d, 0, 0)),
            pl.BlockSpec((1, 1, 1, C), lambda n, d, kd: (n, d, 0, 0)),
            pl.BlockSpec((1, 1, 1, C), lambda n, d, kd: (n, d, 0, 0)),
        ),
        scratch_shapes=[pltpu.VMEM((NB, C), f32)],
        compiler_params=pltpu.CompilerParams(
            dimension_semantics=("parallel", "parallel", "arbitrary")),
    )(xpadf, w1r, b1m)

    # ---- tiny global BN stat reduction; fold gamma/beta/mean/var into one scale/shift ----
    count = jnp.float32(N * D * H * W)
    mean = jnp.sum(s1, axis=(0, 1, 2)) / count
    var = jnp.sum(s2, axis=(0, 1, 2)) / count - mean * mean   # biased, train-mode BatchNorm
    scale_c = gamma.astype(f32) * lax.rsqrt(var + BN_EPS)
    shift_c = beta.astype(f32) - mean * scale_c

    # ---- pass 2: lane-dense normalize + ELU + 1x1 conv ----
    assert 128 % C == 0, "lane-dense pass assumes classes divides 128"
    # TODO(synk): fall back to a (rows, C) matmul pass when classes does not divide 128.
    G = 128 // C
    M2 = N * D * NB
    R = -(-M2 // G)
    tr = min(row_tile, -(-R // 8) * 8)
    R_pad = -(-R // tr) * tr
    M2p = R_pad * G

    y_flat = jnp.pad(y_pre.reshape(M2, C), ((0, M2p - M2), (0, 0)))
    y_il = y_flat.reshape(R_pad, G * C)              # free row-major reshape -> 128 lanes

    scale_l = jnp.tile(scale_c, G).reshape(1, 128)
    shift_l = jnp.tile(shift_c, G).reshape(1, 128)
    b2_l = jnp.tile(b2.astype(f32), G).reshape(1, 128)

    # 1x1-conv lane-mixing coefficients: out[g*C+co] = b2[co] + sum_ci w2[co,ci] * z[g*C+ci]
    w2m = w2[:, :, 0, 0, 0].astype(f32)              # (co, ci)
    co = jnp.arange(128) % C
    coefs, shifts = [], []
    for delta in range(-(C - 1), C):
        ci = co + delta
        ok = (ci >= 0) & (ci < C)
        coefs.append(jnp.where(ok, w2m[co, jnp.clip(ci, 0, C - 1)], 0.0))
        shifts.append((-delta) % 128)
    coef_mat = jnp.stack(coefs, axis=0)              # (2C-1, 128)

    kernel2 = functools.partial(_bn_elu_conv2_kernel, shifts=tuple(shifts))
    out_il = pl.pallas_call(
        kernel2,
        out_shape=jax.ShapeDtypeStruct((R_pad, 128), f32),
        grid=(R_pad // tr,),
        in_specs=[
            pl.BlockSpec((tr, 128), lambda i: (i, 0)),
            pl.BlockSpec((1, 128), lambda i: (0, 0)),
            pl.BlockSpec((1, 128), lambda i: (0, 0)),
            pl.BlockSpec((len(shifts), 128), lambda i: (0, 0)),
            pl.BlockSpec((1, 128), lambda i: (0, 0)),
        ],
        out_specs=pl.BlockSpec((tr, 128), lambda i: (i, 0)),
        compiler_params=pltpu.CompilerParams(dimension_semantics=("parallel",)),
    )(y_il, scale_l, shift_l, coef_mat, b2_l)

    # ---- glue: undo interleave, drop junk columns, back to NCDHW ----
    out_flat = out_il.reshape(M2p, C)[:M2]
    out_nd = jnp.pad(out_flat.reshape(N, D, NB, C),
                     ((0, 0), (0, 0), (0, H * Wp - NB), (0, 0)))
    out = out_nd.reshape(N, D, H, Wp, C)[:, :, :, :W, :]
    return jnp.transpose(out, (0, 4, 1, 2, 3))


def reference_forward(x, w1, b1, gamma, beta, w2, b2):
    """Pure-JAX reference mirroring the PyTorch forward (train-mode BatchNorm, ELU)."""
    dn = ('NCDHW', 'OIDHW', 'NCDHW')
    y = lax.conv_general_dilated(x, w1, window_strides=(1, 1, 1),
                                 padding=[(2, 2)] * 3, dimension_numbers=dn,
                                 precision=lax.Precision.HIGHEST)
    y = y + b1[None, :, None, None, None]
    mean = jnp.mean(y, axis=(0, 2, 3, 4), keepdims=True)
    var = jnp.mean((y - mean) ** 2, axis=(0, 2, 3, 4), keepdims=True)
    y = (y - mean) * lax.rsqrt(var + BN_EPS)
    y = y * gamma[None, :, None, None, None] + beta[None, :, None, None, None]
    y = jnp.where(y > 0.0, y, jnp.expm1(y))
    y = lax.conv_general_dilated(y, w2, window_strides=(1, 1, 1),
                                 padding=[(0, 0)] * 3, dimension_numbers=dn,
                                 precision=lax.Precision.HIGHEST)
    return y + b2[None, :, None, None, None]


if __name__ == "__main__":
    # Small shapes consistent with the module: in_channels=4, classes=2, 8^3 volume, batch=2.
    N, Cin, D, H, W = 2, 4, 8, 8, 8
    classes = 2

    key = jax.random.PRNGKey(0)
    ks = jax.random.split(key, 7)
    x = jax.random.normal(ks[0], (N, Cin, D, H, W), jnp.float32)
    w1 = 0.1 * jax.random.normal(ks[1], (classes, Cin, 5, 5, 5), jnp.float32)
    b1 = 0.1 * jax.random.normal(ks[2], (classes,), jnp.float32)
    gamma = 1.0 + 0.1 * jax.random.normal(ks[3], (classes,), jnp.float32)
    beta = 0.1 * jax.random.normal(ks[4], (classes,), jnp.float32)
    w2 = 0.1 * jax.random.normal(ks[5], (classes, classes, 1, 1, 1), jnp.float32)
    b2 = 0.1 * jax.random.normal(ks[6], (classes,), jnp.float32)

    out = output_transition_forward(x, w1, b1, gamma, beta, w2, b2)
    out = jax.block_until_ready(out)

    ref = reference_forward(x, w1, b1, gamma, beta, w2, b2)
    ref = jax.block_until_ready(ref)

    assert out.shape == (N, classes, D, H, W), out.shape
    max_err = float(jnp.max(jnp.abs(out - ref)))
    assert max_err < 1e-2, f"max abs error too large: {max_err}"

    print("KERNEL_OK")
</pallas_src>

<mosaic_0001>
module attributes {stable_mosaic.version = 11 : i64} {
  func.func @_conv1_stats_kernel(%arg0: i32, %arg1: i32, %arg2: i32, %arg3: memref<1x1x144x4xf32, #tpu.memory_space<vmem>>, %arg4: memref<1x25x4x2xbf16, #tpu.memory_space<vmem>>, %arg5: memref<1x2xf32, #tpu.memory_space<vmem>>, %arg6: memref<1x1x92x2xf32, #tpu.memory_space<vmem>>, %arg7: memref<1x1x1x2xf32, #tpu.memory_space<vmem>>, %arg8: memref<1x1x1x2xf32, #tpu.memory_space<vmem>>, %arg9: memref<92x2xf32, #tpu.memory_space<vmem>>) attributes {dimension_semantics = [#tpu.dimension_semantics<parallel>, #tpu.dimension_semantics<parallel>, #tpu.dimension_semantics<arbitrary>], iteration_bounds = array<i64: 2, 8, 5>, scalar_prefetch = 0 : i64, scratch_operands = 1 : i64, tpu.core_type = #tpu.core_type<tc>, window_params = [{transform_indices = @transform_0, window_bounds = array<i64: 1, 1, 144, 4>}, {transform_indices = @transform_1, window_bounds = array<i64: 1, 25, 4, 2>}, {pipeline_mode = #tpu.pipeline_mode<synchronous>, transform_indices = @transform_2, window_bounds = array<i64: 1, 2>}, {transform_indices = @transform_3, window_bounds = array<i64: 1, 1, 92, 2>}, {transform_indices = @transform_4, window_bounds = array<i64: 1, 1, 1, 2>}, {transform_indices = @transform_5, window_bounds = array<i64: 1, 1, 1, 2>}]} {
    %c0_i32 = arith.constant 0 : i32
    %0 = arith.cmpi eq, %arg2, %c0_i32 : i32
    %1 = arith.extui %0 : i1 to i32
    %c0_i32_0 = arith.constant 0 : i32
    %2 = arith.cmpi ne, %1, %c0_i32_0 : i32
    scf.if %2 {
      %cst_192 = arith.constant 0.000000e+00 : f32
      %185 = vector.broadcast %cst_192 : f32 to vector<92x2xf32>
      %c0_193 = arith.constant 0 : index
      %c0_194 = arith.constant 0 : index
      %186 = vector.load %arg9[%c0_193, %c0_194] : memref<92x2xf32, #tpu.memory_space<vmem>>, vector<92x2xf32>
      tpu.vector_store %arg9[%c0_193, %c0_194], %185 {strides = array<i32>} : memref<92x2xf32, #tpu.memory_space<vmem>>, vector<92x2xf32>,
    } else {
    }
    %cst = arith.constant 0.000000e+00 : f32
    %3 = vector.broadcast %cst : f32 to vector<92x2xf32>
    %c0 = arith.constant 0 : index
    %c0_1 = arith.constant 0 : index
    %c0_2 = arith.constant 0 : index
    %c0_3 = arith.constant 0 : index
    %4 = vector.load %arg3[%c0, %c0_1, %c0_2, %c0_3] : memref<1x1x144x4xf32, #tpu.memory_space<vmem>>, vector<1x1x92x4xf32>
    %5 = vector.shape_cast %4 : vector<1x1x92x4xf32> to vector<92x4xf32>
    %6 = arith.truncf %5 : vector<92x4xf32> to vector<92x4xbf16>
    %c0_4 = arith.constant 0 : index
    %c0_5 = arith.constant 0 : index
    %c0_6 = arith.constant 0 : index
    %c0_7 = arith.constant 0 : index
    %7 = vector.load %arg4[%c0_4, %c0_5, %c0_6, %c0_7] : memref<1x25x4x2xbf16, #tpu.memory_space<vmem>>, vector<1x1x4x2xbf16>
    %8 = vector.shape_cast %7 : vector<1x1x4x2xbf16> to vector<4x2xbf16>
    %cst_8 = arith.constant dense<0.000000e+00> : vector<92x2xf32>
    %9 = tpu.matmul %6, %8, %cst_8 {dimension_numbers = #tpu.dot_dimension_numbers<[1], [0], [0], [1], [0, 0, 1, 1], [], []>} : vector<92x4xbf16>, vector<4x2xbf16>, vector<92x2xf32> -> vector<92x2xf32>
    %10 = arith.addf %3, %9 : vector<92x2xf32>
    %c0_9 = arith.constant 0 : index
    %c0_10 = arith.constant 0 : index
    %c1 = arith.constant 1 : index
    %c0_11 = arith.constant 0 : index
    %11 = vector.load %arg3[%c0_9, %c0_10, %c1, %c0_11] : memref<1x1x144x4xf32, #tpu.memory_space<vmem>>, vector<1x1x92x4xf32>
    %12 = vector.shape_cast %11 : vector<1x1x92x4xf32> to vector<92x4xf32>
    %13 = arith.truncf %12 : vector<92x4xf32> to vector<92x4xbf16>
    %c0_12 = arith.constant 0 : index
    %c1_13 = arith.constant 1 : index
    %c0_14 = arith.constant 0 : index
    %c0_15 = arith.constant 0 : index
    %14 = vector.load %arg4[%c0_12, %c1_13, %c0_14, %c0_15] : memref<1x25x4x2xbf16, #tpu.memory_space<vmem>>, vector<1x1x4x2xbf16>
    %15 = vector.shape_cast %14 : vector<1x1x4x2xbf16> to vector<4x2xbf16>
    %cst_16 = arith.constant dense<0.000000e+00> : vector<92x2xf32>
    %16 = tpu.matmul %13, %15, %cst_16 {dimension_numbers = #tpu.dot_dimension_numbers<[1], [0], [0], [1], [0, 0, 1, 1], [], []>} : vector<92x4xbf16>, vector<4x2xbf16>, vector<92x2xf32> -> vector<92x2xf32>
    %17 = arith.addf %10, %16 : vector<92x2xf32>
    %c0_17 = arith.constant 0 : index
    %c0_18 = arith.constant 0 : index
    %c2 = arith.constant 2 : index
    %c0_19 = arith.constant 0 : index
    %18 = vector.load %arg3[%c0_17, %c0_18, %c2, %c0_19] : memref<1x1x144x4xf32, #tpu.memory_space<vmem>>, vector<1x1x92x4xf32>
    %19 = vector.shape_cast %18 : vector<1x1x92x4xf32> to vector<92x4xf32>
    %20 = arith.truncf %19 : vector<92x4xf32> to vector<92x4xbf16>
    %c0_20 = arith.constant 0 : index
    %c2_21 = arith.constant 2 : index
    %c0_22 = arith.constant 0 : index
    %c0_23 = arith.constant 0 : index
    %21 = vector.load %arg4[%c0_20, %c2_21, %c0_22, %c0_23] : memref<1x25x4x2xbf16, #tpu.memory_space<vmem>>, vector<1x1x4x2xbf16>
    %22 = vector.shape_cast %21 : vector<1x1x4x2xbf16> to vector<4x2xbf16>
    %cst_24 = arith.constant dense<0.000000e+00> : vector<92x2xf32>
    %23 = tpu.matmul %20, %22, %cst_24 {dimension_numbers = #tpu.dot_dimension_numbers<[1], [0], [0], [1], [0, 0, 1, 1], [], []>} : vector<92x4xbf16>, vector<4x2xbf16>, vector<92x2xf32> -> vector<92x2xf32>
    %24 = arith.addf %17, %23 : vector<92x2xf32>
    %c0_25 = arith.constant 0 : index
    %c0_26 = arith.constant 0 : index
    %c3 = arith.constant 3 : index
    %c0_27 = arith.constant 0 : index
    %25 = vector.load %arg3[%c0_25, %c0_26, %c3, %c0_27] : memref<1x1x144x4xf32, #tpu.memory_space<vmem>>, vector<1x1x92x4xf32>
    %26 = vector.shape_cast %25 : vector<1x1x92x4xf32> to vector<92x4xf32>
    %27 = arith.truncf %26 : vector<92x4xf32> to vector<92x4xbf16>
    %c0_28 = arith.constant 0 : index
    %c3_29 = arith.constant 3 : index
    %c0_30 = arith.constant 0 : index
    %c0_31 = arith.constant 0 : index
    %28 = vector.load %arg4[%c0_28, %c3_29, %c0_30, %c0_31] : memref<1x25x4x2xbf16, #tpu.memory_space<vmem>>, vector<1x1x4x2xbf16>
    %29 = vector.shape_cast %28 : vector<1x1x4x2xbf16> to vector<4x2xbf16>
    %cst_32 = arith.constant dense<0.000000e+00> : vector<92x2xf32>
    %30 = tpu.matmul %27, %29, %cst_32 {dimension_numbers = #tpu.dot_dimension_numbers<[1], [0], [0], [1], [0, 0, 1, 1], [], []>} : vector<92x4xbf16>, vector<4x2xbf16>, vector<92x2xf32> -> vector<92x2xf32>
    %31 = arith.addf %24, %30 : vector<92x2xf32>
    %c0_33 = arith.constant 0 : index
    %c0_34 = arith.constant 0 : index
    %c4 = arith.constant 4 : index
    %c0_35 = arith.constant 0 : index
    %32 = vector.load %arg3[%c0_33, %c0_34, %c4, %c0_35] : memref<1x1x144x4xf32, #tpu.memory_space<vmem>>, vector<1x1x92x4xf32>
    %33 = vector.shape_cast %32 : vector<1x1x92x4xf32> to vector<92x4xf32>
    %34 = arith.truncf %33 : vector<92x4xf32> to vector<92x4xbf16>
    %c0_36 = arith.constant 0 : index
    %c4_37 = arith.constant 4 : index
    %c0_38 = arith.constant 0 : index
    %c0_39 = arith.constant 0 : index
    %35 = vector.load %arg4[%c0_36, %c4_37, %c0_38, %c0_39] : memref<1x25x4x2xbf16, #tpu.memory_space<vmem>>, vector<1x1x4x2xbf16>
    %36 = vector.shape_cast %35 : vector<1x1x4x2xbf16> to vector<4x2xbf16>
    %cst_40 = arith.constant dense<0.000000e+00> : vector<92x2xf32>
    %37 = tpu.matmul %34, %36, %cst_40 {dimension_numbers = #tpu.dot_dimension_numbers<[1], [0], [0], [1], [0, 0, 1, 1], [], []>} : vector<92x4xbf16>, vector<4x2xbf16>, vector<92x2xf32> -> vector<92x2xf32>
    %38 = arith.addf %31, %37 : vector<92x2xf32>
    %c0_41 = arith.constant 0 : index
    %c0_42 = arith.constant 0 : index
    %c12 = arith.constant 12 : index
    %c0_43 = arith.constant 0 : index
    %39 = vector.load %arg3[%c0_41, %c0_42, %c12, %c0_43] : memref<1x1x144x4xf32, #tpu.memory_space<vmem>>, vector<1x1x92x4xf32>
    %40 = vector.shape_cast %39 : vector<1x1x92x4xf32> to vector<92x4xf32>
    %41 = arith.truncf %40 : vector<92x4xf32> to vector<92x4xbf16>
    %c0_44 = arith.constant 0 : index
    %c5 = arith.constant 5 : index
    %c0_45 = arith.constant 0 : index
    %c0_46 = arith.constant 0 : index
    %42 = vector.load %arg4[%c0_44, %c5, %c0_45, %c0_46] : memref<1x25x4x2xbf16, #tpu.memory_space<vmem>>, vector<1x1x4x2xbf16>
    %43 = vector.shape_cast %42 : vector<1x1x4x2xbf16> to vector<4x2xbf16>
    %cst_47 = arith.constant dense<0.000000e+00> : vector<92x2xf32>
    %44 = tpu.matmul %41, %43, %cst_47 {dimension_numbers = #tpu.dot_dimension_numbers<[1], [0], [0], [1], [0, 0, 1, 1], [], []>} : vector<92x4xbf16>, vector<4x2xbf16>, vector<92x2xf32> -> vector<92x2xf32>
    %45 = arith.addf %38, %44 : vector<92x2xf32>
    %c0_48 = arith.constant 0 : index
    %c0_49 = arith.constant 0 : index
    %c13 = arith.constant 13 : index
    %c0_50 = arith.constant 0 : index
    %46 = vector.load %arg3[%c0_48, %c0_49, %c13, %c0_50] : memref<1x1x144x4xf32, #tpu.memory_space<vmem>>, vector<1x1x92x4xf32>
    %47 = vector.shape_cast %46 : vector<1x1x92x4xf32> to vector<92x4xf32>
    %48 = arith.truncf %47 : vector<92x4xf32> to vector<92x4xbf16>
    %c0_51 = arith.constant 0 : index
    %c6 = arith.constant 6 : index
    %c0_52 = arith.constant 0 : index
    %c0_53 = arith.constant 0 : index
    %49 = vector.load %arg4[%c0_51, %c6, %c0_52, %c0_53] : memref<1x25x4x2xbf16, #tpu.memory_space<vmem>>, vector<1x1x4x2xbf16>
    %50 = vector.shape_cast %49 : vector<1x1x4x2xbf16> to vector<4x2xbf16>
    %cst_54 = arith.constant dense<0.000000e+00> : vector<92x2xf32>
    %51 = tpu.matmul %48, %50, %cst_54 {dimension_numbers = #tpu.dot_dimension_numbers<[1], [0], [0], [1], [0, 0, 1, 1], [], []>} : vector<92x4xbf16>, vector<4x2xbf16>, vector<92x2xf32> -> vector<92x2xf32>
    %52 = arith.addf %45, %51 : vector<92x2xf32>
    %c0_55 = arith.constant 0 : index
    %c0_56 = arith.constant 0 : index
    %c14 = arith.constant 14 : index
    %c0_57 = arith.constant 0 : index
    %53 = vector.load %arg3[%c0_55, %c0_56, %c14, %c0_57] : memref<1x1x144x4xf32, #tpu.memory_space<vmem>>, vector<1x1x92x4xf32>
    %54 = vector.shape_cast %53 : vector<1x1x92x4xf32> to vector<92x4xf32>
    %55 = arith.truncf %54 : vector<92x4xf32> to vector<92x4xbf16>
    %c0_58 = arith.constant 0 : index
    %c7 = arith.constant 7 : index
    %c0_59 = arith.constant 0 : index
    %c0_60 = arith.constant 0 : index
    %56 = vector.load %arg4[%c0_58, %c7, %c0_59, %c0_60] : memref<1x25x4x2xbf16, #tpu.memory_space<vmem>>, vector<1x1x4x2xbf16>
    %57 = vector.shape_cast %56 : vector<1x1x4x2xbf16> to vector<4x2xbf16>
    %cst_61 = arith.constant dense<0.000000e+00> : vector<92x2xf32>
    %58 = tpu.matmul %55, %57, %cst_61 {dimension_numbers = #tpu.dot_dimension_numbers<[1], [0], [0], [1], [0, 0, 1, 1], [], []>} : vector<92x4xbf16>, vector<4x2xbf16>, vector<92x2xf32> -> vector<92x2xf32>
    %59 = arith.addf %52, %58 : vector<92x2xf32>
    %c0_62 = arith.constant 0 : index
    %c0_63 = arith.constant 0 : index
    %c15 = arith.constant 15 : index
    %c0_64 = arith.constant 0 : index
    %60 = vector.load %arg3[%c0_62, %c0_63, %c15, %c0_64] : memref<1x1x144x4xf32, #tpu.memory_space<vmem>>, vector<1x1x92x4xf32>
    %61 = vector.shape_cast %60 : vector<1x1x92x4xf32> to vector<92x4xf32>
    %62 = arith.truncf %61 : vector<92x4xf32> to vector<92x4xbf16>
    %c0_65 = arith.constant 0 : index
    %c8 = arith.constant 8 : index
    %c0_66 = arith.constant 0 : index
    %c0_67 = arith.constant 0 : index
    %63 = vector.load %arg4[%c0_65, %c8, %c0_66, %c0_67] : memref<1x25x4x2xbf16, #tpu.memory_space<vmem>>, vector<1x1x4x2xbf16>
    %64 = vector.shape_cast %63 : vector<1x1x4x2xbf16> to vector<4x2xbf16>
    %cst_68 = arith.constant dense<0.000000e+00> : vector<92x2xf32>
    %65 = tpu.matmul %62, %64, %cst_68 {dimension_numbers = #tpu.dot_dimension_numbers<[1], [0], [0], [1], [0, 0, 1, 1], [], []>} : vector<92x4xbf16>, vector<4x2xbf16>, vector<92x2xf32> -> vector<92x2xf32>
    %66 = arith.addf %59, %65 : vector<92x2xf32>
    %c0_69 = arith.constant 0 : index
    %c0_70 = arith.constant 0 : index
    %c16 = arith.constant 16 : index
    %c0_71 = arith.constant 0 : index
    %67 = vector.load %arg3[%c0_69, %c0_70, %c16, %c0_71] : memref<1x1x144x4xf32, #tpu.memory_space<vmem>>, vector<1x1x92x4xf32>
    %68 = vector.shape_cast %67 : vector<1x1x92x4xf32> to vector<92x4xf32>
    %69 = arith.truncf %68 : vector<92x4xf32> to vector<92x4xbf16>
    %c0_72 = arith.constant 0 : index
    %c9 = arith.constant 9 : index
    %c0_73 = arith.constant 0 : index
    %c0_74 = arith.constant 0 : index
    %70 = vector.load %arg4[%c0_72, %c9, %c0_73, %c0_74] : memref<1x25x4x2xbf16, #tpu.memory_space<vmem>>, vector<1x1x4x2xbf16>
    %71 = vector.shape_cast %70 : vector<1x1x4x2xbf16> to vector<4x2xbf16>
    %cst_75 = arith.constant dense<0.000000e+00> : vector<92x2xf32>
    %72 = tpu.matmul %69, %71, %cst_75 {dimension_numbers = #tpu.dot_dimension_numbers<[1], [0], [0], [1], [0, 0, 1, 1], [], []>} : vector<92x4xbf16>, vector<4x2xbf16>, vector<92x2xf32> -> vector<92x2xf32>
    %73 = arith.addf %66, %72 : vector<92x2xf32>
    %c0_76 = arith.constant 0 : index
    %c0_77 = arith.constant 0 : index
    %c24 = arith.constant 24 : index
    %c0_78 = arith.constant 0 : index
    %74 = vector.load %arg3[%c0_76, %c0_77, %c24, %c0_78] : memref<1x1x144x4xf32, #tpu.memory_space<vmem>>, vector<1x1x92x4xf32>
    %75 = vector.shape_cast %74 : vector<1x1x92x4xf32> to vector<92x4xf32>
    %76 = arith.truncf %75 : vector<92x4xf32> to vector<92x4xbf16>
    %c0_79 = arith.constant 0 : index
    %c10 = arith.constant 10 : index
    %c0_80 = arith.constant 0 : index
    %c0_81 = arith.constant 0 : index
    %77 = vector.load %arg4[%c0_79, %c10, %c0_80, %c0_81] : memref<1x25x4x2xbf16, #tpu.memory_space<vmem>>, vector<1x1x4x2xbf16>
    %78 = vector.shape_cast %77 : vector<1x1x4x2xbf16> to vector<4x2xbf16>
    %cst_82 = arith.constant dense<0.000000e+00> : vector<92x2xf32>
    %79 = tpu.matmul %76, %78, %cst_82 {dimension_numbers = #tpu.dot_dimension_numbers<[1], [0], [0], [1], [0, 0, 1, 1], [], []>} : vector<92x4xbf16>, vector<4x2xbf16>, vector<92x2xf32> -> vector<92x2xf32>
    %80 = arith.addf %73, %79 : vector<92x2xf32>
    %c0_83 = arith.constant 0 : index
    %c0_84 = arith.constant 0 : index
    %c25 = arith.constant 25 : index
    %c0_85 = arith.constant 0 : index
    %81 = vector.load %arg3[%c0_83, %c0_84, %c25, %c0_85] : memref<1x1x144x4xf32, #tpu.memory_space<vmem>>, vector<1x1x92x4xf32>
    %82 = vector.shape_cast %81 : vector<1x1x92x4xf32> to vector<92x4xf32>
    %83 = arith.truncf %82 : vector<92x4xf32> to vector<92x4xbf16>
    %c0_86 = arith.constant 0 : index
    %c11 = arith.constant 11 : index
    %c0_87 = arith.constant 0 : index
    %c0_88 = arith.constant 0 : index
    %84 = vector.load %arg4[%c0_86, %c11, %c0_87, %c0_88] : memref<1x25x4x2xbf16, #tpu.memory_space<vmem>>, vector<1x1x4x2xbf16>
    %85 = vector.shape_cast %84 : vector<1x1x4x2xbf16> to vector<4x2xbf16>
    %cst_89 = arith.constant dense<0.000000e+00> : vector<92x2xf32>
    %86 = tpu.matmul %83, %85, %cst_89 {dimension_numbers = #tpu.dot_dimension_numbers<[1], [0], [0], [1], [0, 0, 1, 1], [], []>} : vector<92x4xbf16>, vector<4x2xbf16>, vector<92x2xf32> -> vector<92x2xf32>
    %87 = arith.addf %80, %86 : vector<92x2xf32>
    %c0_90 = arith.constant 0 : index
    %c0_91 = arith.constant 0 : index
    %c26 = arith.constant 26 : index
    %c0_92 = arith.constant 0 : index
    %88 = vector.load %arg3[%c0_90, %c0_91, %c26, %c0_92] : memref<1x1x144x4xf32, #tpu.memory_space<vmem>>, vector<1x1x92x4xf32>
    %89 = vector.shape_cast %88 : vector<1x1x92x4xf32> to vector<92x4xf32>
    %90 = arith.truncf %89 : vector<92x4xf32> to vector<92x4xbf16>
    %c0_93 = arith.constant 0 : index
    %c12_94 = arith.constant 12 : index
    %c0_95 = arith.constant 0 : index
    %c0_96 = arith.constant 0 : index
    %91 = vector.load %arg4[%c0_93, %c12_94, %c0_95, %c0_96] : memref<1x25x4x2xbf16, #tpu.memory_space<vmem>>, vector<1x1x4x2xbf16>
    %92 = vector.shape_cast %91 : vector<1x1x4x2xbf16> to vector<4x2xbf16>
    %cst_97 = arith.constant dense<0.000000e+00> : vector<92x2xf32>
    %93 = tpu.matmul %90, %92, %cst_97 {dimension_numbers = #tpu.dot_dimension_numbers<[1], [0], [0], [1], [0, 0, 1, 1], [], []>} : vector<92x4xbf16>, vector<4x2xbf16>, vector<92x2xf32> -> vector<92x2xf32>
    %94 = arith.addf %87, %93 : vector<92x2xf32>
    %c0_98 = arith.constant 0 : index
    %c0_99 = arith.constant 0 : index
    %c27 = arith.constant 27 : index
    %c0_100 = arith.constant 0 : index
    %95 = vector.load %arg3[%c0_98, %c0_99, %c27, %c0_100] : memref<1x1x144x4xf32, #tpu.memory_space<vmem>>, vector<1x1x92x4xf32>
    %96 = vector.shape_cast %95 : vector<1x1x92x4xf32> to vector<92x4xf32>
    %97 = arith.truncf %96 : vector<92x4xf32> to vector<92x4xbf16>
    %c0_101 = arith.constant 0 : index
    %c13_102 = arith.constant 13 : index
    %c0_103 = arith.constant 0 : index
    %c0_104 = arith.constant 0 : index
    %98 = vector.load %arg4[%c0_101, %c13_102, %c0_103, %c0_104] : memref<1x25x4x2xbf16, #tpu.memory_space<vmem>>, vector<1x1x4x2xbf16>
    %99 = vector.shape_cast %98 : vector<1x1x4x2xbf16> to vector<4x2xbf16>
    %cst_105 = arith.constant dense<0.000000e+00> : vector<92x2xf32>
    %100 = tpu.matmul %97, %99, %cst_105 {dimension_numbers = #tpu.dot_dimension_numbers<[1], [0], [0], [1], [0, 0, 1, 1], [], []>} : vector<92x4xbf16>, vector<4x2xbf16>, vector<92x2xf32> -> vector<92x2xf32>
    %101 = arith.addf %94, %100 : vector<92x2xf32>
    %c0_106 = arith.constant 0 : index
    %c0_107 = arith.constant 0 : index
    %c28 = arith.constant 28 : index
    %c0_108 = arith.constant 0 : index
    %102 = vector.load %arg3[%c0_106, %c0_107, %c28, %c0_108] : memref<1x1x144x4xf32, #tpu.memory_space<vmem>>, vector<1x1x92x4xf32>
    %103 = vector.shape_cast %102 : vector<1x1x92x4xf32> to vector<92x4xf32>
    %104 = arith.truncf %103 : vector<92x4xf32> to vector<92x4xbf16>
    %c0_109 = arith.constant 0 : index
    %c14_110 = arith.constant 14 : index
    %c0_111 = arith.constant 0 : index
    %c0_112 = arith.constant 0 : index
    %105 = vector.load %arg4[%c0_109, %c14_110, %c0_111, %c0_112] : memref<1x25x4x2xbf16, #tpu.memory_space<vmem>>, vector<1x1x4x2xbf16>
    %106 = vector.shape_cast %105 : vector<1x1x4x2xbf16> to vector<4x2xbf16>
    %cst_113 = arith.constant dense<0.000000e+00> : vector<92x2xf32>
    %107 = tpu.matmul %104, %106, %cst_113 {dimension_numbers = #tpu.dot_dimension_numbers<[1], [0], [0], [1], [0, 0, 1, 1], [], []>} : vector<92x4xbf16>, vector<4x2xbf16>, vector<92x2xf32> -> vector<92x2xf32>
    %108 = arith.addf %101, %107 : vector<92x2xf32>
    %c0_114 = arith.constant 0 : index
    %c0_115 = arith.constant 0 : index
    %c36 = arith.constant 36 : index
    %c0_116 = arith.constant 0 : index
    %109 = vector.load %arg3[%c0_114, %c0_115, %c36, %c0_116] : memref<1x1x144x4xf32, #tpu.memory_space<vmem>>, vector<1x1x92x4xf32>
    %110 = vector.shape_cast %109 : vector<1x1x92x4xf32> to vector<92x4xf32>
    %111 = arith.truncf %110 : vector<92x4xf32> to vector<92x4xbf16>
    %c0_117 = arith.constant 0 : index
    %c15_118 = arith.constant 15 : index
    %c0_119 = arith.constant 0 : index
    %c0_120 = arith.constant 0 : index
    %112 = vector.load %arg4[%c0_117, %c15_118, %c0_119, %c0_120] : memref<1x25x4x2xbf16, #tpu.memory_space<vmem>>, vector<1x1x4x2xbf16>
    %113 = vector.shape_cast %112 : vector<1x1x4x2xbf16> to vector<4x2xbf16>
    %cst_121 = arith.constant dense<0.000000e+00> : vector<92x2xf32>
    %114 = tpu.matmul %111, %113, %cst_121 {dimension_numbers = #tpu.dot_dimension_numbers<[1], [0], [0], [1], [0, 0, 1, 1], [], []>} : vector<92x4xbf16>, vector<4x2xbf16>, vector<92x2xf32> -> vector<92x2xf32>
    %115 = arith.addf %108, %114 : vector<92x2xf32>
    %c0_122 = arith.constant 0 : index
    %c0_123 = arith.constant 0 : index
    %c37 = arith.constant 37 : index
    %c0_124 = arith.constant 0 : index
    %116 = vector.load %arg3[%c0_122, %c0_123, %c37, %c0_124] : memref<1x1x144x4xf32, #tpu.memory_space<vmem>>, vector<1x1x92x4xf32>
    %117 = vector.shape_cast %116 : vector<1x1x92x4xf32> to vector<92x4xf32>
    %118 = arith.truncf %117 : vector<92x4xf32> to vector<92x4xbf16>
    %c0_125 = arith.constant 0 : index
    %c16_126 = arith.constant 16 : index
    %c0_127 = arith.constant 0 : index
    %c0_128 = arith.constant 0 : index
    %119 = vector.load %arg4[%c0_125, %c16_126, %c0_127, %c0_128] : memref<1x25x4x2xbf16, #tpu.memory_space<vmem>>, vector<1x1x4x2xbf16>
    %120 = vector.shape_cast %119 : vector<1x1x4x2xbf16> to vector<4x2xbf16>
    %cst_129 = arith.constant dense<0.000000e+00> : vector<92x2xf32>
    %121 = tpu.matmul %118, %120, %cst_129 {dimension_numbers = #tpu.dot_dimension_numbers<[1], [0], [0], [1], [0, 0, 1, 1], [], []>} : vector<92x4xbf16>, vector<4x2xbf16>, vector<92x2xf32> -> vector<92x2xf32>
    %122 = arith.addf %115, %121 : vector<92x2xf32>
    %c0_130 = arith.constant 0 : index
    %c0_131 = arith.constant 0 : index
    %c38 = arith.constant 38 : index
    %c0_132 = arith.constant 0 : index
    %123 = vector.load %arg3[%c0_130, %c0_131, %c38, %c0_132] : memref<1x1x144x4xf32, #tpu.memory_space<vmem>>, vector<1x1x92x4xf32>
    %124 = vector.shape_cast %123 : vector<1x1x92x4xf32> to vector<92x4xf32>
    %125 = arith.truncf %124 : vector<92x4xf32> to vector<92x4xbf16>
    %c0_133 = arith.constant 0 : index
    %c17 = arith.constant 17 : index
    %c0_134 = arith.constant 0 : index
    %c0_135 = arith.constant 0 : index
    %126 = vector.load %arg4[%c0_133, %c17, %c0_134, %c0_135] : memref<1x25x4x2xbf16, #tpu.memory_space<vmem>>, vector<1x1x4x2xbf16>
    %127 = vector.shape_cast %126 : vector<1x1x4x2xbf16> to vector<4x2xbf16>
    %cst_136 = arith.constant dense<0.000000e+00> : vector<92x2xf32>
    %128 = tpu.matmul %125, %127, %cst_136 {dimension_numbers = #tpu.dot_dimension_numbers<[1], [0], [0], [1], [0, 0, 1, 1], [], []>} : vector<92x4xbf16>, vector<4x2xbf16>, vector<92x2xf32> -> vector<92x2xf32>
    %129 = arith.addf %122, %128 : vector<92x2xf32>
    %c0_137 = arith.constant 0 : index
    %c0_138 = arith.constant 0 : index
    %c39 = arith.constant 39 : index
    %c0_139 = arith.constant 0 : index
    %130 = vector.load %arg3[%c0_137, %c0_138, %c39, %c0_139] : memref<1x1x144x4xf32, #tpu.memory_space<vmem>>, vector<1x1x92x4xf32>
    %131 = vector.shape_cast %130 : vector<1x1x92x4xf32> to vector<92x4xf32>
    %132 = arith.truncf %131 : vector<92x4xf32> to vector<92x4xbf16>
    %c0_140 = arith.constant 0 : index
    %c18 = arith.constant 18 : index
    %c0_141 = arith.constant 0 : index
    %c0_142 = arith.constant 0 : index
    %133 = vector.load %arg4[%c0_140, %c18, %c0_141, %c0_142] : memref<1x25x4x2xbf16, #tpu.memory_space<vmem>>, vector<1x1x4x2xbf16>
    %134 = vector.shape_cast %133 : vector<1x1x4x2xbf16> to vector<4x2xbf16>
    %cst_143 = arith.constant dense<0.000000e+00> : vector<92x2xf32>
    %135 = tpu.matmul %132, %134, %cst_143 {dimension_numbers = #tpu.dot_dimension_numbers<[1], [0], [0], [1], [0, 0, 1, 1], [], []>} : vector<92x4xbf16>, vector<4x2xbf16>, vector<92x2xf32> -> vector<92x2xf32>
    %136 = arith.addf %129, %135 : vector<92x2xf32>
    %c0_144 = arith.constant 0 : index
    %c0_145 = arith.constant 0 : index
    %c40 = arith.constant 40 : index
    %c0_146 = arith.constant 0 : index
    %137 = vector.load %arg3[%c0_144, %c0_145, %c40, %c0_146] : memref<1x1x144x4xf32, #tpu.memory_space<vmem>>, vector<1x1x92x4xf32>
    %138 = vector.shape_cast %137 : vector<1x1x92x4xf32> to vector<92x4xf32>
    %139 = arith.truncf %138 : vector<92x4xf32> to vector<92x4xbf16>
    %c0_147 = arith.constant 0 : index
    %c19 = arith.constant 19 : index
    %c0_148 = arith.constant 0 : index
    %c0_149 = arith.constant 0 : index
    %140 = vector.load %arg4[%c0_147, %c19, %c0_148, %c0_149] : memref<1x25x4x2xbf16, #tpu.memory_space<vmem>>, vector<1x1x4x2xbf16>
    %141 = vector.shape_cast %140 : vector<1x1x4x2xbf16> to vector<4x2xbf16>
    %cst_150 = arith.constant dense<0.000000e+00> : vector<92x2xf32>
    %142 = tpu.matmul %139, %141, %cst_150 {dimension_numbers = #tpu.dot_dimension_numbers<[1], [0], [0], [1], [0, 0, 1, 1], [], []>} : vector<92x4xbf16>, vector<4x2xbf16>, vector<92x2xf32> -> vector<92x2xf32>
    %143 = arith.addf %136, %142 : vector<92x2xf32>
    %c0_151 = arith.constant 0 : index
    %c0_152 = arith.constant 0 : index
    %c48 = arith.constant 48 : index
    %c0_153 = arith.constant 0 : index
    %144 = vector.load %arg3[%c0_151, %c0_152, %c48, %c0_153] : memref<1x1x144x4xf32, #tpu.memory_space<vmem>>, vector<1x1x92x4xf32>
    %145 = vector.shape_cast %144 : vector<1x1x92x4xf32> to vector<92x4xf32>
    %146 = arith.truncf %145 : vector<92x4xf32> to vector<92x4xbf16>
    %c0_154 = arith.constant 0 : index
    %c20 = arith.constant 20 : index
    %c0_155 = arith.constant 0 : index
    %c0_156 = arith.constant 0 : index
    %147 = vector.load %arg4[%c0_154, %c20, %c0_155, %c0_156] : memref<1x25x4x2xbf16, #tpu.memory_space<vmem>>, vector<1x1x4x2xbf16>
    %148 = vector.shape_cast %147 : vector<1x1x4x2xbf16> to vector<4x2xbf16>
    %cst_157 = arith.constant dense<0.000000e+00> : vector<92x2xf32>
    %149 = tpu.matmul %146, %148, %cst_157 {dimension_numbers = #tpu.dot_dimension_numbers<[1], [0], [0], [1], [0, 0, 1, 1], [], []>} : vector<92x4xbf16>, vector<4x2xbf16>, vector<92x2xf32> -> vector<92x2xf32>
    %150 = arith.addf %143, %149 : vector<92x2xf32>
    %c0_158 = arith.constant 0 : index
    %c0_159 = arith.constant 0 : index
    %c49 = arith.constant 49 : index
    %c0_160 = arith.constant 0 : index
    %151 = vector.load %arg3[%c0_158, %c0_159, %c49, %c0_160] : memref<1x1x144x4xf32, #tpu.memory_space<vmem>>, vector<1x1x92x4xf32>
    %152 = vector.shape_cast %151 : vector<1x1x92x4xf32> to vector<92x4xf32>
    %153 = arith.truncf %152 : vector<92x4xf32> to vector<92x4xbf16>
    %c0_161 = arith.constant 0 : index
    %c21 = arith.constant 21 : index
    %c0_162 = arith.constant 0 : index
    %c0_163 = arith.constant 0 : index
    %154 = vector.load %arg4[%c0_161, %c21, %c0_162, %c0_163] : memref<1x25x4x2xbf16, #tpu.memory_space<vmem>>, vector<1x1x4x2xbf16>
    %155 = vector.shape_cast %154 : vector<1x1x4x2xbf16> to vector<4x2xbf16>
    %cst_164 = arith.constant dense<0.000000e+00> : vector<92x2xf32>
    %156 = tpu.matmul %153, %155, %cst_164 {dimension_numbers = #tpu.dot_dimension_numbers<[1], [0], [0], [1], [0, 0, 1, 1], [], []>} : vector<92x4xbf16>, vector<4x2xbf16>, vector<92x2xf32> -> vector<92x2xf32>
    %157 = arith.addf %150, %156 : vector<92x2xf32>
    %c0_165 = arith.constant 0 : index
    %c0_166 = arith.constant 0 : index
    %c50 = arith.constant 50 : index
    %c0_167 = arith.constant 0 : index
    %158 = vector.load %arg3[%c0_165, %c0_166, %c50, %c0_167] : memref<1x1x144x4xf32, #tpu.memory_space<vmem>>, vector<1x1x92x4xf32>
    %159 = vector.shape_cast %158 : vector<1x1x92x4xf32> to vector<92x4xf32>
    %160 = arith.truncf %159 : vector<92x4xf32> to vector<92x4xbf16>
    %c0_168 = arith.constant 0 : index
    %c22 = arith.constant 22 : index
    %c0_169 = arith.constant 0 : index
    %c0_170 = arith.constant 0 : index
    %161 = vector.load %arg4[%c0_168, %c22, %c0_169, %c0_170] : memref<1x25x4x2xbf16, #tpu.memory_space<vmem>>, vector<1x1x4x2xbf16>
    %162 = vector.shape_cast %161 : vector<1x1x4x2xbf16> to vector<4x2xbf16>
    %cst_171 = arith.constant dense<0.000000e+00> : vector<92x2xf32>
    %163 = tpu.matmul %160, %162, %cst_171 {dimension_numbers = #tpu.dot_dimension_numbers<[1], [0], [0], [1], [0, 0, 1, 1], [], []>} : vector<92x4xbf16>, vector<4x2xbf16>, vector<92x2xf32> -> vector<92x2xf32>
    %164 = arith.addf %157, %163 : vector<92x2xf32>
    %c0_172 = arith.constant 0 : index
    %c0_173 = arith.constant 0 : index
    %c51 = arith.constant 51 : index
    %c0_174 = arith.constant 0 : index
    %165 = vector.load %arg3[%c0_172, %c0_173, %c51, %c0_174] : memref<1x1x144x4xf32, #tpu.memory_space<vmem>>, vector<1x1x92x4xf32>
    %166 = vector.shape_cast %165 : vector<1x1x92x4xf32> to vector<92x4xf32>
    %167 = arith.truncf %166 : vector<92x4xf32> to vector<92x4xbf16>
    %c0_175 = arith.constant 0 : index
    %c23 = arith.constant 23 : index
    %c0_176 = arith.constant 0 : index
    %c0_177 = arith.constant 0 : index
    %168 = vector.load %arg4[%c0_175, %c23, %c0_176, %c0_177] : memref<1x25x4x2xbf16, #tpu.memory_space<vmem>>, vector<1x1x4x2xbf16>
    %169 = vector.shape_cast %168 : vector<1x1x4x2xbf16> to vector<4x2xbf16>
    %cst_178 = arith.constant dense<0.000000e+00> : vector<92x2xf32>
    %170 = tpu.matmul %167, %169, %cst_178 {dimension_numbers = #tpu.dot_dimension_numbers<[1], [0], [0], [1], [0, 0, 1, 1], [], []>} : vector<92x4xbf16>, vector<4x2xbf16>, vector<92x2xf32> -> vector<92x2xf32>
    %171 = arith.addf %164, %170 : vector<92x2xf32>
    %c0_179 = arith.constant 0 : index
    %c0_180 = arith.constant 0 : index
    %c52 = arith.constant 52 : index
    %c0_181 = arith.constant 0 : index
    %172 = vector.load %arg3[%c0_179, %c0_180, %c52, %c0_181] : memref<1x1x144x4xf32, #tpu.memory_space<vmem>>, vector<1x1x92x4xf32>
    %173 = vector.shape_cast %172 : vector<1x1x92x4xf32> to vector<92x4xf32>
    %174 = arith.truncf %173 : vector<92x4xf32> to vector<92x4xbf16>
    %c0_182 = arith.constant 0 : index
    %c24_183 = arith.constant 24 : index
    %c0_184 = arith.constant 0 : index
    %c0_185 = arith.constant 0 : index
    %175 = vector.load %arg4[%c0_182, %c24_183, %c0_184, %c0_185] : memref<1x25x4x2xbf16, #tpu.memory_space<vmem>>, vector<1x1x4x2xbf16>
    %176 = vector.shape_cast %175 : vector<1x1x4x2xbf16> to vector<4x2xbf16>
    %cst_186 = arith.constant dense<0.000000e+00> : vector<92x2xf32>
    %177 = tpu.matmul %174, %176, %cst_186 {dimension_numbers = #tpu.dot_dimension_numbers<[1], [0], [0], [1], [0, 0, 1, 1], [], []>} : vector<92x4xbf16>, vector<4x2xbf16>, vector<92x2xf32> -> vector<92x2xf32>
    %178 = arith.addf %171, %177 : vector<92x2xf32>
    %c0_187 = arith.constant 0 : index
    %c0_188 = arith.constant 0 : index
    %179 = vector.load %arg9[%c0_187, %c0_188] : memref<92x2xf32, #tpu.memory_space<vmem>>, vector<92x2xf32>
    %180 = arith.addf %179, %178 : vector<92x2xf32>
    %c0_189 = arith.constant 0 : index
    %c0_190 = arith.constant 0 : index
    %181 = vector.load %arg9[%c0_189, %c0_190] : memref<92x2xf32, #tpu.memory_space<vmem>>, vector<92x2xf32>
    tpu.vector_store %arg9[%c0_189, %c0_190], %180 {strides = array<i32>} : memref<92x2xf32, #tpu.memory_space<vmem>>, vector<92x2xf32>,
    %c4_i32 = arith.constant 4 : i32
    %182 = arith.cmpi eq, %arg2, %c4_i32 : i32
    %183 = arith.extui %182 : i1 to i32
    %c0_i32_191 = arith.constant 0 : i32
    %184 = arith.cmpi ne, %183, %c0_i32_191 : i32
    scf.if %184 {
      %c0_192 = arith.constant 0 : index
      %c0_193 = arith.constant 0 : index
      %185 = vector.load %arg9[%c0_192, %c0_193] : memref<92x2xf32, #tpu.memory_space<vmem>>, vector<92x2xf32>
      %c0_194 = arith.constant 0 : index
      %c0_195 = arith.constant 0 : index
      %186 = vector.load %arg5[%c0_194, %c0_195] : memref<1x2xf32, #tpu.memory_space<vmem>>, vector<1x2xf32>
      %187 = vector.broadcast %186 : vector<1x2xf32> to vector<92x2xf32>
      %188 = arith.addf %185, %187 : vector<92x2xf32>
      %c0_196 = arith.constant 0 : index
      %c0_197 = arith.constant 0 : index
      %c0_198 = arith.constant 0 : index
      %c0_199 = arith.constant 0 : index
      %189 = vector.load %arg6[%c0_196, %c0_197, %c0_198, %c0_199] : memref<1x1x92x2xf32, #tpu.memory_space<vmem>>, vector<1x1x92x2xf32>
      %190 = vector.shape_cast %189 : vector<1x1x92x2xf32> to vector<92x2xf32>
      %191 = vector.shape_cast %188 : vector<92x2xf32> to vector<1x1x92x2xf32>
      tpu.vector_store %arg6[%c0_196, %c0_197, %c0_198, %c0_199], %191 {strides = array<i32>} : memref<1x1x92x2xf32, #tpu.memory_space<vmem>>, vector<1x1x92x2xf32>,
      %192 = tpu.iota {dimensions = array<i32: 0>} : vector<92x1xi32>
      %c12_i32 = arith.constant 12 : i32
      %c0_i32_200 = arith.constant 0 : i32
      %193 = arith.cmpi eq, %c12_i32, %c0_i32_200 : i32
      %c1_i32 = arith.constant 1 : i32
      %194 = arith.select %193, %c1_i32, %c12_i32 : i32
      %195 = vector.broadcast %194 : i32 to vector<92x1xi32>
      %196 = arith.remsi %192, %195 : vector<92x1xi32>
      %c0_i32_201 = arith.constant 0 : i32
      %197 = vector.broadcast %c0_i32_201 : i32 to vector<92x1xi32>
      %198 = arith.cmpi ne, %196, %197 : vector<92x1xi32>
      %c0_i32_202 = arith.constant 0 : i32
      %199 = vector.broadcast %c0_i32_202 : i32 to vector<92x1xi32>
      %200 = arith.cmpi slt, %196, %199 : vector<92x1xi32>
      %c0_i32_203 = arith.constant 0 : i32
      %201 = arith.cmpi slt, %194, %c0_i32_203 : i32
      %202 = vector.broadcast %201 : i1 to vector<92x1xi1>
      %203 = vector.broadcast %202 : vector<92x1xi1> to vector<92x1xi1>
      %204 = arith.xori %200, %203 : vector<92x1xi1>
      %205 = arith.andi %204, %198 : vector<92x1xi1>
      %206 = vector.broadcast %194 : i32 to vector<92x1xi32>
      %207 = arith.addi %196, %206 : vector<92x1xi32>
      %208 = arith.select %205, %207, %196 : vector<92x1xi1>, vector<92x1xi32>
      %c8_i32 = arith.constant 8 : i32
      %209 = vector.broadcast %c8_i32 : i32 to vector<92x1xi32>
      %210 = arith.cmpi slt, %208, %209 : vector<92x1xi32>
      %cst_204 = arith.constant 0.000000e+00 : f32
      %211 = vector.shape_cast %210 : vector<92x1xi1> to vector<92x1xi1>
      %212 = vector.broadcast %211 : vector<92x1xi1> to vector<92x2xi1>
      %213 = vector.broadcast %cst_204 : f32 to vector<92x2xf32>
      %214 = arith.select %212, %188, %213 : vector<92x2xi1>, vector<92x2xf32>
      %cst_205 = arith.constant dense<0.000000e+00> : vector<2xf32>
      %215 = vector.multi_reduction <add>, %214, %cst_205 [0] : vector<92x2xf32> to vector<2xf32>
      %216 = vector.shape_cast %215 : vector<2xf32> to vector<1x2xf32>
      %c0_206 = arith.constant 0 : index
      %c0_207 = arith.constant 0 : index
      %c0_208 = arith.constant 0 : index
      %c0_209 = arith.constant 0 : index
      %217 = vector.load %arg7[%c0_206, %c0_207, %c0_208, %c0_209] : memref<1x1x1x2xf32, #tpu.memory_space<vmem>>, vector<1x1x1x2xf32>
      %218 = vector.shape_cast %217 : vector<1x1x1x2xf32> to vector<1x2xf32>
      %219 = vector.shape_cast %216 : vector<1x2xf32> to vector<1x1x1x2xf32>
      tpu.vector_store %arg7[%c0_206, %c0_207, %c0_208, %c0_209], %219 {strides = array<i32>} : memref<1x1x1x2xf32, #tpu.memory_space<vmem>>, vector<1x1x1x2xf32>,
      %220 = arith.mulf %188, %188 : vector<92x2xf32>
      %cst_210 = arith.constant 0.000000e+00 : f32
      %221 = vector.shape_cast %210 : vector<92x1xi1> to vector<92x1xi1>
      %222 = vector.broadcast %221 : vector<92x1xi1> to vector<92x2xi1>
      %223 = vector.broadcast %cst_210 : f32 to vector<92x2xf32>
      %224 = arith.select %222, %220, %223 : vector<92x2xi1>, vector<92x2xf32>
      %cst_211 = arith.constant dense<0.000000e+00> : vector<2xf32>
      %225 = vector.multi_reduction <add>, %224, %cst_211 [0] : vector<92x2xf32> to vector<2xf32>
      %226 = vector.shape_cast %225 : vector<2xf32> to vector<1x2xf32>
      %c0_212 = arith.constant 0 : index
      %c0_213 = arith.constant 0 : index
      %c0_214 = arith.constant 0 : index
      %c0_215 = arith.constant 0 : index
      %227 = vector.load %arg8[%c0_212, %c0_213, %c0_214, %c0_215] : memref<1x1x1x2xf32, #tpu.memory_space<vmem>>, vector<1x1x1x2xf32>
      %228 = vector.shape_cast %227 : vector<1x1x1x2xf32> to vector<1x2xf32>
      %229 = vector.shape_cast %226 : vector<1x2xf32> to vector<1x1x1x2xf32>
      tpu.vector_store %arg8[%c0_212, %c0_213, %c0_214, %c0_215], %229 {strides = array<i32>} : memref<1x1x1x2xf32, #tpu.memory_space<vmem>>, vector<1x1x1x2xf32>,
    } else {
    }
    return
  }
  func.func @transform_0(%arg0: i32, %arg1: i32, %arg2: i32) -> (i32, i32, i32, i32) {
    %0 = arith.addi %arg1, %arg2 : i32
    %c0_i32 = arith.constant 0 : i32
    %c0_i32_0 = arith.constant 0 : i32
    %c0_i32_1 = arith.constant 0 : i32
    return %arg0, %0, %c0_i32, %c0_i32_0 : i32, i32, i32, i32
  }
  func.func @transform_1(%arg0: i32, %arg1: i32, %arg2: i32) -> (i32, i32, i32, i32) {
    %c0_i32 = arith.constant 0 : i32
    %c0_i32_0 = arith.constant 0 : i32
    %c0_i32_1 = arith.constant 0 : i32
    %c0_i32_2 = arith.constant 0 : i32
    return %arg2, %c0_i32, %c0_i32_0, %c0_i32_1 : i32, i32, i32, i32
  }
  func.func @transform_2(%arg0: i32, %arg1: i32, %arg2: i32) -> (i32, i32) {
    %c0_i32 = arith.constant 0 : i32
    %c0_i32_0 = arith.constant 0 : i32
    %c0_i32_1 = arith.constant 0 : i32
    return %c0_i32, %c0_i32_0 : i32, i32
  }
  func.func @transform_3(%arg0: i32, %arg1: i32, %arg2: i32) -> (i32, i32, i32, i32) {
    %c0_i32 = arith.constant 0 : i32
    %c0_i32_0 = arith.constant 0 : i32
    %c0_i32_1 = arith.constant 0 : i32
    return %arg0, %arg1, %c0_i32, %c0_i32_0 : i32, i32, i32, i32
  }
  func.func @transform_4(%arg0: i32, %arg1: i32, %arg2: i32) -> (i32, i32, i32, i32) {
    %c0_i32 = arith.constant 0 : i32
    %c0_i32_0 = arith.constant 0 : i32
    %c0_i32_1 = arith.constant 0 : i32
    return %arg0, %arg1, %c0_i32, %c0_i32_0 : i32, i32, i32, i32
  }
  func.func @transform_5(%arg0: i32, %arg1: i32, %arg2: i32) -> (i32, i32, i32, i32) {
    %c0_i32 = arith.constant 0 : i32
    %c0_i32_0 = arith.constant 0 : i32
    %c0_i32_1 = arith.constant 0 : i32
    return %arg0, %arg1, %c0_i32, %c0_i32_0 : i32, i32, i32, i32
  }
}

</mosaic_0001>

<bundles_post_ra>
// kernel: tpu_custom_call.1
= control target key start
LH: loop header
LB: loop body
LE: loop exit
PB: predicated region body
PF: predicated region fallthrough
CT: control target
= control target key end

     0   :  { %s5211_s18 = smov 0   ;;  %s5213_s19 = smov 0   ;;  %s6790_s0 = inlined_call_operand.vmem [shape: f32[2,12,144,4], index: 0, kind: input, shape index: {}]   ;;  %s6791_s1 = inlined_call_operand.vmem [shape: bf16[5,25,4,2], index: 1, kind: input, shape index: {}]   ;;  %s6792_s2 = inlined_call_operand.vmem [shape: f32[1,2], index: 2, kind: input, shape index: {}]   ;;  %s6793_s3 = inlined_call_operand.vmem [shape: f32[2,8,92,2], index: 3, kind: output, shape index: {0}]   ;;  %s6794_s4 = inlined_call_operand.vmem [shape: f32[2,8,1,2], index: 4, kind: output, shape index: {1}]   ;;  %s6795_s5 = inlined_call_operand.vmem [shape: f32[2,8,1,2], index: 5, kind: output, shape index: {2}]  }
   0x1   :  { %6811 = sst [smem:[#allocation24_spill]] %s6790_s0  ;;  %s5215_s20 = smov 0  }
   0x2   :  { %s5217_s21 = smov 0   ;;  %s5219_s22 = smov 0  }
   0x3   :  { %s5221_s23 = smov 0   ;;  %s5223_s24 = smov 0  }
   0x4 LB: > { %s28_s25 = sadd.s32 1, %s5166_s21  ;;  %s31_s26 = sadd.s32 1, %s5170_s22  ;;  %s5178_s24 = sphi %s5223_s24, %s16_s24   ;;  %s5174_s23 = sphi %s5221_s23, %s6921_s23   ;;  %s5170_s22 = sphi %s5219_s22, %s6920_s22   ;;  %s5166_s21 = sphi %s5217_s21, %s6919_s21   ;;  %s5162_s20 = sphi %s5215_s20, %s6918_s20   ;;  %s5158_s19 = sphi %s5213_s19, %s6917_s19   ;;  %s5154_s18 = sphi %s5211_s18, %s6916_s18  }
   0x5   : > { %p29_p0 = scmp.ge.s32.totalorder %s28_s25, 5  ;;  %p4300_p1 = scmp.ge.s32.totalorder %s5178_s24, 1 }
   0x6   : > { %p237_p2 = scmp.lt.s32.totalorder %s5178_s24, 81  ;;  %s35_s27 = sadd.s32 1, %s5174_s23 }
   0x7   : > { %s6923_s25 = smov (%p29_p0, %s28_s25), 0  ;;  %s6925_s26 = smov (!%p29_p0, %s31_s26), %s5170_s22 }
   0x8   : > { %p238_p3 = pnand %p4300_p1, %p237_p2  ;;  %p33_p4 = scmp.ge.s32.totalorder %s6925_s26, 8 }
   0xa   : > { %s6927_s26 = smov (%p33_p4, %s6925_s26), 0  ;;  %s6929_s27 = smov (!%p33_p4, %s35_s27), %s5174_s23 }
   0xb   : > { %p37_p5 = scmp.ge.s32.totalorder %s6929_s27, 2  ;;  %241 = sbr.rel (%p238_p3) target bundleno = 627 (0x273), region = 32 }
   0xd   : > { %s6931_s27 = smov (%p37_p5, %s6929_s27), 0 }
   0xe   : > { %6812 = sst [smem:[#allocation3_spill]] %s6931_s27 }
  0x10   : > { %s293_s28 = sadd.s32 %s5154_s18, %s5158_s19  ;;  %p294_p6 = scmp.lt.s32.totalorder %s5162_s20, 1 }
  0x11   : > { %p296_p7 = scmp.lt.s32.totalorder %s293_s28, 11  ;;  %p304_p8 = scmp.lt.s32.totalorder %s5154_s18, 4 }
  0x12   : > { %s6933_s20 = smov (!%p294_p6, %s5162_s20), 1  ;;  %p311_p9 = scmp.lt.s32.totalorder %s5158_s19, 7 }
  0x13   : > { %s6935_s28 = smov (!%p296_p7, %s293_s28), 11  ;;  %s5039_s29 = smul.u32 216, %s6933_s20 }
  0x14   : > { %s5038_s30 = smul.u32 18, %s6935_s28  ;;  %s6813_s0 = sld [smem:[#allocation24_spill]] }
  0x15   : > { %s305_s6 = scalar_select %p304_p8, %s5154_s18, 4 }
  0x16   : > { %s300_s7 = sadd.s32 %s5039_s29, %s5038_s30  ;;  %s4304_s13 = sshll.u32 %s6933_s20, 3 }
  0x17   : > { %s4301_s8 = sshll.u32 %s300_s7, 3  ;;  %s5040_s9 = smul.u32 50, %s305_s6 }
  0x18   : > { %s5042_s17 = smul.u32 96, %s6933_s20  ;;  %s6937_s19 = smov (!%p311_p9, %s5158_s19), 7 }
  0x19   : > { %s5270_s16 = scalar_lea.vmem %s6791_s1, %s5040_s9  ;;  %s5041_s27 = smul.u32 12, %s6937_s19 }
  0x1a   : > { %s5265_s12 = scalar_lea.vmem %s6813_s0, %s4301_s8  ;;  %s5273_s28 = sadd.s32 %s4304_s13, %s6937_s19 }
  0x1b   : > { %s324_s6 = scalar_lea.vmem %s6794_s4, %s5273_s28  ;;  %s331_s10 = scalar_lea.vmem %s6795_s5, %s5273_s28 }
  0x1c   : > { %s315_s11 = sadd.s32 %s5042_s17, %s5041_s27  ;;  %p4306_p10 = scmp.ne.s32.totalorder %s5154_s18, 0 }
  0x1d   : > { %s4303_s0 = sshll.u32 %s315_s11, 3 }
  0x1e   : > { %s5286_s20 = scalar_lea.vmem %s6793_s3, %s4303_s0  ;;  %336 = sbr.rel (%p4306_p10) target bundleno = 43 (0x2b), region = 36 }
  0x23   : > { %vm337_vm0 = vcmask 15360   ;;  %vm349_vm1 = vcmask 11264   ;;  %v5180_v0 = vmov 0.0  }
  0x24   : > { %338 = vst.msk [vmem:[#allocation2] sm:$0xff] %vm337_vm0, %v5180_v0  ;;  %339 = vst.msk [vmem:[#allocation2 + $0x8] sm:$0xff] %vm337_vm0, %v5180_v0 }
  0x25   : > { %340 = vst.msk [vmem:[#allocation2 + $0x10] sm:$0xff] %vm337_vm0, %v5180_v0  ;;  %341 = vst.msk [vmem:[#allocation2 + $0x18] sm:$0xff] %vm337_vm0, %v5180_v0 }
  0x26   : > { %342 = vst.msk [vmem:[#allocation2 + $0x20] sm:$0xff] %vm337_vm0, %v5180_v0  ;;  %343 = vst.msk [vmem:[#allocation2 + $0x28] sm:$0xff] %vm337_vm0, %v5180_v0 }
  0x27   : > { %344 = vst.msk [vmem:[#allocation2 + $0x30] sm:$0xff] %vm337_vm0, %v5180_v0  ;;  %345 = vst.msk [vmem:[#allocation2 + $0x38] sm:$0xff] %vm337_vm0, %v5180_v0 }
  0x28   : > { %346 = vst.msk [vmem:[#allocation2 + $0x40] sm:$0xff] %vm337_vm0, %v5180_v0  ;;  %347 = vst.msk [vmem:[#allocation2 + $0x48] sm:$0xff] %vm337_vm0, %v5180_v0 }
  0x29   : > { %348 = vst.msk [vmem:[#allocation2 + $0x50] sm:$0xff] %vm337_vm0, %v5180_v0 }
  0x2a   : > { %350 = vst.msk [vmem:[#allocation2 + $0x58] sm:$0xf] %vm349_vm1, %v5180_v0 }
  0x2b PF: > { %v4307_v1 = vld [vmem:[%s5270_s16 + $0x2] sm:$0x3]  ;;  %vm409_vm2 = vcmask 1041408   ;;  %v5294_v3 = vld [vmem:[%s5265_s12 + $0x29] sm:$0xff]  ;;  %vm390_vm3 = vcmask 31744   ;;  %v5301_v6 = vld [vmem:[%s5265_s12 + $0x31] sm:$0xff] }
  0x2c   : > { %v5291_v2 = vld [vmem:[%s5265_s12 + $0x21] sm:$0xff]  ;;  %5013 = vmatprep.subr.msk.bf16.mxu1 %vm409_vm2, %v4307_v1  ;;  %v411_v4 = vsel %vm409_vm2, %v4307_v1, 0  ;;  %v5304_v7 = vld [vmem:[%s5265_s12 + $0x39] sm:$0xff]  ;;  %5012 = vmatprep.subr.msk.bf16.mxu0 %vm409_vm2, %v4307_v1  ;;  %v371_v11 = vld [vmem:[%s5265_s12 + $0x9] sm:$0xff]  ;;  %vm3702_vm4 = vcmask 15360   ;;  %vm3714_vm5 = vcmask 11264  }
  0x2d   : > { %v384_v5 = vpack.c.bf16 %v5294_v3, %v5291_v2  ;;  %v369_v8 = vld [vmem:[%s5270_s16] sm:$0x3]  ;;  %5011 = vmatpush3.bf16.msra.mxu1 %v411_v4  ;;  %v385_v9 = vpack.c.bf16 %v5304_v7, %v5301_v6  ;;  %4661 = vmatpush3.bf16.msra.mxu0 %v411_v4  ;;  %v372_v12 = vld [vmem:[%s5265_s12 + $0x11] sm:$0xff]  ;;  %v5323_v17 = vld [vmem:[%s5265_s12 + $0x49] sm:$0xff]  ;;  %p4481_p11 = scmp.ne.s32.totalorder %s5154_s18, 4 }
  0x2e   : > { %v370_v10 = vld [vmem:[%s5265_s12 + $0x1] sm:$0xff]  ;;  %5014 = vmatprep.subr.msk.bf16.mxu1 %vm409_vm2, %v369_v8  ;;  %v513_v13 = vsel %vm409_vm2, %v369_v8, 0  ;;  %v5317_v15 = vld [vmem:[%s5265_s12 + $0x19] sm:$0xff]  ;;  %v5332_v21 = vld [vmem:[%s5265_s12 + $0x51] sm:$0xff] }
  0x2f   : > { %4666 = vmatprep.mubr.msk.bf16.mxu1 %vm390_vm3, %v384_v5  ;;  %v382_v14 = vpack.c.bf16 %v371_v11, %v370_v10  ;;  %v5320_v16 = vld [vmem:[%s5265_s12 + $0x41] sm:$0xff]  ;;  %v383_v18 = vpack.c.bf16 %v5317_v15, %v372_v12  ;;  %v597_v24 = vld [vmem:[%s5265_s12 + $0xa] sm:$0xff]  ;;  %v381_v25 = vld [vmem:[%s5265_s12 + $0x59] sm:$0xf] }
  0x30   : > { %v386_v19 = vpack.c.bf16 %v5323_v17, %v5320_v16  ;;  %v4320_v20 = vld [vmem:[%s5270_s16 + $0x4] sm:$0x3]  ;;  %4667 = vmatmul.mubr.msk.bf16.vlgmr.msra.gmra.mxu1 %vm390_vm3, %v385_v9  ;;  %v598_v27 = vld [vmem:[%s5265_s12 + $0x12] sm:$0xff]  ;;  %v5341_v28 = vld [vmem:[%s5265_s12 + $0x1a] sm:$0xff]  ;;  %v387_v37 = vpack.c.bf16 %v381_v25, %v5332_v21 }
  0x31   : > { %4662 = vmatprep.mubr.msk.bf16.mxu0 %vm390_vm3, %v382_v14  ;;  %v635_v22 = vsel %vm409_vm2, %v4320_v20, 0  ;;  %v596_v23 = vld [vmem:[%s5265_s12 + $0x2] sm:$0xff]  ;;  %4675 = vmatpush3.bf16.msra.mxu1 %v513_v13  ;;  %v5358_v36 = vld [vmem:[%s5265_s12 + $0x2a] sm:$0xff]  ;;  %v5362_v38 = vld [vmem:[%s5265_s12 + $0x18] sm:$0xff]  ;;  %v609_v42 = vpack.c.bf16 %v5341_v28, %v598_v27 }
  0x32   : > { %4663 = vmatmul.mubr.msk.bf16.vlgmr.msra.gmra.mxu0 %vm390_vm3, %v383_v18  ;;  %v608_v26 = vpack.c.bf16 %v597_v24, %v596_v23  ;;  %4670 = vmatprep.mubr.msk.bf16.mxu1 %vm390_vm3, %v386_v19  ;;  %v351_v31 = vld [vmem:[%s5265_s12] sm:$0xff]  ;;  %v352_v32 = vld [vmem:[%s5265_s12 + $0x8] sm:$0xff]  ;;  %v5367_v39 = vld [vmem:[%s5265_s12 + $0x32] sm:$0xff] }
  0x33   : > { %5015 = vmatprep.subr.msk.bf16.mxu0 %vm409_vm2, %v4320_v20  ;;  %v4327_v33 = vld [vmem:[%s5270_s16 + $0x6] sm:$0x3]  ;;  %v4334_v34 = vld [vmem:[%s5270_s16 + $0x8] sm:$0x3]  ;;  %v363_v43 = vpack.c.bf16 %v352_v32, %v351_v31  ;;  %v5379_v45 = vld [vmem:[%s5265_s12 + $0x30] sm:$0xff] }
  0x34   : > { %4689 = vmatpush3.bf16.msra.mxu0 %v635_v22  ;;  %4690 = vmatprep.mubr.msk.bf16.mxu0 %vm390_vm3, %v608_v26  ;;  %v5355_v35 = vld [vmem:[%s5265_s12 + $0x22] sm:$0xff]  ;;  %v903_v50 = vsel %vm409_vm2, %v4334_v34, 0  ;;  %v5391_v51 = vld [vmem:[%s5265_s12 + $0x3a] sm:$0xff]  ;;  %v5407_v56 = vld [vmem:[%s5265_s12 + $0x50] sm:$0xff]  ;;  %v769_v9 = vsel %vm409_vm2, %v4327_v33, 0 }
  0x35   : > { %5016 = vmatprep.subr.msk.bf16.mxu1 %vm409_vm2, %v4327_v33  ;;  %5017 = vmatprep.subr.msk.bf16.mxu0 %vm409_vm2, %v4334_v34  ;;  %v5370_v40 = vld [vmem:[%s5265_s12 + $0x20] sm:$0xff]  ;;  %v5376_v44 = vld [vmem:[%s5265_s12 + $0x28] sm:$0xff]  ;;  %v610_v48 = vpack.c.bf16 %v5358_v36, %v5355_v35  ;;  %v5394_v52 = vld [vmem:[%s5265_s12 + $0x38] sm:$0xff]  ;;  %v611_v8 = vpack.c.bf16 %v5391_v51, %v5367_v39 }
  0x36   : > { %v5397_v53 = vld [vmem:[%s5265_s12 + $0x40] sm:$0xff]  ;;  %v5404_v55 = vld [vmem:[%s5265_s12 + $0x48] sm:$0xff]  ;;  %v353_v58 = vld [vmem:[%s5265_s12 + $0x10] sm:$0xff]  ;;  %v5441_v10 = vpack.c.bf16 %v5376_v44, %v5370_v40  ;;  %v5460_v19 = vpack.c.bf16 %v5394_v52, %v5379_v45 }
  0x37   : > { %v5401_v54 = vld [vmem:[%s5265_s12 + $0x42] sm:$0xff]  ;;  %v5420_v61 = vld [vmem:[%s5265_s12 + $0x4a] sm:$0xff]  ;;  %v5423_v62 = vld [vmem:[%s5265_s12 + $0x52] sm:$0xff]  ;;  %v5433_v5 = vpack.c.bf16 %v5362_v38, %v353_v58  ;;  %v5465_v22 = vpack.c.bf16 %v5404_v55, %v5397_v53 }
  0x38   : > { %4671 = vmatmul.mubr.msk.bf16.gmra.mxu1 %vm390_vm3, %v387_v37  ;;  %v4348_v63 = vld [vmem:[%s5270_s16 + $0xc] sm:$0x3]  ;;  %v612_v11 = vpack.c.bf16 %v5420_v61, %v5401_v54  ;;  %v4341_v12 = vld [vmem:[%s5270_s16 + $0xa] sm:$0x3]  ;;  %v607_v13 = vld [vmem:[%s5265_s12 + $0x5a] sm:$0xf] }
  0x39   : > { %4676 = vmatprep.mubr.msk.bf16.mxu1 %vm390_vm3, %v363_v43  ;;  %v864_v14 = vld [vmem:[%s5265_s12 + $0x4] sm:$0xff]  ;;  %v5455_v18 = vld [vmem:[%s5265_s12 + $0xc] sm:$0xff]  ;;  %v613_v20 = vpack.c.bf16 %v607_v13, %v5423_v62  ;;  %v5469_v24 = vld [vmem:[%s5265_s12 + $0x1b] sm:$0xff]  ;;  %v1171_v13 = vsel %vm409_vm2, %v4348_v63, 0  ;;  %v1037_v4 = vsel %vm409_vm2, %v4341_v12, 0 }
  0x3a   : > { %4691 = vmatmul.mubr.msk.bf16.vlgmr.msra.gmra.mxu0 %vm390_vm3, %v609_v42  ;;  %v876_v23 = vpack.c.bf16 %v5455_v18, %v864_v14  ;;  %v5474_v25 = vld [vmem:[%s5265_s12 + $0x23] sm:$0xff]  ;;  %v5477_v26 = vld [vmem:[%s5265_s12 + $0x2b] sm:$0xff]  ;;  %v5480_v27 = vld [vmem:[%s5265_s12 + $0x33] sm:$0xff] }
  0x3b   : > { %4717 = vmatpush3.bf16.msra.mxu0 %v903_v50  ;;  %4694 = vmatprep.mubr.msk.bf16.mxu0 %vm390_vm3, %v610_v48  ;;  %v362_v31 = vld [vmem:[%s5265_s12 + $0x58] sm:$0xf]  ;;  %v5495_v37 = vld [vmem:[%s5265_s12 + $0x1c] sm:$0xff]  ;;  %v731_v43 = vld [vmem:[%s5265_s12 + $0xb] sm:$0xff]  ;;  %v744_v1 = vpack.c.bf16 %v5477_v26, %v5474_v25 }
  0x3c   : > { %5019 = vmatprep.subr.msk.bf16.mxu0 %vm409_vm2, %v4348_v63  ;;  %v5487_v32 = vld [vmem:[%s5265_s12 + $0x14] sm:$0xff]  ;;  %v730_v42 = vld [vmem:[%s5265_s12 + $0x3] sm:$0xff]  ;;  %v5503_v50 = vld [vmem:[%s5265_s12 + $0x2c] sm:$0xff]  ;;  %v368_v58 = vpack.c.bf16 %v362_v31, %v5407_v56 }
  0x3d   : > { %v5500_v48 = vld [vmem:[%s5265_s12 + $0x24] sm:$0xff]  ;;  %v5515_v14 = vld [vmem:[%s5265_s12 + $0x3b] sm:$0xff]  ;;  %v732_v31 = vld [vmem:[%s5265_s12 + $0x13] sm:$0xff] }
  0x3e   : > { %v5536_v34 = vld [vmem:[%s5265_s12 + $0x3c] sm:$0xff]  ;;  %v5544_v33 = vld [vmem:[%s5265_s12 + $0x4c] sm:$0xff] }
  0x3f   : > { %v4355_v0 = vld [vmem:[%s5270_s16 + $0xe] sm:$0x3]  ;;  %v1133_v60 = vld [vmem:[%s5265_s12 + $0x15] sm:$0xff]  ;;  %v5578_v47 = vld [vmem:[%s5265_s12 + $0x25] sm:$0xff] }
  0x40   : > { %4677 = vmatmul.mubr.msk.bf16.vlgmr.msra.gmra.mxu1 %vm390_vm3, %v5433_v5  ;;  %v1132_v30 = vld [vmem:[%s5265_s12 + $0xd] sm:$0xff]  ;;  %v5584_v59 = vld [vmem:[%s5265_s12 + $0x35] sm:$0xff]  ;;  %v5587_v57 = vld [vmem:[%s5265_s12 + $0x3d] sm:$0xff] }
  0x41   : > { %4703 = vmatpush3.bf16.msra.mxu1 %v769_v9  ;;  %4680 = vmatprep.mubr.msk.bf16.mxu1 %vm390_vm3, %v5441_v10  ;;  %v742_v9 = vpack.c.bf16 %v731_v43, %v730_v42  ;;  %v5525_v42 = vld [vmem:[%s5265_s12 + $0x4b] sm:$0xff]  ;;  %v5528_v43 = vld [vmem:[%s5265_s12 + $0x53] sm:$0xff]  ;;  %v1144_v29 = vpack.c.bf16 %v1133_v60, %v1132_v30  ;;  %6818 = vst [vmem:[#allocation8_spill] sm:$0xff] %v5584_v59  ;;  %6819 = vst [vmem:[#allocation9_spill] sm:$0xff] %v5587_v57 }
  0x42   : > { %4695 = vmatmul.mubr.msk.bf16.gmra.mxu0 %vm390_vm3, %v611_v8  ;;  %5018 = vmatprep.subr.msk.bf16.mxu1 %vm409_vm2, %v4341_v12  ;;  %v877_v8 = vpack.c.bf16 %v5495_v37, %v5487_v32  ;;  %v5566_v12 = vld [vmem:[%s5265_s12 + $0x54] sm:$0xff]  ;;  %v1134_v49 = vld [vmem:[%s5265_s12 + $0x1d] sm:$0xff] }
  0x43   : > { %4698 = vmatprep.mubr.msk.bf16.mxu0 %vm390_vm3, %v612_v11  ;;  %v5510_v11 = vpack.c.bf16 %v5503_v50, %v5500_v48  ;;  %6817 = vst [vmem:[#allocation7_spill] sm:$0xff] %v5566_v12  ;;  %v5581_v41 = vld [vmem:[%s5265_s12 + $0x2d] sm:$0xff]  ;;  %v741_v60 = vld [vmem:[%s5265_s12 + $0x5b] sm:$0xf] }
  0x44   : > { %v747_v46 = vpack.c.bf16 %v741_v60, %v5528_v43  ;;  %v5617_v60 = vld [vmem:[%s5265_s12 + $0x5d] sm:$0xff] }
  0x45   : > { %6814 = vst [vmem:[#allocation4_spill] sm:$0xff] %v5510_v11  ;;  %6823 = vst [vmem:[#allocation13_spill] sm:$0xff] %v5617_v60 }
  0x48   : > { %4681 = vmatmul.mubr.msk.bf16.gmra.mxu1 %vm390_vm3, %v5460_v19 }
  0x49   : > { %4684 = vmatprep.mubr.msk.bf16.mxu1 %vm390_vm3, %v5465_v22 }
  0x4a   : > { %4699 = vmatmul.mubr.msk.bf16.gmra.mxu0 %vm390_vm3, %v613_v20  ;;  %v5518_v20 = vld [vmem:[%s5265_s12 + $0x43] sm:$0xff] }
  0x4b   : > { %4718 = vmatprep.mubr.msk.bf16.mxu0 %vm390_vm3, %v876_v23  ;;  %v4362_v23 = vld [vmem:[%s5270_s16 + $0x10] sm:$0x3] }
  0x4c   : > { %v1439_v30 = vsel %vm409_vm2, %v4362_v23, 0 }
  0x50   : > { %4685 = vmatmul.mubr.msk.bf16.gmra.mxu1 %vm390_vm3, %v368_v58  ;;  %v870_v58 = vld [vmem:[%s5265_s12 + $0x34] sm:$0xff] }
  0x51   : > { %4704 = vmatprep.mubr.msk.bf16.mxu1 %vm390_vm3, %v742_v9  ;;  %v5541_v9 = vld [vmem:[%s5265_s12 + $0x44] sm:$0xff]  ;;  %v5549_v63 = vpack.c.bf16 %v5536_v34, %v870_v58 }
  0x52   : > { %4719 = vmatmul.mubr.msk.bf16.vlgmr.msra.gmra.mxu0 %vm390_vm3, %v877_v8  ;;  %v5556_v8 = vpack.c.bf16 %v5544_v33, %v5541_v9 }
  0x53   : > { %4745 = vmatpush3.bf16.msra.mxu0 %v1171_v13  ;;  %4722 = vmatprep.mubr.msk.bf16.mxu0 %vm390_vm3, %v5510_v11  ;;  %v743_v13 = vpack.c.bf16 %v5469_v24, %v732_v31  ;;  %6815 = vst [vmem:[#allocation5_spill] sm:$0xff] %v5549_v63  ;;  %v875_v31 = vld [vmem:[%s5265_s12 + $0x5c] sm:$0xf] }
  0x54   : > { %5021 = vmatprep.subr.msk.bf16.mxu0 %vm409_vm2, %v4362_v23  ;;  %6816 = vst [vmem:[#allocation6_spill] sm:$0xff] %v5556_v8  ;;  %v1268_v11 = vld [vmem:[%s5265_s12 + $0x1e] sm:$0xff] }
  0x58   : > { %4705 = vmatmul.mubr.msk.bf16.vlgmr.msra.gmra.mxu1 %vm390_vm3, %v743_v13  ;;  %v881_v13 = vpack.c.bf16 %v875_v31, %v5566_v12  ;;  %v1010_v31 = vpack.c.bf16 %v5487_v32, %v5455_v18  ;;  %v5668_v32 = vld [vmem:[%s5265_s12 + $0x27] sm:$0xff]  ;;  %v5671_v18 = vld [vmem:[%s5265_s12 + $0x2f] sm:$0xff] }
  0x59   : > { %4731 = vmatpush3.bf16.msra.mxu1 %v1037_v4  ;;  %4708 = vmatprep.mubr.msk.bf16.mxu1 %vm390_vm3, %v744_v1  ;;  %v745_v4 = vpack.c.bf16 %v5515_v14, %v5480_v27  ;;  %v746_v1 = vpack.c.bf16 %v5525_v42, %v5518_v20  ;;  %6824 = vst [vmem:[#allocation14_spill] sm:$0xff] %v5668_v32  ;;  %6825 = vst [vmem:[#allocation15_spill] sm:$0xff] %v5671_v18 }
  0x5a   : > { %4723 = vmatmul.mubr.msk.bf16.gmra.mxu0 %vm390_vm3, %v5549_v63  ;;  %5020 = vmatprep.subr.msk.bf16.mxu1 %vm409_vm2, %v4355_v0  ;;  %v5696_v63 = vld [vmem:[%s5265_s12 + $0x2e] sm:$0xff] }
  0x5b   : > { %4726 = vmatprep.mubr.msk.bf16.mxu0 %vm390_vm3, %v5556_v8  ;;  %v1146_v8 = vpack.c.bf16 %v5584_v59, %v5581_v41 }
  0x60   : > { %4709 = vmatmul.mubr.msk.bf16.gmra.mxu1 %vm390_vm3, %v745_v4  ;;  %v1145_v4 = vpack.c.bf16 %v5578_v47, %v1134_v49  ;;  %v4376_v49 = vld [vmem:[%s5270_s16 + $0x14] sm:$0x3] }
  0x61   : > { %4712 = vmatprep.mubr.msk.bf16.mxu1 %vm390_vm3, %v746_v1  ;;  %v5610_v1 = vld [vmem:[%s5265_s12 + $0x4d] sm:$0xff]  ;;  %v1707_v59 = vsel %vm409_vm2, %v4376_v49, 0 }
  0x62   : > { %4727 = vmatmul.mubr.msk.bf16.gmra.mxu0 %vm390_vm3, %v881_v13  ;;  %v5607_v13 = vld [vmem:[%s5265_s12 + $0x45] sm:$0xff]  ;;  %6821 = vst [vmem:[#allocation11_spill] sm:$0xff] %v5610_v1 }
  0x63   : > { %4746 = vmatprep.mubr.msk.bf16.mxu0 %vm390_vm3, %v1144_v29  ;;  %6820 = vst [vmem:[#allocation10_spill] sm:$0xff] %v5607_v13  ;;  %v5614_v29 = vld [vmem:[%s5265_s12 + $0x55] sm:$0xff]  ;;  %v1147_v23 = vpack.c.bf16 %v5607_v13, %v5587_v57 }
  0x64   : > { %6822 = vst [vmem:[#allocation12_spill] sm:$0xff] %v5614_v29  ;;  %v5700_v13 = vld [vmem:[%s5265_s12 + $0x36] sm:$0xff] }
  0x68   : > { %4713 = vmatmul.mubr.msk.bf16.gmra.mxu1 %vm390_vm3, %v747_v46  ;;  %v5630_v46 = vpack.c.bf16 %v5500_v48, %v5495_v37  ;;  %v4369_v37 = vld [vmem:[%s5270_s16 + $0x12] sm:$0x3] }
  0x69   : > { %4732 = vmatprep.mubr.msk.bf16.mxu1 %vm390_vm3, %v1010_v31  ;;  %v5635_v31 = vld [vmem:[%s5265_s12 + $0x5c] sm:$0xff]  ;;  %v1400_v48 = vld [vmem:[%s5265_s12 + $0xf] sm:$0xff] }
  0x6a   : > { %4747 = vmatmul.mubr.msk.bf16.vlgmr.msra.gmra.mxu0 %vm390_vm3, %v1145_v4  ;;  %v1305_v4 = vsel %vm409_vm2, %v4355_v0, 0  ;;  %v1143_v0 = vld [vmem:[%s5265_s12 + $0x65] sm:$0xf] }
  0x6b   : > { %4773 = vmatpush3.bf16.msra.mxu0 %v1439_v30  ;;  %4750 = vmatprep.mubr.msk.bf16.mxu0 %vm390_vm3, %v1146_v8  ;;  %v5639_v30 = vpack.c.bf16 %v870_v58, %v5503_v50  ;;  %v1148_v8 = vpack.c.bf16 %v5614_v29, %v5610_v1  ;;  %v1401_v50 = vld [vmem:[%s5265_s12 + $0x17] sm:$0xff]  ;;  %v5658_v58 = vpack.c.bf16 %v5541_v9, %v5536_v34  ;;  %v1009_v34 = vld [vmem:[%s5265_s12 + $0x64] sm:$0xf] }
  0x6c   : > { %5023 = vmatprep.subr.msk.bf16.mxu0 %vm409_vm2, %v4376_v49  ;;  %v5681_v9 = vld [vmem:[%s5265_s12 + $0x3f] sm:$0xff]  ;;  %v1015_v29 = vpack.c.bf16 %v1009_v34, %v5635_v31  ;;  %v1573_v49 = vsel %vm409_vm2, %v4369_v37, 0 }
  0x6d   : > { %v5703_v1 = vld [vmem:[%s5265_s12 + $0x3e] sm:$0xff] }
  0x70   : > { %4733 = vmatmul.mubr.msk.bf16.vlgmr.msra.gmra.mxu1 %vm390_vm3, %v5630_v46 }
  0x71   : > { %4759 = vmatpush3.bf16.msra.mxu1 %v1305_v4  ;;  %4736 = vmatprep.mubr.msk.bf16.mxu1 %vm390_vm3, %v5639_v30  ;;  %v5663_v4 = vpack.c.bf16 %v5566_v12, %v5544_v33  ;;  %v5678_v33 = vld [vmem:[%s5265_s12 + $0x37] sm:$0xff]  ;;  %v5727_v12 = vld [vmem:[%s5265_s12 + $0x5f] sm:$0xff] }
  0x72   : > { %4751 = vmatmul.mubr.msk.bf16.gmra.mxu0 %vm390_vm3, %v1147_v23  ;;  %5022 = vmatprep.subr.msk.bf16.mxu1 %vm409_vm2, %v4369_v37  ;;  %v1149_v23 = vpack.c.bf16 %v1143_v0, %v5617_v60  ;;  %6826 = vst [vmem:[#allocation16_spill] sm:$0xff] %v5678_v33  ;;  %v5693_v60 = vld [vmem:[%s5265_s12 + $0x26] sm:$0xff]  ;;  %v1414_v34 = vpack.c.bf16 %v5678_v33, %v5671_v18  ;;  %v5724_v33 = vld [vmem:[%s5265_s12 + $0x57] sm:$0xff] }
  0x73   : > { %4754 = vmatprep.mubr.msk.bf16.mxu0 %vm390_vm3, %v1148_v8  ;;  %v1412_v8 = vpack.c.bf16 %v1401_v50, %v1400_v48  ;;  %v1402_v48 = vld [vmem:[%s5265_s12 + $0x1f] sm:$0xff]  ;;  %v1266_v50 = vld [vmem:[%s5265_s12 + $0xe] sm:$0xff]  ;;  %6827 = vst [vmem:[#allocation17_spill] sm:$0xff] %v5693_v60  ;;  %v1411_v37 = vld [vmem:[%s5265_s12 + $0x67] sm:$0xf] }
  0x74   : > { %v1413_v0 = vpack.c.bf16 %v5668_v32, %v1402_v48  ;;  %v5714_v48 = vld [vmem:[%s5265_s12 + $0x47] sm:$0xff]  ;;  %v1417_v57 = vpack.c.bf16 %v1411_v37, %v5727_v12  ;;  %v4404_v37 = vld [vmem:[%s5270_s16 + $0x1c] sm:$0x3] }
  0x75   : > { %6828 = vst [vmem:[#allocation18_spill] sm:$0xff] %v5714_v48  ;;  %v5740_v32 = vld [vmem:[%s5265_s12 + $0x4e] sm:$0xff]  ;;  %v1415_v18 = vpack.c.bf16 %v5714_v48, %v5681_v9  ;;  %v4383_v48 = vld [vmem:[%s5270_s16 + $0x16] sm:$0x3] }
  0x78   : > { %4737 = vmatmul.mubr.msk.bf16.gmra.mxu1 %vm390_vm3, %v5658_v58 }
  0x79   : > { %4740 = vmatprep.mubr.msk.bf16.mxu1 %vm390_vm3, %v5663_v4 }
  0x7a   : > { %4755 = vmatmul.mubr.msk.bf16.gmra.mxu0 %vm390_vm3, %v1149_v23  ;;  %v1267_v23 = vld [vmem:[%s5265_s12 + $0x16] sm:$0xff] }
  0x7b   : > { %4774 = vmatprep.mubr.msk.bf16.mxu0 %vm390_vm3, %v1412_v8  ;;  %v1278_v8 = vpack.c.bf16 %v1267_v23, %v1266_v50  ;;  %v5717_v50 = vld [vmem:[%s5265_s12 + $0x4f] sm:$0xff]  ;;  %v4390_v23 = vld [vmem:[%s5270_s16 + $0x18] sm:$0x3] }
  0x80   : > { %4741 = vmatmul.mubr.msk.bf16.gmra.mxu1 %vm390_vm3, %v1015_v29  ;;  %v5745_v29 = vld [vmem:[%s5265_s12 + $0x56] sm:$0xff] }
  0x81   : > { %4760 = vmatprep.mubr.msk.bf16.mxu1 %vm390_vm3, %v1278_v8  ;;  %v5737_v8 = vld [vmem:[%s5265_s12 + $0x46] sm:$0xff] }
  0x82   : > { %4775 = vmatmul.mubr.msk.bf16.vlgmr.msra.gmra.mxu0 %vm390_vm3, %v1413_v0  ;;  %v1279_v0 = vpack.c.bf16 %v5693_v60, %v1268_v11  ;;  %v1280_v11 = vpack.c.bf16 %v5700_v13, %v5696_v63  ;;  %v1416_v60 = vpack.c.bf16 %v5724_v33, %v5717_v50 }
  0x83   : > { %4801 = vmatpush3.bf16.msra.mxu0 %v1707_v59  ;;  %4778 = vmatprep.mubr.msk.bf16.mxu0 %vm390_vm3, %v1414_v34  ;;  %v5748_v59 = vld [vmem:[%s5265_s12 + $0x5e] sm:$0xff]  ;;  %v1281_v34 = vpack.c.bf16 %v5737_v8, %v5703_v1 }
  0x84   : > { %5025 = vmatprep.subr.msk.bf16.mxu0 %vm409_vm2, %v4390_v23 }
  0x88   : > { %4761 = vmatmul.mubr.msk.bf16.vlgmr.msra.gmra.mxu1 %vm390_vm3, %v1279_v0 }
  0x89   : > { %4787 = vmatpush3.bf16.msra.mxu1 %v1573_v49  ;;  %4764 = vmatprep.mubr.msk.bf16.mxu1 %vm390_vm3, %v1280_v11  ;;  %v1282_v49 = vpack.c.bf16 %v5745_v29, %v5740_v32  ;;  %v1975_v11 = vsel %vm409_vm2, %v4390_v23, 0  ;;  %v6833_v23 = vpack.c.bf16 %v5355_v35, %v5341_v28  ;;  %v6836_v28 = vpack.c.bf16 %v5401_v54, %v5391_v51  ;;  %v5850_v35 = vld [vmem:[%s5265_s12 + $0x5a] sm:$0xff]  ;;  %v5869_v54 = vld [vmem:[%s5265_s12 + $0x6a] sm:$0xff] }
  0x8a   : > { %4779 = vmatmul.mubr.msk.bf16.gmra.mxu0 %vm390_vm3, %v1415_v18  ;;  %5024 = vmatprep.subr.msk.bf16.mxu1 %vm409_vm2, %v4383_v48  ;;  %v6829_v18 = vpack.c.bf16 %v5370_v40, %v5362_v38  ;;  %v6831_v38 = vpack.c.bf16 %v5397_v53, %v5394_v52  ;;  %v5794_v40 = vld [vmem:[%s5265_s12 + $0x58] sm:$0xff]  ;;  %v6832_v52 = vpack.c.bf16 %v5407_v56, %v5404_v55  ;;  %v5817_v53 = vld [vmem:[%s5265_s12 + $0x68] sm:$0xff] }
  0x8b   : > { %4782 = vmatprep.mubr.msk.bf16.mxu0 %vm390_vm3, %v1416_v60  ;;  %v1277_v60 = vld [vmem:[%s5265_s12 + $0x66] sm:$0xf]  ;;  %v1550_v55 = vpack.c.bf16 %v5794_v40, %v5407_v56  ;;  %v4418_v56 = vld [vmem:[%s5270_s16 + $0x20] sm:$0x3]  ;;  %v6838_v51 = vpack.c.bf16 %v5423_v62, %v5420_v61 }
  0x8c   : > { %v1283_v0 = vpack.c.bf16 %v1277_v60, %v5748_v59  ;;  %v2243_v60 = vsel %vm409_vm2, %v4404_v37, 0 }
  0x90   : > { %4765 = vmatmul.mubr.msk.bf16.gmra.mxu1 %vm390_vm3, %v1281_v34  ;;  %v6830_v34 = vpack.c.bf16 %v5379_v45, %v5376_v44  ;;  %v1841_v44 = vsel %vm409_vm2, %v4383_v48, 0  ;;  %v1679_v48 = vld [vmem:[%s5265_s12 + $0x70] sm:$0xf] }
  0x91   : > { %4768 = vmatprep.mubr.msk.bf16.mxu1 %vm390_vm3, %v1282_v49 }
  0x92   : > { %4783 = vmatmul.mubr.msk.bf16.gmra.mxu0 %vm390_vm3, %v1417_v57  ;;  %v5797_v57 = vld [vmem:[%s5265_s12 + $0x60] sm:$0xff] }
  0x93   : > { %4802 = vmatprep.mubr.msk.bf16.mxu0 %vm390_vm3, %v6829_v18  ;;  %v5803_v45 = vpack.c.bf16 %v5797_v57, %v5794_v40  ;;  %v6834_v18 = vpack.c.bf16 %v5367_v39, %v5358_v36  ;;  %v4411_v39 = vld [vmem:[%s5270_s16 + $0x1e] sm:$0x3] }
  0x98   : > { %4769 = vmatmul.mubr.msk.bf16.gmra.mxu1 %vm390_vm3, %v1283_v0  ;;  %v6835_v0 = vpack.c.bf16 %v5291_v2, %v5317_v15  ;;  %v6837_v15 = vpack.c.bf16 %v5301_v6, %v5294_v3  ;;  %v1947_v3 = vld [vmem:[%s5265_s12 + $0x72] sm:$0xf]  ;;  %v5878_v6 = vld [vmem:[%s5265_s12 + $0x59] sm:$0xff] }
  0x99   : > { %4788 = vmatprep.mubr.msk.bf16.mxu1 %vm390_vm3, %v5433_v5  ;;  %v4397_v5 = vld [vmem:[%s5270_s16 + $0x1a] sm:$0x3]  ;;  %v1953_v61 = vpack.c.bf16 %v1947_v3, %v5869_v54  ;;  %v6854_v3 = vld [vmem:[#allocation13_spill] sm:$0xff] }
  0x9a   : > { %4803 = vmatmul.mubr.msk.bf16.vlgmr.msra.gmra.mxu0 %vm390_vm3, %v6830_v34  ;;  %v2109_v36 = vsel %vm409_vm2, %v4397_v5, 0  ;;  %v5881_v34 = vld [vmem:[%s5265_s12 + $0x61] sm:$0xff] }
  0x9b   : > { %4829 = vmatpush3.bf16.msra.mxu0 %v1975_v11  ;;  %4806 = vmatprep.mubr.msk.bf16.mxu0 %vm390_vm3, %v6831_v38  ;;  %v5853_v11 = vld [vmem:[%s5265_s12 + $0x62] sm:$0xff]  ;;  %v1818_v62 = vpack.c.bf16 %v5881_v34, %v5878_v6  ;;  %v1813_v38 = vld [vmem:[%s5265_s12 + $0x71] sm:$0xf] }
  0x9c   : > { %5027 = vmatprep.subr.msk.bf16.mxu0 %vm409_vm2, %v4404_v37  ;;  %v1952_v2 = vpack.c.bf16 %v5853_v11, %v5850_v35  ;;  %v6839_v37 = vpack.c.bf16 %v5320_v16, %v5304_v7  ;;  %v6840_v7 = vpack.c.bf16 %v5332_v21, %v5323_v17  ;;  %v5894_v16 = vld [vmem:[%s5265_s12 + $0x69] sm:$0xff]  ;;  %v4432_v17 = vld [vmem:[%s5270_s16 + $0x24] sm:$0x3]  ;;  %v6841_v21 = vpack.c.bf16 %v5474_v25, %v5469_v24  ;;  %v4425_v24 = vld [vmem:[%s5270_s16 + $0x22] sm:$0x3] }
  0x9d   : > { %v2214_v25 = vld [vmem:[%s5265_s12 + $0x6c] sm:$0xff] }
  0xa0   : > { %4789 = vmatmul.mubr.msk.bf16.vlgmr.msra.gmra.mxu1 %vm390_vm3, %v5441_v10  ;;  %v1685_v10 = vpack.c.bf16 %v1679_v48, %v5817_v53 }
  0xa1   : > { %4815 = vmatpush3.bf16.msra.mxu1 %v1841_v44  ;;  %4792 = vmatprep.mubr.msk.bf16.mxu1 %vm390_vm3, %v5460_v19  ;;  %v1545_v19 = vld [vmem:[%s5265_s12 + $0x68] sm:$0xf]  ;;  %v1819_v44 = vpack.c.bf16 %v1813_v38, %v5894_v16  ;;  %v2482_v38 = vld [vmem:[%s5265_s12 + $0x75] sm:$0xff] }
  0xa2   : > { %4807 = vmatmul.mubr.msk.bf16.gmra.mxu0 %vm390_vm3, %v6832_v52  ;;  %5026 = vmatprep.subr.msk.bf16.mxu1 %vm409_vm2, %v4397_v5  ;;  %v1551_v49 = vpack.c.bf16 %v1545_v19, %v5797_v57  ;;  %v2511_v5 = vsel %vm409_vm2, %v4418_v56, 0  ;;  %v2377_v52 = vsel %vm409_vm2, %v4411_v39, 0  ;;  %v2081_v19 = vld [vmem:[%s5265_s12 + $0x73] sm:$0xf] }
  0xa3   : > { %4810 = vmatprep.mubr.msk.bf16.mxu0 %vm390_vm3, %v5803_v45 }
  0xa8   : > { %4793 = vmatmul.mubr.msk.bf16.gmra.mxu1 %vm390_vm3, %v5465_v22 }
  0xa9   : > { %4796 = vmatprep.mubr.msk.bf16.mxu1 %vm390_vm3, %v1550_v55 }
  0xaa   : > { %4811 = vmatmul.mubr.msk.bf16.gmra.mxu0 %vm390_vm3, %v1685_v10  ;;  %v2215_v10 = vld [vmem:[%s5265_s12 + $0x74] sm:$0xf] }
  0xab   : > { %4830 = vmatprep.mubr.msk.bf16.mxu0 %vm390_vm3, %v6833_v23  ;;  %v2221_v55 = vpack.c.bf16 %v2215_v10, %v2214_v25  ;;  %v6845_v23 = vpack.c.bf16 %v5581_v41, %v5578_v47  ;;  %v6850_v41 = vld [vmem:[#allocation11_spill] sm:$0xff]  ;;  %v6851_v47 = vld [vmem:[#allocation10_spill] sm:$0xff] }
  0xb0   : > { %4797 = vmatmul.mubr.msk.bf16.gmra.mxu1 %vm390_vm3, %v1551_v49 }
  0xb1   : > { %4816 = vmatprep.mubr.msk.bf16.mxu1 %vm390_vm3, %v6835_v0  ;;  %v6849_v0 = vld [vmem:[#allocation4_spill] sm:$0xff] }
  0xb2   : > { %4831 = vmatmul.mubr.msk.bf16.vlgmr.msra.gmra.mxu0 %vm390_vm3, %v6834_v18 }
  0xb3   : > { %4857 = vmatpush3.bf16.msra.mxu0 %v2243_v60  ;;  %4834 = vmatprep.mubr.msk.bf16.mxu0 %vm390_vm3, %v6836_v28  ;;  %v6846_v60 = vld [vmem:[#allocation9_spill] sm:$0xff]  ;;  %v6852_v28 = vpack.c.bf16 %v6850_v41, %v6851_v47 }
  0xb4   : > { %5029 = vmatprep.subr.msk.bf16.mxu0 %vm409_vm2, %v4418_v56  ;;  %v6847_v56 = vld [vmem:[#allocation8_spill] sm:$0xff]  ;;  %v6865_v47 = vld [vmem:[#allocation17_spill] sm:$0xff] }
  0xb5   : > { %v6848_v18 = vpack.c.bf16 %v6846_v60, %v6847_v56  ;;  %v6014_v56 = vld [vmem:[%s5270_s16 + $0x2c] sm:$0x3] }
  0xb8   : > { %4817 = vmatmul.mubr.msk.bf16.vlgmr.msra.gmra.mxu1 %vm390_vm3, %v6837_v15  ;;  %v2645_v15 = vsel %vm409_vm2, %v4425_v24, 0 }
  0xb9   : > { %4843 = vmatpush3.bf16.msra.mxu1 %v2109_v36  ;;  %4820 = vmatprep.mubr.msk.bf16.mxu1 %vm390_vm3, %v6839_v37  ;;  %v2480_v36 = vld [vmem:[%s5265_s12 + $0x65] sm:$0xff] }
  0xba   : > { %4835 = vmatmul.mubr.msk.bf16.gmra.mxu0 %vm390_vm3, %v6838_v51  ;;  %5028 = vmatprep.subr.msk.bf16.mxu1 %vm409_vm2, %v4411_v39  ;;  %v6853_v51 = vld [vmem:[#allocation5_spill] sm:$0xff]  ;;  %v4439_v37 = vld [vmem:[%s5270_s16 + $0x26] sm:$0x3] }
  0xbb   : > { %4838 = vmatprep.mubr.msk.bf16.mxu0 %vm390_vm3, %v1952_v2  ;;  %v2481_v2 = vld [vmem:[%s5265_s12 + $0x6d] sm:$0xff] }
  0xbc   : > { %v2488_v39 = vpack.c.bf16 %v2481_v2, %v2480_v36 }
  0xc0   : > { %4821 = vmatmul.mubr.msk.bf16.gmra.mxu1 %vm390_vm3, %v6840_v7  ;;  %v6857_v7 = vld [vmem:[#allocation6_spill] sm:$0xff] }
  0xc1   : > { %4824 = vmatprep.mubr.msk.bf16.mxu1 %vm390_vm3, %v1818_v62 }
  0xc2   : > { %4839 = vmatmul.mubr.msk.bf16.gmra.mxu0 %vm390_vm3, %v1953_v61  ;;  %v6855_v61 = vld [vmem:[#allocation12_spill] sm:$0xff] }
  0xc3   : > { %4858 = vmatprep.mubr.msk.bf16.mxu0 %vm390_vm3, %v5630_v46  ;;  %v2213_v46 = vld [vmem:[%s5265_s12 + $0x64] sm:$0xff]  ;;  %v6856_v62 = vpack.c.bf16 %v6854_v3, %v6855_v61  ;;  %v2913_v61 = vsel %vm409_vm2, %v4439_v37, 0 }
  0xc4   : > { %v2220_v48 = vpack.c.bf16 %v2213_v46, %v5635_v31 }
  0xc8   : > { %4825 = vmatmul.mubr.msk.bf16.gmra.mxu1 %vm390_vm3, %v1819_v44  ;;  %v2483_v44 = vld [vmem:[%s5265_s12 + $0x7d] sm:$0xf] }
  0xc9   : > { %4844 = vmatprep.mubr.msk.bf16.mxu1 %vm390_vm3, %v6841_v21 }
  0xca   : > { %4859 = vmatmul.mubr.msk.bf16.vlgmr.msra.gmra.mxu0 %vm390_vm3, %v5639_v30  ;;  %v6842_v30 = vpack.c.bf16 %v5480_v27, %v5477_v26  ;;  %v5930_v26 = vld [vmem:[%s5265_s12 + $0x5b] sm:$0xff]  ;;  %v5933_v27 = vld [vmem:[%s5265_s12 + $0x63] sm:$0xff] }
  0xcb   : > { %4885 = vmatpush3.bf16.msra.mxu0 %v2511_v5  ;;  %4862 = vmatprep.mubr.msk.bf16.mxu0 %vm390_vm3, %v5658_v58  ;;  %v6843_v58 = vpack.c.bf16 %v5518_v20, %v5515_v14  ;;  %v6844_v14 = vpack.c.bf16 %v5528_v43, %v5525_v42  ;;  %v5945_v20 = vld [vmem:[%s5265_s12 + $0x6b] sm:$0xff]  ;;  %v2779_v42 = vsel %vm409_vm2, %v4432_v17, 0  ;;  %v4446_v43 = vld [vmem:[%s5270_s16 + $0x28] sm:$0x3]  ;;  %v2489_v5 = vpack.c.bf16 %v2483_v44, %v2482_v38 }
  0xcc   : > { %5031 = vmatprep.subr.msk.bf16.mxu0 %vm409_vm2, %v4432_v17  ;;  %v2087_v49 = vpack.c.bf16 %v2081_v19, %v5945_v20  ;;  %v5983_v17 = vpack.c.bf16 %v2214_v25, %v2213_v46  ;;  %v6860_v46 = vld [vmem:[#allocation15_spill] sm:$0xff]  ;;  %v6861_v25 = vld [vmem:[#allocation14_spill] sm:$0xff]  ;;  %v6869_v38 = vpack.c.bf16 %v5703_v1, %v5700_v13  ;;  %v6044_v44 = vld [vmem:[%s5270_s16 + $0x2a] sm:$0x3] }
  0xcd   : > { %v2751_v13 = vld [vmem:[%s5265_s12 + $0x7f] sm:$0xf]  ;;  %v2614_v1 = vld [vmem:[%s5265_s12 + $0x66] sm:$0xff] }
  0xd0   : > { %4845 = vmatmul.mubr.msk.bf16.vlgmr.msra.gmra.mxu1 %vm390_vm3, %v6842_v30 }
  0xd1   : > { %4871 = vmatpush3.bf16.msra.mxu1 %v2377_v52  ;;  %4848 = vmatprep.mubr.msk.bf16.mxu1 %vm390_vm3, %v6843_v58  ;;  %v6858_v52 = vld [vmem:[#allocation7_spill] sm:$0xff] }
  0xd2   : > { %4863 = vmatmul.mubr.msk.bf16.gmra.mxu0 %vm390_vm3, %v5663_v4  ;;  %5030 = vmatprep.subr.msk.bf16.mxu1 %vm409_vm2, %v4425_v24  ;;  %v2086_v4 = vpack.c.bf16 %v5933_v27, %v5930_v26  ;;  %v5995_v24 = vld [vmem:[%s5265_s12 + $0x74] sm:$0xff]  ;;  %v2349_v58 = vld [vmem:[%s5265_s12 + $0x7c] sm:$0xf] }
  0xd3   : > { %4866 = vmatprep.mubr.msk.bf16.mxu0 %vm390_vm3, %v2220_v48  ;;  %v6859_v48 = vpack.c.bf16 %v5635_v31, %v6858_v52 }
  0xd8   : > { %4849 = vmatmul.mubr.msk.bf16.gmra.mxu1 %vm390_vm3, %v6844_v14  ;;  %v2355_v14 = vpack.c.bf16 %v2349_v58, %v5995_v24 }
  0xd9   : > { %4852 = vmatprep.mubr.msk.bf16.mxu1 %vm390_vm3, %v2086_v4 }
  0xda   : > { %4867 = vmatmul.mubr.msk.bf16.gmra.mxu0 %vm390_vm3, %v2221_v55  ;;  %v6862_v55 = vpack.c.bf16 %v6860_v46, %v6861_v25  ;;  %v6871_v46 = vpack.c.bf16 %v5740_v32, %v5737_v8  ;;  %v2615_v25 = vld [vmem:[%s5265_s12 + $0x6e] sm:$0xff] }
  0xdb   : > { %4886 = vmatprep.mubr.msk.bf16.mxu0 %vm390_vm3, %v6845_v23 }
  0xe0   : > { %4853 = vmatmul.mubr.msk.bf16.gmra.mxu1 %vm390_vm3, %v2087_v49 }
  0xe1   : > { %4872 = vmatprep.mubr.msk.bf16.mxu1 %vm390_vm3, %v6849_v0  ;;  %v6863_v0 = vld [vmem:[#allocation16_spill] sm:$0xff] }
  0xe2   : > { %4887 = vmatmul.mubr.msk.bf16.vlgmr.msra.gmra.mxu0 %vm390_vm3, %v6848_v18  ;;  %v6864_v41 = vpack.c.bf16 %v5681_v9, %v6863_v0  ;;  %v2749_v9 = vld [vmem:[%s5265_s12 + $0x6f] sm:$0xff] }
  0xe3   : > { %4913 = vmatpush3.bf16.msra.mxu0 %v2779_v42  ;;  %4890 = vmatprep.mubr.msk.bf16.mxu0 %vm390_vm3, %v6852_v28  ;;  %v3047_v42 = vsel %vm409_vm2, %v4446_v43, 0  ;;  %v6866_v28 = vpack.c.bf16 %v5696_v63, %v6865_v47 }
  0xe4   : > { %5033 = vmatprep.subr.msk.bf16.mxu0 %vm409_vm2, %v4446_v43  ;;  %v6867_v43 = vld [vmem:[#allocation18_spill] sm:$0xff] }
  0xe5   : > { %v6868_v2 = vpack.c.bf16 %v5717_v50, %v6867_v43 }
  0xe8   : > { %4873 = vmatmul.mubr.msk.bf16.vlgmr.msra.gmra.mxu1 %vm390_vm3, %v6853_v51 }
  0xe9   : > { %4899 = vmatpush3.bf16.msra.mxu1 %v2645_v15  ;;  %4876 = vmatprep.mubr.msk.bf16.mxu1 %vm390_vm3, %v6857_v7 }
  0xea   : > { %4891 = vmatmul.mubr.msk.bf16.gmra.mxu0 %vm390_vm3, %v6856_v62  ;;  %5032 = vmatprep.subr.msk.bf16.mxu1 %vm409_vm2, %v4439_v37  ;;  %v2750_v37 = vld [vmem:[%s5265_s12 + $0x77] sm:$0xff] }
  0xeb   : > { %4894 = vmatprep.mubr.msk.bf16.mxu0 %vm390_vm3, %v2488_v39  ;;  %v2748_v39 = vld [vmem:[%s5265_s12 + $0x67] sm:$0xff]  ;;  %v2757_v8 = vpack.c.bf16 %v2751_v13, %v2750_v37 }
  0xec   : > { %v2756_v50 = vpack.c.bf16 %v2749_v9, %v2748_v39 }
  0xf0   : > { %v5985_v21 = vpop.f32.mrf.mxu1  ;;  %4877 = vmatmul.mubr.msk.bf16.gmra.mxu1 %vm390_vm3, %v6859_v48  ;;  %v6870_v48 = vpack.c.bf16 %v5727_v12, %v5724_v33 }
  0xf1   : > { %4880 = vmatprep.mubr.msk.bf16.mxu1 %vm390_vm3, %v5983_v17 }
  0xf2   : > { %v4664_v30 = vpop.f32.mrf.mxu0  ;;  %4895 = vmatmul.mubr.msk.bf16.gmra.mxu0 %vm390_vm3, %v2489_v5  ;;  %v5998_v10 = vpop.f32.mrf.mxu1 }
  0xf3   : > { %4914 = vmatprep.mubr.msk.bf16.mxu0 %vm390_vm3, %v6862_v55 }
  0xf4   : > { %v447_v31 = vpop.f32.mrf.mxu0  ;;  %v6004_v4 = vpop.f32.mrf.mxu1 }
  0xf6   : > { %v4665_v19 = vpop.f32.mrf.mxu0  ;;  %v6007_v23 = vpop.f32.mrf.mxu1 }
  0xf8   : > { %v450_v49 = vpop.f32.mrf.mxu0  ;;  %v6010_v60 = vpop.f32.mrf.mxu1  ;;  %4881 = vmatmul.mubr.msk.bf16.gmra.mxu1 %vm390_vm3, %v2355_v14  ;;  %v3008_v14 = vld [vmem:[%s5265_s12 + $0x30] sm:$0xff] }
  0xf9   : > { %4900 = vmatprep.mubr.msk.bf16.mxu1 %vm390_vm3, %v6866_v28 }
  0xfa   : > { %v4692_v18 = vpop.f32.mrf.mxu0  ;;  %4915 = vmatmul.mubr.msk.bf16.vlgmr.msra.gmra.mxu0 %vm390_vm3, %v6864_v41  ;;  %v6024_v36 = vpop.f32.mrf.mxu1  ;;  %v2622_v41 = vpack.c.bf16 %v2615_v25, %v2614_v1 }
  0xfb   : > { %4941 = vmatpush3.bf16.msra.mxu0 %v3047_v42  ;;  %4918 = vmatprep.mubr.msk.bf16.mxu0 %vm390_vm3, %v6868_v2  ;;  %v6061_v42 = vld [vmem:[%s5265_s12 + $0x38] sm:$0xff] }
  0xfc   : > { %v671_v15 = vpop.f32.mrf.mxu0  ;;  %5035 = vmatprep.subr.msk.bf16.mxu0 %vm409_vm2, %v6014_v56  ;;  %v6034_v51 = vpop.f32.mrf.mxu1 }
  0xfe   : > { %v4693_v63 = vpop.f32.mrf.mxu0  ;;  %v6036_v3 = vpop.f32.mrf.mxu1 }
 0x100   : > { %v674_v62 = vpop.f32.mrf.mxu0  ;;  %v4678_v7 = vpop.f32.mrf.mxu1  ;;  %4901 = vmatmul.mubr.msk.bf16.vlgmr.msra.gmra.mxu1 %vm390_vm3, %v6869_v38 }
 0x101   : > { %v558_v5 = vadd.f32 %v4678_v7, %v4664_v30  ;;  %4927 = vmatpush3.bf16.msra.mxu1 %v2913_v61  ;;  %4904 = vmatprep.mubr.msk.bf16.mxu1 %vm390_vm3, %v6871_v46 }
 0x102   : > { %v4696_v52 = vpop.f32.mrf.mxu0  ;;  %4919 = vmatmul.mubr.msk.bf16.gmra.mxu0 %vm390_vm3, %v6870_v48  ;;  %v549_v58 = vpop.f32.mrf.mxu1  ;;  %5034 = vmatprep.subr.msk.bf16.mxu1 %vm409_vm2, %v6044_v44 }
 0x103   : > { %4922 = vmatprep.mubr.msk.bf16.mxu0 %vm390_vm3, %v2756_v50  ;;  %v550_v30 = vadd.f32 %v549_v58, %v447_v31  ;;  %v6063_v12 = vadd.f32 %v4692_v18, %v558_v5  ;;  %v3020_v31 = vpack.c.bf16 %v6061_v42, %v3008_v14  ;;  %v2617_v50 = vld [vmem:[%s5265_s12 + $0x7e] sm:$0xf] }
 0x104   : > { %v687_v55 = vpop.f32.mrf.mxu0  ;;  %v4679_v33 = vpop.f32.mrf.mxu1 }
 0x105   : > { %v561_v0 = vadd.f32 %v4679_v33, %v4665_v19  ;;  %v6067_v47 = vadd.f32 %v671_v15, %v550_v30  ;;  %v6872_v19 = vpack.c.bf16 %v5748_v59, %v5745_v29  ;;  %v2616_v15 = vld [vmem:[%s5265_s12 + $0x76] sm:$0xff]  ;;  %v3315_v30 = vsel %vm409_vm2, %v6014_v56, 0 }
 0x106   : > { %v4697_v32 = vpop.f32.mrf.mxu0  ;;  %v552_v28 = vpop.f32.mrf.mxu1  ;;  %v3012_v59 = vld [vmem:[%s5265_s12 + $0x50] sm:$0xff]  ;;  %v2623_v48 = vpack.c.bf16 %v2617_v50, %v2616_v15 }
 0x107   : > { %v553_v43 = vadd.f32 %v552_v28, %v450_v49  ;;  %v6070_v18 = vadd.f32 %v4693_v63, %v561_v0  ;;  %v2874_v63 = vld [vmem:[%s5265_s12 + $0x28] sm:$0xff]  ;;  %v3022_v1 = vpack.c.bf16 %v5794_v40, %v3012_v59  ;;  %v2877_v40 = vld [vmem:[%s5265_s12 + $0x40] sm:$0xff]  ;;  %v6114_v28 = vld [vmem:[%s5265_s12 + $0x78] sm:$0xff] }
 0x108   : > { %v690_v2 = vpop.f32.mrf.mxu0  ;;  %v4682_v39 = vpop.f32.mrf.mxu1  ;;  %4905 = vmatmul.mubr.msk.bf16.gmra.mxu1 %vm390_vm3, %v6872_v19  ;;  %v2886_v46 = vpack.c.bf16 %v3008_v14, %v2874_v63 }
 0x109   : > { %v574_v9 = vadd.f32 %v4682_v39, %v5985_v21  ;;  %4908 = vmatprep.mubr.msk.bf16.mxu1 %vm390_vm3, %v2622_v41  ;;  %v6081_v49 = vadd.f32 %v674_v62, %v553_v43  ;;  %v3016_v41 = vld [vmem:[%s5265_s12 + $0x70] sm:$0xff] }
 0x10a   : > { %v4700_v61 = vpop.f32.mrf.mxu0  ;;  %4923 = vmatmul.mubr.msk.bf16.gmra.mxu0 %vm390_vm3, %v2757_v8  ;;  %v565_v7 = vpop.f32.mrf.mxu1  ;;  %v2878_v8 = vld [vmem:[%s5265_s12 + $0x48] sm:$0xff]  ;;  %v3024_v15 = vpack.c.bf16 %v6114_v28, %v3016_v41 }
 0x10b   : > { %4942 = vmatprep.mubr.msk.bf16.mxu0 %vm390_vm3, %v3020_v31  ;;  %v566_v38 = vadd.f32 %v565_v7, %v5998_v10  ;;  %v6087_v5 = vadd.f32 %v4696_v52, %v574_v9  ;;  %v2887_v31 = vpack.c.bf16 %v2877_v40, %v6061_v42  ;;  %v3181_v9 = vsel %vm409_vm2, %v6044_v44, 0 }
 0x10c   : > { %v703_v29 = vpop.f32.mrf.mxu0  ;;  %v4683_v21 = vpop.f32.mrf.mxu1 }
 0x10d   : > { %v577_v37 = vadd.f32 %v4683_v21, %v6004_v4  ;;  %v6090_v62 = vadd.f32 %v687_v55, %v566_v38  ;;  %v6100_v4 = vld [vmem:[%s5270_s16 + $0x30] sm:$0x3] }
 0x10e   : > { %v4701_v58 = vpop.f32.mrf.mxu0  ;;  %v568_v13 = vpop.f32.mrf.mxu1 }
 0x10f   : > { %v569_v25 = vadd.f32 %v568_v13, %v6007_v23  ;;  %v6096_v52 = vadd.f32 %v4697_v32, %v577_v37  ;;  %v3276_v37 = vld [vmem:[%s5265_s12 + $0x32] sm:$0xff] }
 0x110   : > { %v706_v10 = vpop.f32.mrf.mxu0  ;;  %v4686_v33 = vpop.f32.mrf.mxu1  ;;  %4909 = vmatmul.mubr.msk.bf16.gmra.mxu1 %vm390_vm3, %v2623_v48 }
 0x111   : > { %v590_v55 = vadd.f32 %v4686_v33, %v6010_v60  ;;  %4928 = vmatprep.mubr.msk.bf16.mxu1 %vm390_vm3, %v2886_v46  ;;  %v6107_v23 = vadd.f32 %v690_v2, %v569_v25 }
 0x112   : > { %v4720_v14 = vpop.f32.mrf.mxu0  ;;  %4943 = vmatmul.mubr.msk.bf16.vlgmr.msra.gmra.mxu0 %vm390_vm3, %v5465_v22  ;;  %v581_v56 = vpop.f32.mrf.mxu1 }
 0x113   : > { %4969 = vmatpush3.bf16.msra.mxu0 %v3315_v30  ;;  %4946 = vmatprep.mubr.msk.bf16.mxu0 %vm390_vm3, %v3022_v1  ;;  %v582_v0 = vadd.f32 %v581_v56, %v6024_v36  ;;  %v6116_v60 = vadd.f32 %v4700_v61, %v590_v55  ;;  %v3023_v36 = vpack.c.bf16 %v5817_v53, %v5797_v57  ;;  %v6134_v57 = vld [vmem:[%s5270_s16 + $0x2e] sm:$0x3] }
 0x114   : > { %v939_v32 = vpop.f32.mrf.mxu0  ;;  %5037 = vmatprep.subr.msk.bf16.mxu0 %vm409_vm2, %v6100_v4  ;;  %v4687_v22 = vpop.f32.mrf.mxu1  ;;  %v2888_v61 = vpack.c.bf16 %v3012_v59, %v2878_v8  ;;  %v3019_v59 = vld [vmem:[%s5265_s12 + $0x88] sm:$0xf] }
 0x115   : > { %v593_v43 = vadd.f32 %v4687_v22, %v6034_v51  ;;  %v6124_v39 = vadd.f32 %v703_v29, %v582_v0  ;;  %v2885_v0 = vld [vmem:[%s5265_s12 + $0x80] sm:$0xf]  ;;  %v3142_v22 = vld [vmem:[%s5265_s12 + $0x31] sm:$0xff] }
 0x116   : > { %v4721_v2 = vpop.f32.mrf.mxu0  ;;  %v584_v19 = vpop.f32.mrf.mxu1 }
 0x117   : > { %v585_v50 = vadd.f32 %v584_v19, %v6036_v3  ;;  %v6130_v7 = vadd.f32 %v4701_v58, %v593_v43  ;;  %v3018_v3 = vld [vmem:[%s5265_s12 + $0x80] sm:$0xff]  ;;  %v2891_v19 = vpack.c.bf16 %v2885_v0, %v6114_v28 }
 0x118   : > { %v942_v42 = vpop.f32.mrf.mxu0  ;;  %v4706_v51 = vpop.f32.mrf.mxu1  ;;  %4929 = vmatmul.mubr.msk.bf16.vlgmr.msra.gmra.mxu1 %vm390_vm3, %v2887_v31  ;;  %v3277_v58 = vld [vmem:[%s5265_s12 + $0x3a] sm:$0xff]  ;;  %v3025_v25 = vpack.c.bf16 %v3019_v59, %v3018_v3 }
 0x119   : > { %v854_v63 = vadd.f32 %v4706_v51, %v6063_v12  ;;  %4955 = vmatpush3.bf16.msra.mxu1 %v3181_v9  ;;  %v6138_v38 = vadd.f32 %v706_v10, %v585_v50  ;;  %4932 = vmatprep.mubr.msk.bf16.mxu1 %vm390_vm3, %v2888_v61  ;;  %v2890_v10 = vpack.c.bf16 %v3016_v41, %v5817_v53  ;;  %v3279_v41 = vld [vmem:[%s5265_s12 + $0x4a] sm:$0xff]  ;;  %v3143_v31 = vld [vmem:[%s5265_s12 + $0x39] sm:$0xff] }
 0x11a   : > { %v4724_v44 = vpop.f32.mrf.mxu0  ;;  %4947 = vmatmul.mubr.msk.bf16.gmra.mxu0 %vm390_vm3, %v3023_v36  ;;  %v805_v29 = vpop.f32.mrf.mxu1  ;;  %5036 = vmatprep.subr.msk.bf16.mxu1 %vm409_vm2, %v6134_v57  ;;  %v3288_v33 = vpack.c.bf16 %v3277_v58, %v3276_v37  ;;  %v3154_v50 = vpack.c.bf16 %v3143_v31, %v3142_v22  ;;  %v3146_v58 = vld [vmem:[%s5265_s12 + $0x51] sm:$0xff]  ;;  %v3151_v22 = vld [vmem:[%s5265_s12 + $0x79] sm:$0xff] }
 0x11b   : > { %4950 = vmatprep.mubr.msk.bf16.mxu0 %vm390_vm3, %v3024_v15  ;;  %v852_v21 = vadd.f32 %v805_v29, %v6067_v47  ;;  %v6147_v46 = vadd.f32 %v4720_v14, %v854_v63 }
 0x11c   : > { %v955_v48 = vpop.f32.mrf.mxu0  ;;  %v4707_v12 = vpop.f32.mrf.mxu1 }
 0x11d   : > { %v855_v13 = vadd.f32 %v4707_v12, %v6070_v18  ;;  %v6153_v30 = vadd.f32 %v939_v32, %v852_v21  ;;  %v3278_v32 = vld [vmem:[%s5265_s12 + $0x42] sm:$0xff]  ;;  %v3284_v12 = vld [vmem:[%s5265_s12 + $0x72] sm:$0xff] }
 0x11e   : > { %v4725_v1 = vpop.f32.mrf.mxu0  ;;  %v808_v47 = vpop.f32.mrf.mxu1  ;;  %v3289_v15 = vpack.c.bf16 %v3279_v41, %v3278_v32  ;;  %v3150_v41 = vld [vmem:[%s5265_s12 + $0x71] sm:$0xff] }
 0x11f   : > { %v853_v55 = vadd.f32 %v808_v47, %v6081_v49  ;;  %v6156_v40 = vadd.f32 %v4721_v2, %v855_v13  ;;  %v3280_v2 = vld [vmem:[%s5265_s12 + $0x52] sm:$0xff]  ;;  %v3285_v13 = vld [vmem:[%s5265_s12 + $0x7a] sm:$0xff] }
 0x120   : > { %v958_v14 = vpop.f32.mrf.mxu0  ;;  %v4710_v56 = vpop.f32.mrf.mxu1  ;;  %4933 = vmatmul.mubr.msk.bf16.gmra.mxu1 %vm390_vm3, %v5803_v45  ;;  %v3290_v63 = vpack.c.bf16 %v5850_v35, %v3280_v2  ;;  %v3144_v35 = vld [vmem:[%s5265_s12 + $0x41] sm:$0xff] }
 0x121   : > { %v858_v18 = vadd.f32 %v4710_v56, %v6087_v5  ;;  %4936 = vmatprep.mubr.msk.bf16.mxu1 %vm390_vm3, %v2890_v10  ;;  %v6165_v8 = vadd.f32 %v942_v42, %v853_v55  ;;  %v3156_v56 = vpack.c.bf16 %v5878_v6, %v3146_v58  ;;  %v3286_v6 = vld [vmem:[%s5265_s12 + $0x82] sm:$0xff]  ;;  %v3548_v58 = vld [vmem:[%s5265_s12 + $0x54] sm:$0xff] }
 0x122   : > { %v4728_v53 = vpop.f32.mrf.mxu0  ;;  %4951 = vmatmul.mubr.msk.bf16.gmra.mxu0 %vm390_vm3, %v3025_v25  ;;  %v821_v49 = vpop.f32.mrf.mxu1 }
 0x123   : > { %4970 = vmatprep.mubr.msk.bf16.mxu0 %vm390_vm3, %v3288_v33  ;;  %v856_v43 = vadd.f32 %v821_v49, %v6090_v62  ;;  %v6173_v5 = vadd.f32 %v4724_v44, %v858_v18  ;;  %v3583_v44 = vsel %vm409_vm2, %v6100_v4, 0  ;;  %v3291_v33 = vpack.c.bf16 %v5869_v54, %v5853_v11 }
 0x124   : > { %v971_v45 = vpop.f32.mrf.mxu0  ;;  %v4711_v36 = vpop.f32.mrf.mxu1  ;;  %v3292_v18 = vpack.c.bf16 %v3285_v13, %v3284_v12  ;;  %v3549_v12 = vld [vmem:[%s5265_s12 + $0x5c] sm:$0xff] }
 0x125   : > { %v859_v9 = vadd.f32 %v4711_v36, %v6096_v52  ;;  %v6177_v42 = vadd.f32 %v955_v48, %v856_v43 }
 0x126   : > { %v4729_v61 = vpop.f32.mrf.mxu0  ;;  %v824_v51 = vpop.f32.mrf.mxu1 }
 0x127   : > { %v857_v62 = vadd.f32 %v824_v51, %v6107_v23  ;;  %v6183_v28 = vadd.f32 %v4725_v1, %v859_v9  ;;  %v3145_v23 = vld [vmem:[%s5265_s12 + $0x49] sm:$0xff] }
 0x128   : > { %v974_v29 = vpop.f32.mrf.mxu0  ;;  %v4714_v52 = vpop.f32.mrf.mxu1  ;;  %4937 = vmatmul.mubr.msk.bf16.gmra.mxu1 %vm390_vm3, %v2891_v19  ;;  %v3155_v25 = vpack.c.bf16 %v3145_v23, %v3144_v35  ;;  %v3157_v19 = vpack.c.bf16 %v5894_v16, %v5881_v34  ;;  %v3547_v23 = vld [vmem:[%s5265_s12 + $0x4c] sm:$0xff] }
 0x129   : > { %v862_v3 = vadd.f32 %v4714_v52, %v6116_v60  ;;  %4956 = vmatprep.mubr.msk.bf16.mxu1 %vm390_vm3, %v3154_v50  ;;  %v6191_v21 = vadd.f32 %v958_v14, %v857_v62  ;;  %v3158_v50 = vpack.c.bf16 %v3151_v22, %v3150_v41  ;;  %v3152_v52 = vld [vmem:[%s5265_s12 + $0x81] sm:$0xff] }
 0x12a   : > { %v4748_v59 = vpop.f32.mrf.mxu0  ;;  %4971 = vmatmul.mubr.msk.bf16.vlgmr.msra.gmra.mxu0 %vm390_vm3, %v3289_v15  ;;  %v837_v4 = vpop.f32.mrf.mxu1 }
 0x12b   : > { %4997 = vmatpush3.bf16.msra.mxu0 %v3583_v44  ;;  %4974 = vmatprep.mubr.msk.bf16.mxu0 %vm390_vm3, %v3290_v63  ;;  %v860_v48 = vadd.f32 %v837_v4, %v6124_v39  ;;  %v6198_v60 = vadd.f32 %v4728_v53, %v862_v3  ;;  %v3449_v39 = vsel %vm409_vm2, %v6134_v57, 0  ;;  %v3153_v3 = vld [vmem:[%s5265_s12 + $0x89] sm:$0xf]  ;;  %v3410_v4 = vld [vmem:[%s5265_s12 + $0x33] sm:$0xff] }
 0x12c   : > { %v1207_v37 = vpop.f32.mrf.mxu0  ;;  %v4715_v1 = vpop.f32.mrf.mxu1 }
 0x12d   : > { %v863_v10 = vadd.f32 %v4715_v1, %v6130_v7  ;;  %v6203_v55 = vadd.f32 %v971_v45, %v860_v48  ;;  %v3544_v45 = vld [vmem:[%s5265_s12 + $0x34] sm:$0xff] }
 0x12e   : > { %v4749_v47 = vpop.f32.mrf.mxu0  ;;  %v840_v14 = vpop.f32.mrf.mxu1  ;;  %v3411_v48 = vld [vmem:[%s5265_s12 + $0x3b] sm:$0xff] }
 0x12f   : > { %v861_v53 = vadd.f32 %v840_v14, %v6138_v38  ;;  %v6209_v0 = vadd.f32 %v4729_v61, %v863_v10  ;;  %v3287_v38 = vld [vmem:[%s5265_s12 + $0x8a] sm:$0xf]  ;;  %v3422_v14 = vpack.c.bf16 %v3411_v48, %v3410_v4 }
 0x130   : > { %v1210_v7 = vpop.f32.mrf.mxu0  ;;  %v4734_v32 = vpop.f32.mrf.mxu1  ;;  %4957 = vmatmul.mubr.msk.bf16.vlgmr.msra.gmra.mxu1 %vm390_vm3, %v3155_v25  ;;  %v3293_v15 = vpack.c.bf16 %v3287_v38, %v3286_v6  ;;  %v3159_v25 = vpack.c.bf16 %v3153_v3, %v3152_v52  ;;  %v3413_v6 = vld [vmem:[%s5265_s12 + $0x4b] sm:$0xff] }
 0x131   : > { %v1122_v11 = vadd.f32 %v4734_v32, %v6147_v46  ;;  %4983 = vmatpush3.bf16.msra.mxu1 %v3449_v39  ;;  %v6215_v57 = vadd.f32 %v974_v29, %v861_v53  ;;  %4960 = vmatprep.mubr.msk.bf16.mxu1 %vm390_vm3, %v3156_v56  ;;  %v3545_v46 = vld [vmem:[%s5265_s12 + $0x3c] sm:$0xff] }
 0x132   : > { %v4752_v54 = vpop.f32.mrf.mxu0  ;;  %4975 = vmatmul.mubr.msk.bf16.gmra.mxu0 %vm390_vm3, %v3291_v33  ;;  %v1073_v49 = vpop.f32.mrf.mxu1  ;;  %v3556_v63 = vpack.c.bf16 %v3545_v46, %v3544_v45 }
 0x133   : > { %4978 = vmatprep.mubr.msk.bf16.mxu0 %vm390_vm3, %v3292_v18  ;;  %v1120_v31 = vadd.f32 %v1073_v49, %v6153_v30  ;;  %v6225_v2 = vadd.f32 %v4748_v59, %v1122_v11  ;;  %v3558_v18 = vpack.c.bf16 %v3549_v12, %v3548_v58 }
 0x134   : > { %v1223_v43 = vpop.f32.mrf.mxu0  ;;  %v4735_v36 = vpop.f32.mrf.mxu1 }
 0x135   : > { %v1123_v9 = vadd.f32 %v4735_v36, %v6156_v40  ;;  %v6230_v51 = vadd.f32 %v1207_v37, %v1120_v31  ;;  %v3553_v31 = vld [vmem:[%s5265_s12 + $0x7c] sm:$0xff] }
 0x136   : > { %v4753_v61 = vpop.f32.mrf.mxu0  ;;  %v1076_v30 = vpop.f32.mrf.mxu1 }
 0x137   : > { %v1121_v62 = vadd.f32 %v1076_v30, %v6165_v8  ;;  %v6233_v44 = vadd.f32 %v4749_v47, %v1123_v9  ;;  %v3546_v8 = vld [vmem:[%s5265_s12 + $0x44] sm:$0xff] }
 0x138   : > { %v1226_v29 = vpop.f32.mrf.mxu0  ;;  %v4738_v34 = vpop.f32.mrf.mxu1  ;;  %4961 = vmatmul.mubr.msk.bf16.gmra.mxu1 %vm390_vm3, %v3157_v19  ;;  %v3557_v33 = vpack.c.bf16 %v3547_v23, %v3546_v8 }
 0x139   : > { %v1126_v16 = vadd.f32 %v4738_v34, %v6173_v5  ;;  %4964 = vmatprep.mubr.msk.bf16.mxu1 %vm390_vm3, %v3158_v50  ;;  %v6242_v59 = vadd.f32 %v1210_v7, %v1121_v62 }
 0x13a   : > { %v4756_v40 = vpop.f32.mrf.mxu0  ;;  %4979 = vmatmul.mubr.msk.bf16.gmra.mxu0 %vm390_vm3, %v3293_v15  ;;  %v1089_v35 = vpop.f32.mrf.mxu1  ;;  %v3560_v15 = vpack.c.bf16 %v3553_v31, %v5995_v24  ;;  %v3555_v24 = vld [vmem:[%s5265_s12 + $0x8c] sm:$0xf] }
 0x13b   : > { %4998 = vmatprep.mubr.msk.bf16.mxu0 %vm390_vm3, %v3556_v63  ;;  %v1124_v37 = vadd.f32 %v1089_v35, %v6177_v42  ;;  %v6251_v13 = vadd.f32 %v4752_v54, %v1126_v16  ;;  %v3412_v54 = vld [vmem:[%s5265_s12 + $0x43] sm:$0xff]  ;;  %v3419_v16 = vld [vmem:[%s5265_s12 + $0x7b] sm:$0xff] }
 0x13c   : > { %v1239_v5 = vpop.f32.mrf.mxu0  ;;  %v4739_v1 = vpop.f32.mrf.mxu1  ;;  %v3423_v45 = vpack.c.bf16 %v3413_v6, %v3412_v54 }
 0x13d   : > { %v1127_v10 = vadd.f32 %v4739_v1, %v6183_v28  ;;  %v6254_v39 = vadd.f32 %v1223_v43, %v1124_v37 }
 0x13e   : > { %v4757_v47 = vpop.f32.mrf.mxu0  ;;  %v1092_v56 = vpop.f32.mrf.mxu1 }
 0x13f   : > { %v1125_v42 = vadd.f32 %v1092_v56, %v6191_v21  ;;  %v6257_v7 = vadd.f32 %v4753_v61, %v1127_v10  ;;  %v3414_v21 = vld [vmem:[%s5265_s12 + $0x53] sm:$0xff] }
 0x140   : > { %v1242_v53 = vpop.f32.mrf.mxu0  ;;  %v4742_v32 = vpop.f32.mrf.mxu1  ;;  %4965 = vmatmul.mubr.msk.bf16.gmra.mxu1 %vm390_vm3, %v3159_v25  ;;  %v3424_v19 = vpack.c.bf16 %v5930_v26, %v3414_v21  ;;  %v3554_v26 = vld [vmem:[%s5265_s12 + $0x84] sm:$0xff] }
 0x141   : > { %v1130_v28 = vadd.f32 %v4742_v32, %v6198_v60  ;;  %4984 = vmatprep.mubr.msk.bf16.mxu1 %vm390_vm3, %v3422_v14  ;;  %v6265_v49 = vadd.f32 %v1226_v29, %v1125_v42  ;;  %v3561_v23 = vpack.c.bf16 %v3555_v24, %v3554_v26 }
 0x142   : > { %v4776_v11 = vpop.f32.mrf.mxu0  ;;  %4999 = vmatmul.mubr.msk.bf16.vlgmr.msra.gmra.mxu0 %vm390_vm3, %v3557_v33  ;;  %v1105_v38 = vpop.f32.mrf.mxu1 }
 0x143   : > { %5002 = vmatprep.mubr.msk.bf16.mxu0 %vm390_vm3, %v3558_v18  ;;  %v1128_v41 = vadd.f32 %v1105_v38, %v6203_v55  ;;  %v6271_v43 = vadd.f32 %v4756_v40, %v1130_v28 }
 0x144   : > { %v1475_v22 = vpop.f32.mrf.mxu0  ;;  %v4743_v60 = vpop.f32.mrf.mxu1 }
 0x145   : > { %v1131_v46 = vadd.f32 %v4743_v60, %v6209_v0  ;;  %v1262_v9 = vadd.f32 %v1239_v5, %v1128_v41 }
 0x146   : > { %v4777_v36 = vpop.f32.mrf.mxu0  ;;  %v1108_v61 = vpop.f32.mrf.mxu1 }
 0x147   : > { %v1129_v55 = vadd.f32 %v1108_v61, %v6215_v57  ;;  %v1265_v30 = vadd.f32 %v4757_v47, %v1131_v46  ;;  %v3418_v57 = vld [vmem:[%s5265_s12 + $0x73] sm:$0xff] }
 0x148   : > { %v1478_v50 = vpop.f32.mrf.mxu0  ;;  %v4762_v63 = vpop.f32.mrf.mxu1  ;;  %4985 = vmatmul.mubr.msk.bf16.vlgmr.msra.gmra.mxu1 %vm390_vm3, %v3423_v45  ;;  %v3426_v4 = vpack.c.bf16 %v3419_v16, %v3418_v57 }
 0x149   : > { %v1390_v62 = vadd.f32 %v4762_v63, %v6225_v2  ;;  %4988 = vmatprep.mubr.msk.bf16.mxu1 %vm390_vm3, %v3424_v19  ;;  %v1263_v29 = vadd.f32 %v1242_v53, %v1129_v55  ;;  %v3425_v2 = vpack.c.bf16 %v5945_v20, %v5933_v27  ;;  %v3420_v27 = vld [vmem:[%s5265_s12 + $0x83] sm:$0xff]  ;;  %v3421_v20 = vld [vmem:[%s5265_s12 + $0x8b] sm:$0xf] }
 0x14a   : > { %v4780_v0 = vpop.f32.mrf.mxu0  ;;  %5003 = vmatmul.mubr.msk.bf16.gmra.mxu0 %vm390_vm3, %v5983_v17  ;;  %v1341_v34 = vpop.f32.mrf.mxu1  ;;  %v3427_v56 = vpack.c.bf16 %v3421_v20, %v3420_v27 }
 0x14b   : > { %5006 = vmatprep.mubr.msk.bf16.mxu0 %vm390_vm3, %v3560_v15  ;;  %v1388_v40 = vadd.f32 %v1341_v34, %v6230_v51  ;;  %v1524_v3 = vadd.f32 %v4776_v11, %v1390_v62 }
 0x14c   : > { %v1491_v52 = vpop.f32.mrf.mxu0  ;;  %v4763_v8 = vpop.f32.mrf.mxu1 }
 0x14d   : > { %v1391_v17 = vadd.f32 %v4763_v8, %v6233_v44  ;;  %v1522_v48 = vadd.f32 %v1475_v22, %v1388_v40 }
 0x14e   : > { %v4781_v35 = vpop.f32.mrf.mxu0  ;;  %v1344_v37 = vpop.f32.mrf.mxu1 }
 0x14f   : > { %v1389_v5 = vadd.f32 %v1344_v37, %v6242_v59  ;;  %v1525_v12 = vadd.f32 %v4777_v36, %v1391_v17 }
 0x150   : > { %v1494_v58 = vpop.f32.mrf.mxu0  ;;  %v4766_v51 = vpop.f32.mrf.mxu1  ;;  %4989 = vmatmul.mubr.msk.bf16.gmra.mxu1 %vm390_vm3, %v3425_v2 }
 0x151   : > { %v1394_v1 = vadd.f32 %v4766_v51, %v6251_v13  ;;  %4992 = vmatprep.mubr.msk.bf16.mxu1 %vm390_vm3, %v3426_v4  ;;  %v1523_v44 = vadd.f32 %v1478_v50, %v1389_v5 }
 0x152   : > { %v4784_v25 = vpop.f32.mrf.mxu0  ;;  %5007 = vmatmul.mubr.msk.bf16.gmra.mxu0 %vm390_vm3, %v3561_v23  ;;  %v1357_v10 = vpop.f32.mrf.mxu1 }
 0x153   : > { %v1392_v47 = vadd.f32 %v1357_v10, %v6254_v39  ;;  %v1528_v59 = vadd.f32 %v4780_v0, %v1394_v1 }
 0x154   : > { %v1507_v33 = vpop.f32.mrf.mxu0  ;;  %v4767_v14 = vpop.f32.mrf.mxu1 }
 0x155   : > { %v1395_v18 = vadd.f32 %v4767_v14, %v6257_v7  ;;  %v1526_v53 = vadd.f32 %v1491_v52, %v1392_v47 }
 0x156   : > { %v4785_v42 = vpop.f32.mrf.mxu0  ;;  %v1360_v13 = vpop.f32.mrf.mxu1 }
 0x157   : > { %v1393_v32 = vadd.f32 %v1360_v13, %v6265_v49  ;;  %v1529_v11 = vadd.f32 %v4781_v35, %v1395_v18 }
 0x158   : > { %v1510_v28 = vpop.f32.mrf.mxu0  ;;  %v4770_v54 = vpop.f32.mrf.mxu1  ;;  %4993 = vmatmul.mubr.msk.bf16.gmra.mxu1 %vm390_vm3, %v3427_v56 }
 0x159   : > { %v1398_v6 = vadd.f32 %v4770_v54, %v6271_v43  ;;  %v1527_v39 = vadd.f32 %v1494_v58, %v1393_v32 }
 0x15a   : > { %v4804_v38 = vpop.f32.mrf.mxu0  ;;  %v1373_v21 = vpop.f32.mrf.mxu1 }
 0x15b   : > { %v1396_v41 = vadd.f32 %v1373_v21, %v1262_v9  ;;  %v1532_v31 = vadd.f32 %v4784_v25, %v1398_v6 }
 0x15c   : > { %v1743_v22 = vpop.f32.mrf.mxu0  ;;  %v4771_v60 = vpop.f32.mrf.mxu1 }
 0x15d   : > { %v1399_v7 = vadd.f32 %v4771_v60, %v1265_v30  ;;  %v1530_v46 = vadd.f32 %v1507_v33, %v1396_v41 }
 0x15e   : > { %v4805_v45 = vpop.f32.mrf.mxu0  ;;  %v1376_v36 = vpop.f32.mrf.mxu1 }
 0x15f   : > { %v1397_v19 = vadd.f32 %v1376_v36, %v1263_v29  ;;  %v1533_v61 = vadd.f32 %v4785_v42, %v1399_v7 }
 0x160   : > { %v1746_v49 = vpop.f32.mrf.mxu0  ;;  %v4790_v15 = vpop.f32.mrf.mxu1 }
 0x161   : > { %v1658_v55 = vadd.f32 %v4790_v15, %v1524_v3  ;;  %v1531_v63 = vadd.f32 %v1510_v28, %v1397_v19 }
 0x162   : > { %v4808_v50 = vpop.f32.mrf.mxu0  ;;  %v1609_v62 = vpop.f32.mrf.mxu1 }
 0x163   : > { %v1656_v43 = vadd.f32 %v1609_v62, %v1522_v48  ;;  %v1792_v26 = vadd.f32 %v4804_v38, %v1658_v55 }
 0x164   : > { %v1759_v0 = vpop.f32.mrf.mxu0  ;;  %v4791_v34 = vpop.f32.mrf.mxu1 }
 0x165   : > { %v1659_v9 = vadd.f32 %v4791_v34, %v1525_v12  ;;  %v1790_v57 = vadd.f32 %v1743_v22, %v1656_v43 }
 0x166   : > { %v4809_v24 = vpop.f32.mrf.mxu0  ;;  %v1612_v16 = vpop.f32.mrf.mxu1 }
 0x167   : > { %v1657_v30 = vadd.f32 %v1612_v16, %v1523_v44  ;;  %v1793_v52 = vadd.f32 %v4805_v45, %v1659_v9 }
 0x168   : > { %v1762_v40 = vpop.f32.mrf.mxu0  ;;  %v4794_v8 = vpop.f32.mrf.mxu1 }
 0x169   : > { %v1662_v29 = vadd.f32 %v4794_v8, %v1528_v59  ;;  %v1791_v17 = vadd.f32 %v1746_v49, %v1657_v30 }
 0x16a   : > { %v4812_v2 = vpop.f32.mrf.mxu0  ;;  %v1625_v35 = vpop.f32.mrf.mxu1 }
 0x16b   : > { %v1660_v3 = vadd.f32 %v1625_v35, %v1526_v53  ;;  %v1796_v4 = vadd.f32 %v4808_v50, %v1662_v29 }
 0x16c   : > { %v1775_v23 = vpop.f32.mrf.mxu0  ;;  %v4795_v37 = vpop.f32.mrf.mxu1 }
 0x16d   : > { %v1663_v48 = vadd.f32 %v4795_v37, %v1529_v11  ;;  %v1794_v58 = vadd.f32 %v1759_v0, %v1660_v3 }
 0x16e   : > { %v4813_v5 = vpop.f32.mrf.mxu0  ;;  %v1628_v51 = vpop.f32.mrf.mxu1 }
 0x16f   : > { %v1661_v12 = vadd.f32 %v1628_v51, %v1527_v39  ;;  %v1797_v25 = vadd.f32 %v4809_v24, %v1663_v48 }
 0x170   : > { %v1778_v1 = vpop.f32.mrf.mxu0  ;;  %v4798_v27 = vpop.f32.mrf.mxu1 }
 0x171   : > { %v1666_v20 = vadd.f32 %v4798_v27, %v1532_v31  ;;  %v1795_v10 = vadd.f32 %v1762_v40, %v1661_v12 }
 0x172   : > { %v4832_v44 = vpop.f32.mrf.mxu0  ;;  %v1641_v47 = vpop.f32.mrf.mxu1 }
 0x173   : > { %v1664_v33 = vadd.f32 %v1641_v47, %v1530_v46  ;;  %v1800_v14 = vadd.f32 %v4812_v2, %v1666_v20 }
 0x174   : > { %v2011_v59 = vpop.f32.mrf.mxu0  ;;  %v4799_v56 = vpop.f32.mrf.mxu1 }
 0x175   : > { %v1667_v18 = vadd.f32 %v4799_v56, %v1533_v61  ;;  %v1798_v53 = vadd.f32 %v1775_v23, %v1664_v33 }
 0x176   : > { %v4833_v42 = vpop.f32.mrf.mxu0  ;;  %v1644_v13 = vpop.f32.mrf.mxu1 }
 0x177   : > { %v1665_v32 = vadd.f32 %v1644_v13, %v1531_v63  ;;  %v1801_v11 = vadd.f32 %v4813_v5, %v1667_v18 }
 0x178   : > { %v2014_v28 = vpop.f32.mrf.mxu0  ;;  %v4818_v54 = vpop.f32.mrf.mxu1 }
 0x179   : > { %v1926_v6 = vadd.f32 %v4818_v54, %v1792_v26  ;;  %v1799_v39 = vadd.f32 %v1778_v1, %v1665_v32 }
 0x17a   : > { %v4836_v38 = vpop.f32.mrf.mxu0  ;;  %v1877_v21 = vpop.f32.mrf.mxu1 }
 0x17b   : > { %v1924_v41 = vadd.f32 %v1877_v21, %v1790_v57  ;;  %v2060_v31 = vadd.f32 %v4832_v44, %v1926_v6 }
 0x17c   : > { %v2027_v22 = vpop.f32.mrf.mxu0  ;;  %v4819_v60 = vpop.f32.mrf.mxu1 }
 0x17d   : > { %v1927_v7 = vadd.f32 %v4819_v60, %v1793_v52  ;;  %v2058_v46 = vadd.f32 %v2011_v59, %v1924_v41 }
 0x17e   : > { %v4837_v45 = vpop.f32.mrf.mxu0  ;;  %v1880_v36 = vpop.f32.mrf.mxu1 }
 0x17f   : > { %v1925_v19 = vadd.f32 %v1880_v36, %v1791_v17  ;;  %v2061_v61 = vadd.f32 %v4833_v42, %v1927_v7 }
 0x180   : > { %v2030_v49 = vpop.f32.mrf.mxu0  ;;  %v4822_v15 = vpop.f32.mrf.mxu1 }
 0x181   : > { %v1930_v55 = vadd.f32 %v4822_v15, %v1796_v4  ;;  %v2059_v63 = vadd.f32 %v2014_v28, %v1925_v19 }
 0x182   : > { %v4840_v50 = vpop.f32.mrf.mxu0  ;;  %v1893_v62 = vpop.f32.mrf.mxu1 }
 0x183   : > { %v1928_v43 = vadd.f32 %v1893_v62, %v1794_v58  ;;  %v2064_v26 = vadd.f32 %v4836_v38, %v1930_v55 }
 0x184   : > { %v2043_v0 = vpop.f32.mrf.mxu0  ;;  %v4823_v34 = vpop.f32.mrf.mxu1 }
 0x185   : > { %v1931_v9 = vadd.f32 %v4823_v34, %v1797_v25  ;;  %v2062_v57 = vadd.f32 %v2027_v22, %v1928_v43 }
 0x186   : > { %v4841_v24 = vpop.f32.mrf.mxu0  ;;  %v1896_v16 = vpop.f32.mrf.mxu1 }
 0x187   : > { %v1929_v30 = vadd.f32 %v1896_v16, %v1795_v10  ;;  %v2065_v52 = vadd.f32 %v4837_v45, %v1931_v9 }
 0x188   : > { %v2046_v40 = vpop.f32.mrf.mxu0  ;;  %v4826_v8 = vpop.f32.mrf.mxu1 }
 0x189   : > { %v1934_v29 = vadd.f32 %v4826_v8, %v1800_v14  ;;  %v2063_v17 = vadd.f32 %v2030_v49, %v1929_v30 }
 0x18a   : > { %v4860_v2 = vpop.f32.mrf.mxu0  ;;  %v1909_v35 = vpop.f32.mrf.mxu1 }
 0x18b   : > { %v1932_v3 = vadd.f32 %v1909_v35, %v1798_v53  ;;  %v2068_v4 = vadd.f32 %v4840_v50, %v1934_v29 }
 0x18c   : > { %v2279_v23 = vpop.f32.mrf.mxu0  ;;  %v4827_v37 = vpop.f32.mrf.mxu1 }
 0x18d   : > { %v1935_v48 = vadd.f32 %v4827_v37, %v1801_v11  ;;  %v2066_v58 = vadd.f32 %v2043_v0, %v1932_v3 }
 0x18e   : > { %v4861_v5 = vpop.f32.mrf.mxu0  ;;  %v1912_v51 = vpop.f32.mrf.mxu1 }
 0x18f   : > { %v1933_v12 = vadd.f32 %v1912_v51, %v1799_v39  ;;  %v2069_v25 = vadd.f32 %v4841_v24, %v1935_v48 }
 0x190   : > { %v2282_v1 = vpop.f32.mrf.mxu0  ;;  %v4846_v27 = vpop.f32.mrf.mxu1 }
 0x191   : > { %v2194_v20 = vadd.f32 %v4846_v27, %v2060_v31  ;;  %v2067_v10 = vadd.f32 %v2046_v40, %v1933_v12 }
 0x192   : > { %v4864_v44 = vpop.f32.mrf.mxu0  ;;  %v2145_v47 = vpop.f32.mrf.mxu1 }
 0x193   : > { %v2192_v33 = vadd.f32 %v2145_v47, %v2058_v46  ;;  %v2328_v14 = vadd.f32 %v4860_v2, %v2194_v20 }
 0x194   : > { %v2295_v59 = vpop.f32.mrf.mxu0  ;;  %v4847_v56 = vpop.f32.mrf.mxu1 }
 0x195   : > { %v2195_v18 = vadd.f32 %v4847_v56, %v2061_v61  ;;  %v2326_v53 = vadd.f32 %v2279_v23, %v2192_v33 }
 0x196   : > { %v4865_v42 = vpop.f32.mrf.mxu0  ;;  %v2148_v13 = vpop.f32.mrf.mxu1 }
 0x197   : > { %v2193_v32 = vadd.f32 %v2148_v13, %v2059_v63  ;;  %v2329_v11 = vadd.f32 %v4861_v5, %v2195_v18 }
 0x198   : > { %v2298_v28 = vpop.f32.mrf.mxu0  ;;  %v4850_v54 = vpop.f32.mrf.mxu1 }
 0x199   : > { %v2198_v6 = vadd.f32 %v4850_v54, %v2064_v26  ;;  %v2327_v39 = vadd.f32 %v2282_v1, %v2193_v32 }
 0x19a   : > { %v4868_v38 = vpop.f32.mrf.mxu0  ;;  %v2161_v21 = vpop.f32.mrf.mxu1 }
 0x19b   : > { %v2196_v41 = vadd.f32 %v2161_v21, %v2062_v57  ;;  %v2332_v31 = vadd.f32 %v4864_v44, %v2198_v6 }
 0x19c   : > { %v2311_v22 = vpop.f32.mrf.mxu0  ;;  %v4851_v60 = vpop.f32.mrf.mxu1 }
 0x19d   : > { %v2199_v7 = vadd.f32 %v4851_v60, %v2065_v52  ;;  %v2330_v46 = vadd.f32 %v2295_v59, %v2196_v41 }
 0x19e   : > { %v4869_v45 = vpop.f32.mrf.mxu0  ;;  %v2164_v36 = vpop.f32.mrf.mxu1 }
 0x19f   : > { %v2197_v19 = vadd.f32 %v2164_v36, %v2063_v17  ;;  %v2333_v61 = vadd.f32 %v4865_v42, %v2199_v7 }
 0x1a0   : > { %v2314_v49 = vpop.f32.mrf.mxu0  ;;  %v4854_v15 = vpop.f32.mrf.mxu1 }
 0x1a1   : > { %v2202_v55 = vadd.f32 %v4854_v15, %v2068_v4  ;;  %v2331_v63 = vadd.f32 %v2298_v28, %v2197_v19 }
 0x1a2   : > { %v4888_v50 = vpop.f32.mrf.mxu0  ;;  %v2177_v62 = vpop.f32.mrf.mxu1 }
 0x1a3   : > { %v2200_v43 = vadd.f32 %v2177_v62, %v2066_v58  ;;  %v2336_v26 = vadd.f32 %v4868_v38, %v2202_v55 }
 0x1a4   : > { %v2547_v0 = vpop.f32.mrf.mxu0  ;;  %v4855_v34 = vpop.f32.mrf.mxu1 }
 0x1a5   : > { %v2203_v9 = vadd.f32 %v4855_v34, %v2069_v25  ;;  %v2334_v57 = vadd.f32 %v2311_v22, %v2200_v43 }
 0x1a6   : > { %v4889_v24 = vpop.f32.mrf.mxu0  ;;  %v2180_v16 = vpop.f32.mrf.mxu1 }
 0x1a7   : > { %v2201_v30 = vadd.f32 %v2180_v16, %v2067_v10  ;;  %v2337_v52 = vadd.f32 %v4869_v45, %v2203_v9 }
 0x1a8   : > { %v2550_v40 = vpop.f32.mrf.mxu0  ;;  %v4874_v8 = vpop.f32.mrf.mxu1 }
 0x1a9   : > { %v2462_v29 = vadd.f32 %v4874_v8, %v2328_v14  ;;  %v2335_v17 = vadd.f32 %v2314_v49, %v2201_v30 }
 0x1aa   : > { %v4892_v2 = vpop.f32.mrf.mxu0  ;;  %v2413_v35 = vpop.f32.mrf.mxu1 }
 0x1ab   : > { %v2460_v3 = vadd.f32 %v2413_v35, %v2326_v53  ;;  %v6303_v4 = vadd.f32 %v4888_v50, %v2462_v29 }
 0x1ac   : > { %v2563_v23 = vpop.f32.mrf.mxu0  ;;  %v4875_v37 = vpop.f32.mrf.mxu1 }
 0x1ad   : > { %v2463_v48 = vadd.f32 %v4875_v37, %v2329_v11  ;;  %v6305_v58 = vadd.f32 %v2547_v0, %v2460_v3 }
 0x1ae   : > { %v4893_v5 = vpop.f32.mrf.mxu0  ;;  %v2416_v51 = vpop.f32.mrf.mxu1 }
 0x1af   : > { %v2461_v12 = vadd.f32 %v2416_v51, %v2327_v39  ;;  %v6307_v25 = vadd.f32 %v4889_v24, %v2463_v48 }
 0x1b0   : > { %v2566_v1 = vpop.f32.mrf.mxu0  ;;  %v4878_v27 = vpop.f32.mrf.mxu1 }
 0x1b1   : > { %v2466_v20 = vadd.f32 %v4878_v27, %v2332_v31  ;;  %v6309_v10 = vadd.f32 %v2550_v40, %v2461_v12 }
 0x1b2   : > { %v4896_v44 = vpop.f32.mrf.mxu0  ;;  %v2429_v47 = vpop.f32.mrf.mxu1 }
 0x1b3   : > { %v2464_v33 = vadd.f32 %v2429_v47, %v2330_v46  ;;  %v6311_v14 = vadd.f32 %v4892_v2, %v2466_v20 }
 0x1b4   : > { %v2579_v59 = vpop.f32.mrf.mxu0  ;;  %v4879_v56 = vpop.f32.mrf.mxu1 }
 0x1b5   : > { %v2467_v18 = vadd.f32 %v4879_v56, %v2333_v61  ;;  %v6313_v53 = vadd.f32 %v2563_v23, %v2464_v33 }
 0x1b6   : > { %v4897_v42 = vpop.f32.mrf.mxu0  ;;  %v2432_v13 = vpop.f32.mrf.mxu1 }
 0x1b7   : > { %v2465_v32 = vadd.f32 %v2432_v13, %v2331_v63  ;;  %v6315_v11 = vadd.f32 %v4893_v5, %v2467_v18 }
 0x1b8   : > { %v2582_v28 = vpop.f32.mrf.mxu0  ;;  %v4882_v54 = vpop.f32.mrf.mxu1 }
 0x1b9   : > { %v2470_v6 = vadd.f32 %v4882_v54, %v2336_v26  ;;  %v6319_v39 = vadd.f32 %v2566_v1, %v2465_v32 }
 0x1ba   : > { %v6317_v38 = vpop.f32.mrf.mxu0  ;;  %v2445_v21 = vpop.f32.mrf.mxu1 }
 0x1bb   : > { %v2468_v41 = vadd.f32 %v2445_v21, %v2334_v57  ;;  %v6323_v31 = vadd.f32 %v4896_v44, %v2470_v6 }
 0x1bc   : > { %v6321_v22 = vpop.f32.mrf.mxu0  ;;  %v4883_v60 = vpop.f32.mrf.mxu1 }
 0x1bd   : > { %v2471_v7 = vadd.f32 %v4883_v60, %v2337_v52  ;;  %v6327_v46 = vadd.f32 %v2579_v59, %v2468_v41 }
 0x1be   : > { %v6325_v45 = vpop.f32.mrf.mxu0  ;;  %v2448_v36 = vpop.f32.mrf.mxu1 }
 0x1bf   : > { %v2469_v19 = vadd.f32 %v2448_v36, %v2335_v17  ;;  %v6331_v61 = vadd.f32 %v4897_v42, %v2471_v7 }
 0x1c0   : > { %v6329_v49 = vpop.f32.mrf.mxu0  ;;  %v4902_v15 = vpop.f32.mrf.mxu1 }
 0x1c1   : > { %v6335_v50 = vadd.f32 %v2582_v28, %v2469_v19 }
 0x1c2   : > { %v6333_v55 = vpop.f32.mrf.mxu0  ;;  %v2681_v63 = vpop.f32.mrf.mxu1 }
 0x1c3   : > { %6873 = vst [vmem:[#allocation9_spill] sm:$0xff] %v6335_v50 }
 0x1c4   : > { %v6337_v62 = vpop.f32.mrf.mxu0  ;;  %v4903_v43 = vpop.f32.mrf.mxu1 }
 0x1c6   : > { %v6339_v0 = vpop.f32.mrf.mxu0  ;;  %v2684_v26 = vpop.f32.mrf.mxu1 }
 0x1c8   : > { %v6341_v34 = vpop.f32.mrf.mxu0  ;;  %v4906_v9 = vpop.f32.mrf.mxu1 }
 0x1ca   : > { %v6343_v24 = vpop.f32.mrf.mxu0  ;;  %v6345_v57 = vpop.f32.mrf.mxu1 }
 0x1cc   : > { %v6347_v16 = vpop.f32.mrf.mxu0  ;;  %v6349_v30 = vpop.f32.mrf.mxu1 }
 0x1ce   : > { %v6351_v40 = vpop.f32.mrf.mxu0  ;;  %v6353_v52 = vpop.f32.mrf.mxu1 }
 0x1cf   : > { %6874 = vst [vmem:[#allocation8_spill] sm:$0xff] %v6351_v40 }
 0x1d0   : > { %v6355_v8 = vpop.f32.mrf.mxu0  ;;  %v6357_v29 = vpop.f32.mrf.mxu1 }
 0x1d1   : > { %6875 = vst [vmem:[#allocation4_spill] sm:$0xff] %v6355_v8 }
 0x1d2   : > { %v4944_v2 = vpop.f32.mrf.mxu0  ;;  %v6359_v17 = vpop.f32.mrf.mxu1 }
 0x1d4   : > { %v6361_v35 = vpop.f32.mrf.mxu0  ;;  %v6363_v3 = vpop.f32.mrf.mxu1 }
 0x1d6   : > { %v6365_v23 = vpop.f32.mrf.mxu0  ;;  %v6367_v37 = vpop.f32.mrf.mxu1 }
 0x1d7   : > { %6876 = vst [vmem:[#allocation11_spill] sm:$0xff] %v6367_v37 }
 0x1d8   : > { %v6369_v48 = vpop.f32.mrf.mxu0  ;;  %v4930_v5 = vpop.f32.mrf.mxu1 }
 0x1da   : > { %v6371_v51 = vpop.f32.mrf.mxu0  ;;  %v2949_v12 = vpop.f32.mrf.mxu1 }
 0x1dc   : > { %v6373_v1 = vpop.f32.mrf.mxu0  ;;  %v4931_v27 = vpop.f32.mrf.mxu1 }
 0x1de   : > { %v6375_v20 = vpop.f32.mrf.mxu0  ;;  %v2952_v44 = vpop.f32.mrf.mxu1 }
 0x1df   : > { %6877 = vst [vmem:[#allocation10_spill] sm:$0xff] %v6375_v20 }
 0x1e0   : > { %v6377_v47 = vpop.f32.mrf.mxu0  ;;  %v4934_v33 = vpop.f32.mrf.mxu1 }
 0x1e1   : > { %6878 = vst [vmem:[#allocation5_spill] sm:$0xff] %v6377_v47 }
 0x1e2   : > { %v6379_v59 = vpop.f32.mrf.mxu0  ;;  %v2965_v56 = vpop.f32.mrf.mxu1 }
 0x1e3   : > { %6879 = vst [vmem:[#allocation13_spill] sm:$0xff] %v6379_v59 }
 0x1e4   : > { %v6381_v18 = vpop.f32.mrf.mxu0  ;;  %v6383_v42 = vpop.f32.mrf.mxu1 }
 0x1e5   : > { %6880 = vst [vmem:[#allocation12_spill] sm:$0xff] %v6381_v18 }
 0x1e6   : > { %v6385_v13 = vpop.f32.mrf.mxu0  ;;  %v6387_v32 = vpop.f32.mrf.mxu1 }
 0x1e7   : > { %6881 = vst [vmem:[#allocation6_spill] sm:$0xff] %v6385_v13 }
 0x1e8   : > { %v6389_v28 = vpop.f32.mrf.mxu0  ;;  %v6391_v54 = vpop.f32.mrf.mxu1 }
 0x1e9   : > { %6882 = vst [vmem:[#allocation7_spill] sm:$0xff] %v6389_v28  ;;  %6883 = vst [vmem:[#allocation15_spill] sm:$0xff] %v6391_v54  ;;  %v2728_v54 = vadd.f32 %v2681_v63, %v6305_v58  ;;  %v2734_v58 = vadd.f32 %v4906_v9, %v6311_v14  ;;  %v2735_v14 = vadd.f32 %v6349_v30, %v6315_v11 }
 0x1ea   : > { %v4972_v6 = vpop.f32.mrf.mxu0  ;;  %v6393_v21 = vpop.f32.mrf.mxu1  ;;  %v2738_v11 = vadd.f32 %v6357_v29, %v6323_v31 }
 0x1eb   : > { %6884 = vst [vmem:[#allocation14_spill] sm:$0xff] %v6393_v21  ;;  %v2730_v21 = vadd.f32 %v4902_v15, %v6303_v4  ;;  %v2862_v15 = vadd.f32 %v6321_v22, %v2728_v54  ;;  %v2868_v9 = vadd.f32 %v6333_v55, %v2734_v58 }
 0x1ec   : > { %v6395_v41 = vpop.f32.mrf.mxu0  ;;  %v6397_v60 = vpop.f32.mrf.mxu1 }
 0x1ed   : > { %6885 = vst [vmem:[#allocation16_spill] sm:$0xff] %v6397_v60  ;;  %v2864_v37 = vadd.f32 %v6317_v38, %v2730_v21  ;;  %v2732_v38 = vadd.f32 %v6345_v57, %v6313_v53  ;;  %v2733_v53 = vadd.f32 %v6353_v52, %v6319_v39  ;;  %v3002_v57 = vadd.f32 %v4934_v33, %v2868_v9 }
 0x1ee   : > { %v6399_v7 = vpop.f32.mrf.mxu0  ;;  %v6401_v36 = vpop.f32.mrf.mxu1  ;;  %v2736_v39 = vadd.f32 %v6359_v17, %v6327_v46 }
 0x1ef   : > { %6886 = vst [vmem:[#allocation17_spill] sm:$0xff] %v6401_v36  ;;  %v2998_v4 = vadd.f32 %v4930_v5, %v2864_v37  ;;  %v2867_v31 = vadd.f32 %v6341_v34, %v2733_v53  ;;  %v3136_v29 = vadd.f32 %v6371_v51, %v3002_v57  ;;  %v3680_v34 = vld [vmem:[#allocation2 + $0x10] sm:$0xff]  ;;  %v6900_v57 = vld [vmem:[#allocation5_spill] sm:$0xff] }
 0x1f0   : > { %v6403_v19 = vpop.f32.mrf.mxu0  ;;  %v4958_v13 = vpop.f32.mrf.mxu1  ;;  %v2870_v51 = vadd.f32 %v6347_v16, %v2736_v39 }
 0x1f1   : > { %6887 = vst [vmem:[#allocation18_spill] sm:$0xff] %v6403_v19  ;;  %v3132_v22 = vadd.f32 %v4944_v2, %v2998_v4  ;;  %v3001_v17 = vadd.f32 %v6387_v32, %v2867_v31  ;;  %v6904_v31 = vld [vmem:[#allocation13_spill] sm:$0xff] }
 0x1f2   : > { %v6405_v18 = vpop.f32.mrf.mxu0  ;;  %v3217_v59 = vpop.f32.mrf.mxu1 }
 0x1f3   : > { %6888 = vst [vmem:[#allocation19_spill] sm:$0xff] %v6405_v18  ;;  %v2731_v18 = vadd.f32 %v4903_v43, %v6307_v25 }
 0x1f4   : > { %v6407_v28 = vpop.f32.mrf.mxu0  ;;  %v4959_v8 = vpop.f32.mrf.mxu1 }
 0x1f5   : > { %6889 = vst [vmem:[#allocation20_spill] sm:$0xff] %v6407_v28  ;;  %v2865_v25 = vadd.f32 %v6325_v45, %v2731_v18 }
 0x1f6   : > { %v6409_v47 = vpop.f32.mrf.mxu0  ;;  %v3220_v40 = vpop.f32.mrf.mxu1 }
 0x1f7   : > { %6890 = vst [vmem:[#allocation21_spill] sm:$0xff] %v6409_v47  ;;  %v2729_v47 = vadd.f32 %v2684_v26, %v6309_v10  ;;  %v2999_v10 = vadd.f32 %v4931_v27, %v2865_v25  ;;  %v6893_v25 = vld [vmem:[#allocation9_spill] sm:$0xff] }
 0x1f8   : > { %v6412_v20 = vpop.f32.mrf.mxu0  ;;  %v4962_v60 = vpop.f32.mrf.mxu1  ;;  %v6897_v16 = vld [vmem:[#allocation18_spill] sm:$0xff] }
 0x1f9   : > { %6891 = vst [vmem:[#allocation22_spill] sm:$0xff] %v6412_v20  ;;  %v2863_v26 = vadd.f32 %v6329_v49, %v2729_v47  ;;  %v2866_v49 = vadd.f32 %v6337_v62, %v2732_v38  ;;  %v3133_v55 = vadd.f32 %v6365_v23, %v2999_v10  ;;  %v2869_v47 = vadd.f32 %v6339_v0, %v2735_v14  ;;  %v6895_v10 = vld [vmem:[#allocation15_spill] sm:$0xff] }
 0x1fa   : > { %v6415_v36 = vpop.f32.mrf.mxu0  ;;  %v6417_v19 = vpop.f32.mrf.mxu1  ;;  %v2872_v0 = vadd.f32 %v6343_v24, %v2738_v11  ;;  %v3681_v11 = vld [vmem:[#allocation2 + $0x18] sm:$0xff] }
 0x1fb   : > { %6892 = vst [vmem:[#allocation23_spill] sm:$0xff] %v6415_v36  ;;  %v2996_v36 = vadd.f32 %v2949_v12, %v2862_v15  ;;  %v2997_v45 = vadd.f32 %v2952_v44, %v2863_v26  ;;  %v3266_v12 = vadd.f32 %v4958_v13, %v3132_v22  ;;  %v3000_v44 = vadd.f32 %v2965_v56, %v2866_v49 }
 0x1fc   : > { %v6421_v28 = vpop.f32.mrf.mxu0  ;;  %v6423_v50 = vpop.f32.mrf.mxu1  ;;  %v3267_v52 = vadd.f32 %v4959_v8, %v3133_v55  ;;  %v2739_v8 = vadd.f32 %v6363_v3, %v6331_v61  ;;  %v3006_v26 = vadd.f32 %v6895_v10, %v2872_v0  ;;  %v6896_v3 = vld [vmem:[#allocation10_spill] sm:$0xff]  ;;  %v3135_v49 = vadd.f32 %v6900_v57, %v3001_v17  ;;  %v6901_v55 = vld [vmem:[#allocation19_spill] sm:$0xff] }
 0x1fd   : > { %v3130_v18 = vadd.f32 %v6361_v35, %v2996_v36  ;;  %v3131_v62 = vadd.f32 %v6369_v48, %v2997_v45  ;;  %v3400_v33 = vadd.f32 %v4972_v6, %v3266_v12  ;;  %v3003_v36 = vadd.f32 %v6383_v42, %v2869_v47  ;;  %v6898_v12 = vld [vmem:[#allocation14_spill] sm:$0xff] }
 0x1fe   : > { %v6427_v20 = vpop.f32.mrf.mxu0  ;;  %v6430_v63 = vpop.f32.mrf.mxu1  ;;  %v3270_v48 = vadd.f32 %v4962_v60, %v3136_v29  ;;  %v3134_v42 = vadd.f32 %v6373_v1, %v3000_v44  ;;  %v3401_v24 = vadd.f32 %v6399_v7, %v3267_v52  ;;  %v3678_v60 = vld [vmem:[#allocation2] sm:$0xff]  ;;  %v3004_v7 = vadd.f32 %v6898_v12, %v2870_v51 }
 0x1ff   : > { %v3264_v30 = vadd.f32 %v3217_v59, %v3130_v18  ;;  %v3265_v59 = vadd.f32 %v3220_v40, %v3131_v62  ;;  %v3137_v32 = vadd.f32 %v6896_v3, %v3003_v36  ;;  %v6899_v18 = vld [vmem:[#allocation8_spill] sm:$0xff]  ;;  %v3140_v29 = vadd.f32 %v6904_v31, %v3006_v26  ;;  %v6909_v26 = vld [vmem:[#allocation6_spill] sm:$0xff] }
 0x200   : > { %v6433_v43 = vpop.f32.mrf.mxu0  ;;  %v6437_v21 = vpop.f32.mrf.mxu1  ;;  %v3268_v61 = vadd.f32 %v6417_v19, %v3134_v42  ;;  %v2873_v53 = vadd.f32 %v6899_v18, %v2739_v8  ;;  %v3404_v19 = vadd.f32 %v6901_v55, %v3270_v48  ;;  %v6902_v52 = vld [vmem:[#allocation16_spill] sm:$0xff]  ;;  %v3269_v8 = vadd.f32 %v6430_v63, %v3135_v49  ;;  %v3683_v49 = vld [vmem:[#allocation2 + $0x28] sm:$0xff] }
 0x201   : > { %v3398_v4 = vadd.f32 %v6395_v41, %v3264_v30  ;;  %v6894_v41 = vld [vmem:[#allocation11_spill] sm:$0xff]  ;;  %v3271_v44 = vadd.f32 %v6423_v50, %v3137_v32 }
 0x202   : > { %v5000_v37 = vpop.f32.mrf.mxu0  ;;  %v6443_v5 = vpop.f32.mrf.mxu1  ;;  %v2737_v38 = vadd.f32 %v6894_v41, %v6893_v25  ;;  %v3007_v62 = vadd.f32 %v6902_v52, %v2873_v53  ;;  %v6912_v12 = vld [vmem:[#allocation23_spill] sm:$0xff] }
 0x204   : > { %v3619_v54 = vpop.f32.mrf.mxu0  ;;  %v6449_v2 = vpop.f32.mrf.mxu1 }
 0x206   : > { %v5001_v27 = vpop.f32.mrf.mxu0  ;;  %v6455_v35 = vpop.f32.mrf.mxu1 }
 0x208   : > { %v3622_v13 = vpop.f32.mrf.mxu0  ;;  %v4986_v23 = vpop.f32.mrf.mxu1 }
 0x209   : > { %v3534_v56 = vadd.f32 %v4986_v23, %v3400_v33  ;;  %v6903_v33 = vld [vmem:[#allocation4_spill] sm:$0xff]  ;;  %v3679_v23 = vld [vmem:[#allocation2 + $0x8] sm:$0xff] }
 0x20a   : > { %v5004_v46 = vpop.f32.mrf.mxu0  ;;  %v3485_v6 = vpop.f32.mrf.mxu1  ;;  %v2871_v36 = vadd.f32 %v6903_v33, %v2737_v38  ;;  %v6908_v38 = vld [vmem:[#allocation21_spill] sm:$0xff] }
 0x20b   : > { %v3668_v15 = vadd.f32 %v5000_v37, %v3534_v56  ;;  %v3532_v58 = vadd.f32 %v3485_v6, %v3398_v4  ;;  %v3399_v37 = vadd.f32 %v6897_v16, %v3265_v59  ;;  %v6905_v59 = vld [vmem:[#allocation20_spill] sm:$0xff]  ;;  %v3405_v63 = vadd.f32 %v6908_v38, %v3271_v44 }
 0x20c   : > { %v3635_v40 = vpop.f32.mrf.mxu0  ;;  %v4987_v1 = vpop.f32.mrf.mxu1  ;;  %v3402_v56 = vadd.f32 %v6905_v59, %v3268_v61  ;;  %v6907_v6 = vld [vmem:[#allocation12_spill] sm:$0xff] }
 0x20d   : > { %v3692_v22 = vadd.f32 %v3680_v34, %v3668_v15  ;;  %v3666_v14 = vadd.f32 %v3619_v54, %v3532_v58  ;;  %v3535_v9 = vadd.f32 %v4987_v1, %v3401_v24  ;;  %v3274_v34 = vadd.f32 %v6437_v21, %v3140_v29  ;;  %v3684_v15 = vld [vmem:[#allocation2 + $0x30] sm:$0xff]  ;;  %v3682_v61 = vld [vmem:[#allocation2 + $0x20] sm:$0xff] }
 0x20e   : > { %v5005_v45 = vpop.f32.mrf.mxu0  ;;  %v3488_v30 = vpop.f32.mrf.mxu1  ;;  %v3138_v51 = vadd.f32 %v6907_v6, %v3004_v7 }
 0x20f   : > { %3705 = vst.msk [vmem:[#allocation2 + $0x10] sm:$0xff] %vm3702_vm4, %v3692_v22  ;;  %v3690_v47 = vadd.f32 %v3678_v60, %v3666_v14  ;;  %v3669_v54 = vadd.f32 %v5001_v27, %v3535_v9  ;;  %v3533_v39 = vadd.f32 %v3488_v30, %v3399_v37  ;;  %v6906_v27 = vld [vmem:[#allocation17_spill] sm:$0xff]  ;;  %v6910_v22 = vld [vmem:[#allocation22_spill] sm:$0xff]  ;;  %v6911_v9 = vld [vmem:[#allocation7_spill] sm:$0xff]  ;;  %v3408_v7 = vadd.f32 %v6912_v12, %v3274_v34 }
 0x210   : > { %v4990_v0 = vpop.f32.mrf.mxu1  ;;  %v3638_v4 = vpop.f32.mrf.mxu0  ;;  %v3005_v42 = vadd.f32 %v6906_v27, %v2871_v36  ;;  %v3272_v10 = vadd.f32 %v6443_v5, %v3138_v51  ;;  %v3403_v14 = vadd.f32 %v6910_v22, %v3269_v8  ;;  %v3686_v36 = vld [vmem:[#allocation2 + $0x40] sm:$0xff] }
 0x211   : > { %3703 = vst.msk [vmem:[#allocation2] sm:$0xff] %vm3702_vm4, %v3690_v47  ;;  %v3693_v50 = vadd.f32 %v3681_v11, %v3669_v54  ;;  %v3667_v17 = vadd.f32 %v3622_v13, %v3533_v39  ;;  %v3538_v48 = vadd.f32 %v4990_v0, %v3404_v19  ;;  %v3141_v13 = vadd.f32 %v6909_v26, %v3007_v62  ;;  %v3688_v54 = vld [vmem:[#allocation2 + $0x50] sm:$0xff]  ;;  %v3689_v0 = vld [vmem:[#allocation2 + $0x58] sm:$0xf] }
 0x212   : > { %v3501_v58 = vpop.f32.mrf.mxu1  ;;  %v5008_v32 = vpop.f32.mrf.mxu0  ;;  %v3139_v16 = vadd.f32 %v6911_v9, %v3005_v42 }
 0x213   : > { %3706 = vst.msk [vmem:[#allocation2 + $0x18] sm:$0xff] %vm3702_vm4, %v3693_v50  ;;  %v3691_v24 = vadd.f32 %v3679_v23, %v3667_v17  ;;  %v3672_v25 = vadd.f32 %v5004_v46, %v3538_v48  ;;  %v3536_v41 = vadd.f32 %v3501_v58, %v3402_v56  ;;  %v3685_v46 = vld [vmem:[#allocation2 + $0x38] sm:$0xff]  ;;  %v3275_v5 = vadd.f32 %v6449_v2, %v3141_v13 }
 0x214   : > { %v4991_v3 = vpop.f32.mrf.mxu1  ;;  %v3651_v11 = vpop.f32.mrf.mxu0  ;;  %v3273_v55 = vadd.f32 %v6455_v35, %v3139_v16 }
 0x215   : > { %3704 = vst.msk [vmem:[#allocation2 + $0x8] sm:$0xff] %vm3702_vm4, %v3691_v24  ;;  %v3696_v21 = vadd.f32 %v3684_v15, %v3672_v25  ;;  %v3670_v60 = vadd.f32 %v3635_v40, %v3536_v41  ;;  %v3539_v1 = vadd.f32 %v4991_v3, %v3405_v63  ;;  %v3406_v40 = vadd.f32 %v6421_v28, %v3272_v10 }
 0x216   : > { %v3504_v37 = vpop.f32.mrf.mxu1  ;;  %v3409_v62 = vadd.f32 %v6427_v20, %v3275_v5  ;;  %v5009_v33 = vpop.f32.mrf.mxu0  ;;  %v3407_v23 = vadd.f32 %v6433_v43, %v3273_v55  ;;  %v3687_v20 = vld [vmem:[#allocation2 + $0x48] sm:$0xff] }
 0x217   : > { %3709 = vst.msk [vmem:[#allocation2 + $0x30] sm:$0xff] %vm3702_vm4, %v3696_v21  ;;  %v3694_v18 = vadd.f32 %v3682_v61, %v3670_v60  ;;  %v3673_v53 = vadd.f32 %v5005_v45, %v3539_v1  ;;  %v3537_v57 = vadd.f32 %v3504_v37, %v3403_v14 }
 0x218   : > { %v4994_v30 = vpop.f32.mrf.mxu1  ;;  %v3654_v50 = vpop.f32.mrf.mxu0 }
 0x219   : > { %3707 = vst.msk [vmem:[#allocation2 + $0x20] sm:$0xff] %vm3702_vm4, %v3694_v18  ;;  %v3697_v19 = vadd.f32 %v3685_v46, %v3673_v53  ;;  %v3671_v44 = vadd.f32 %v3638_v4, %v3537_v57  ;;  %v3542_v47 = vadd.f32 %v4994_v30, %v3408_v7 }
 0x21a   : > { %v3517_v39 = vpop.f32.mrf.mxu1 }
 0x21b   : > { %3710 = vst.msk [vmem:[#allocation2 + $0x38] sm:$0xff] %vm3702_vm4, %v3697_v19  ;;  %v3695_v2 = vadd.f32 %v3683_v49, %v3671_v44  ;;  %v3676_v52 = vadd.f32 %v5008_v32, %v3542_v47  ;;  %v3540_v45 = vadd.f32 %v3517_v39, %v3406_v40 }
 0x21c   : > { %v4995_v31 = vpop.f32.mrf.mxu1 }
 0x21d   : > { %3708 = vst.msk [vmem:[#allocation2 + $0x28] sm:$0xff] %vm3702_vm4, %v3695_v2  ;;  %v3700_v28 = vadd.f32 %v3688_v54, %v3676_v52  ;;  %v3674_v35 = vadd.f32 %v3651_v11, %v3540_v45  ;;  %v3543_v29 = vadd.f32 %v4995_v31, %v3409_v62 }
 0x21e   : > { %v3520_v59 = vpop.f32.mrf.mxu1 }
 0x21f   : > { %3713 = vst.msk [vmem:[#allocation2 + $0x50] sm:$0xff] %vm3702_vm4, %v3700_v28  ;;  %v3698_v56 = vadd.f32 %v3686_v36, %v3674_v35  ;;  %v3677_v4 = vadd.f32 %v5009_v33, %v3543_v29  ;;  %v3541_v8 = vadd.f32 %v3520_v59, %v3407_v23 }
 0x221   : > { %3711 = vst.msk [vmem:[#allocation2 + $0x40] sm:$0xff] %vm3702_vm4, %v3698_v56  ;;  %v3701_v17 = vadd.f32 %v3689_v0, %v3677_v4  ;;  %v3675_v48 = vadd.f32 %v3654_v50, %v3541_v8  ;;  %3719 = sbr.rel (%p4481_p11) target bundleno = 627 (0x273), region = 40 }
 0x223   : > { %3715 = vst.msk [vmem:[#allocation2 + $0x58] sm:$0xf] %vm3714_vm5, %v3701_v17  ;;  %v3699_v27 = vadd.f32 %v3687_v20, %v3675_v48 }
 0x225   : > { %3712 = vst.msk [vmem:[#allocation2 + $0x48] sm:$0xff] %vm3702_vm4, %v3699_v27 }
 0x226   : > { %v3720_v43 = vld [vmem:[#allocation2] sm:$0xff]  ;;  %v3763_v34 = vlaneseq  ;;  %v3721_v6 = vld [vmem:[#allocation2 + $0x8] sm:$0xff]  ;;  %v3722_v58 = vld [vmem:[#allocation2 + $0x10] sm:$0xff] }
 0x227   : > { %v6517_v42 = vld [vmem:[%s6792_s2] ss:$0 sm:$0xff]  ;;  %v3723_v24 = vld [vmem:[#allocation2 + $0x18] sm:$0xff]  ;;  %v3725_v26 = vld [vmem:[#allocation2 + $0x28] sm:$0xff] }
 0x228   : > { %v6520_v51 = vadd.f32 %v6517_v42, %v3720_v43  ;;  %v6523_v15 = vadd.f32 %v6517_v42, %v3721_v6  ;;  %v3724_v25 = vld [vmem:[#allocation2 + $0x20] sm:$0xff]  ;;  %v6525_v41 = vshrl.u32 %v3763_v34, 7  ;;  %v6528_v38 = vadd.f32 %v6517_v42, %v3722_v58  ;;  %v3726_v13 = vld [vmem:[#allocation2 + $0x30] sm:$0xff]  ;;  %v3727_v12 = vld [vmem:[#allocation2 + $0x38] sm:$0xff] }
 0x229   : > { %v6531_v63 = vadd.f32 %v6517_v42, %v3723_v24  ;;  %v6534_v10 = vadd.f32 %v6517_v42, %v3724_v25  ;;  %v6543_v61 = vadd.f32 %v6517_v42, %v3725_v26  ;;  %v6546_v3 = vadd.f32 %v6517_v42, %v3726_v13  ;;  %v3728_v57 = vld [vmem:[#allocation2 + $0x40] sm:$0xff] }
 0x22a   : > { %3751 = vst.msk [vmem:[%s5286_s20] sm:$0xff] %vm3702_vm4, %v6520_v51  ;;  %3752 = vst.msk [vmem:[%s5286_s20 + $0x8] sm:$0xff] %vm3702_vm4, %v6523_v15  ;;  %v6549_v32 = vmul.u32.u64.low 2863311531, %v6525_v41  ;;  %v6550_v21 = vmul.u32.u64.high 2863311531, %v6525_v41, %v6549_v32  ;;  %v3765_v60 = vadd.s32 8, %v6525_v41  ;;  %v3766_v1 = vadd.s32 16, %v6525_v41 }
 0x22b   : > { %3753 = vst.msk [vmem:[%s5286_s20 + $0x10] sm:$0xff] %vm3702_vm4, %v6528_v38  ;;  %3754 = vst.msk [vmem:[%s5286_s20 + $0x18] sm:$0xff] %vm3702_vm4, %v6531_v63  ;;  %v3767_v22 = vadd.s32 24, %v6525_v41  ;;  %v3768_v14 = vadd.s32 32, %v6525_v41  ;;  %v4047_v11 = vmul.f32 %v6520_v51, %v6520_v51  ;;  %v4048_v30 = vmul.f32 %v6523_v15, %v6523_v15 }
 0x22c   : > { %3755 = vst.msk [vmem:[%s5286_s20 + $0x20] sm:$0xff] %vm3702_vm4, %v6534_v10  ;;  %3756 = vst.msk [vmem:[%s5286_s20 + $0x28] sm:$0xff] %vm3702_vm4, %v6543_v61  ;;  %v6571_v9 = vmul.u32.u64.low 2863311531, %v3765_v60  ;;  %v6572_v16 = vmul.u32.u64.high 2863311531, %v3765_v60, %v6571_v9  ;;  %v6574_v46 = vmul.u32.u64.low 2863311531, %v3766_v1  ;;  %v6575_v37 = vmul.u32.u64.high 2863311531, %v3766_v1, %v6574_v46 }
 0x22d   : > { %3757 = vst.msk [vmem:[%s5286_s20 + $0x30] sm:$0xff] %vm3702_vm4, %v6546_v3  ;;  %v6577_v7 = vmul.u32.u64.low 2863311531, %v3767_v22  ;;  %v6578_v5 = vmul.u32.u64.high 2863311531, %v3767_v22, %v6577_v7  ;;  %v6580_v18 = vmul.u32.u64.low 2863311531, %v3768_v14  ;;  %v6581_v53 = vmul.u32.u64.high 2863311531, %v3768_v14, %v6580_v18 }
 0x22e   : > { %v3782_v49 = vshrl.u32 %v6550_v21, 3  ;;  %v6589_v40 = vadd.s32 40, %v6525_v41  ;;  %v6593_v55 = vmul.f32 %v6528_v38, %v6528_v38  ;;  %v6597_v19 = vmul.f32 %v6531_v63, %v6531_v63 }
 0x22f   : > { %v6601_v44 = vmul.f32 %v6534_v10, %v6534_v10  ;;  %v6604_v47 = vadd.f32 %v6517_v42, %v3727_v12  ;;  %v3793_v39 = vshrl.u32 %v6572_v16, 3  ;;  %v3804_v2 = vshrl.u32 %v6575_v37, 3 }
 0x230   : > { %v3783_v54 = vmul.u32 12, %v3782_v49  ;;  %v6609_v52 = vadd.f32 %v6517_v42, %v3728_v57  ;;  %v3815_v45 = vshrl.u32 %v6578_v5, 3  ;;  %v3826_v62 = vshrl.u32 %v6581_v53, 3 }
 0x231   : > { %v6614_v33 = vmul.u32.u64.low 2863311531, %v6589_v40  ;;  %v6615_v36 = vmul.u32.u64.high 2863311531, %v6589_v40, %v6614_v33  ;;  %3758 = vst.msk [vmem:[%s5286_s20 + $0x38] sm:$0xff] %vm3702_vm4, %v6604_v47  ;;  %v3794_v28 = vmul.u32 12, %v3793_v39  ;;  %v6623_v29 = vmul.f32 %v6543_v61, %v6543_v61 }
 0x232   : > { %v3784_v31 = vsub.s32 %v6525_v41, %v3783_v54  ;;  %v3805_v35 = vmul.u32 12, %v3804_v2  ;;  %3759 = vst.msk [vmem:[%s5286_s20 + $0x40] sm:$0xff] %vm3702_vm4, %v6609_v52  ;;  %v3816_v23 = vmul.u32 12, %v3815_v45  ;;  %v6629_v59 = vadd.s32 48, %v6525_v41 }
 0x233   : > { %v3827_v0 = vmul.u32 12, %v3826_v62  ;;  %v6632_v56 = vadd.s32 56, %v6525_v41  ;;  %v3795_v8 = vsub.s32 %v3765_v60, %v3794_v28  ;;  %v3837_v48 = vshrl.u32 %v6615_v36, 3 }
 0x234   : > { %vm3908_vm6 = vcmp.ne.s32.totalorder %v3784_v31, 0  ;;  %vm3920_vm7 = vcmp.lt.s32.totalorder %v3784_v31, 0  ;;  %v3944_v4 = vadd.s32 12, %v3784_v31  ;;  %v3806_v50 = vsub.s32 %v3766_v1, %v3805_v35  ;;  %v3730_v35 = vld [vmem:[#allocation2 + $0x50] sm:$0xff] }
 0x235   : > { %vm3932_vm8 = vmand %vm3920_vm7, %vm3908_vm6  ;;  %v3817_v20 = vsub.s32 %v3767_v22, %v3816_v23  ;;  %v3828_v17 = vsub.s32 %v3768_v14, %v3827_v0  ;;  %vm3909_vm9 = vcmp.ne.s32.totalorder %v3795_v8, 0  ;;  %vm3921_vm10 = vcmp.lt.s32.totalorder %v3795_v8, 0  ;;  %v3729_v14 = vld [vmem:[#allocation2 + $0x48] sm:$0xff] }
 0x236   : > { %v3956_v27 = vsel %vm3932_vm8, %v3944_v4, %v3784_v31  ;;  %v3945_v43 = vadd.s32 12, %v3795_v8  ;;  %vm3933_vm12 = vmand %vm3921_vm10, %vm3909_vm9  ;;  %vm3910_vm13 = vcmp.ne.s32.totalorder %v3806_v50, 0  ;;  %vm3922_vm14 = vcmp.lt.s32.totalorder %v3806_v50, 0 }
 0x237   : > { %vm3968_vm11 = vcmp.lt.s32.totalorder %v3956_v27, 8  ;;  %v3946_v34 = vadd.s32 12, %v3806_v50  ;;  %vm3934_vm15 = vmand %vm3922_vm14, %vm3910_vm13  ;;  %vm3911_vm0 = vcmp.ne.s32.totalorder %v3817_v20, 0  ;;  %vm3923_vm3 = vcmp.lt.s32.totalorder %v3817_v20, 0 }
 0x238   : > { %v4004_v6 = vsel %vm3968_vm11, %v6520_v51, 0.0  ;;  %v4059_v58 = vsel %vm3968_vm11, %v4047_v11, 0.0  ;;  %v3957_v24 = vsel %vm3933_vm12, %v3945_v43, %v3795_v8  ;;  %vm3935_vm6 = vmand %vm3923_vm3, %vm3911_vm0  ;;  %vm3912_vm7 = vcmp.ne.s32.totalorder %v3828_v17, 0 }
 0x239   : > { %v4016_v25 = vsel %vm3702_vm4, %v4004_v6, 0.0  ;;  %v4071_v26 = vsel %vm3702_vm4, %v4059_v58, 0.0  ;;  %vm3969_vm1 = vcmp.lt.s32.totalorder %v3957_v24, 8  ;;  %v3958_v13 = vsel %vm3934_vm15, %v3946_v34, %v3806_v50 }
 0x23a   : > { %v4005_v32 = vsel %vm3969_vm1, %v6523_v15, 0.0  ;;  %v4060_v21 = vsel %vm3969_vm1, %v4048_v30, 0.0  ;;  %vm3970_vm2 = vcmp.lt.s32.totalorder %v3958_v13, 8  ;;  %v3947_v15 = vadd.s32 12, %v3817_v20 }
 0x23b   : > { %v4017_v60 = vsel %vm3702_vm4, %v4005_v32, 0.0  ;;  %v4072_v1 = vsel %vm3702_vm4, %v4060_v21, 0.0  ;;  %v4006_v51 = vsel %vm3970_vm2, %v6528_v38, 0.0  ;;  %v4061_v22 = vsel %vm3970_vm2, %v6593_v55, 0.0 }
 0x23c   : > { %v4018_v9 = vadd.f32 %v4017_v60, %v4016_v25  ;;  %v4073_v16 = vadd.f32 %v4072_v1, %v4071_v26  ;;  %v4019_v46 = vsel %vm3702_vm4, %v4006_v51, 0.0  ;;  %v4074_v37 = vsel %vm3702_vm4, %v4061_v22, 0.0 }
 0x23d   : > { %vm3924_vm8 = vcmp.lt.s32.totalorder %v3828_v17, 0  ;;  %v3948_v12 = vadd.s32 12, %v3828_v17  ;;  %v3838_v5 = vmul.u32 12, %v3837_v48  ;;  %v6647_v38 = vadd.s32 64, %v6525_v41 }
 0x23e   : > { %v4020_v7 = vadd.f32 %v4019_v46, %v4018_v9  ;;  %vm3936_vm9 = vmand %vm3924_vm8, %vm3912_vm7  ;;  %v6650_v18 = vadd.f32 %v6517_v42, %v3729_v14  ;;  %v3959_v53 = vsel %vm3935_vm6, %v3947_v15, %v3817_v20  ;;  %v4075_v30 = vadd.f32 %v4074_v37, %v4073_v16 }
 0x23f   : > { %v3960_v57 = vsel %vm3936_vm9, %v3948_v12, %v3828_v17  ;;  %v6653_v49 = vmul.u32.u64.low 2863311531, %v6629_v59  ;;  %v6654_v11 = vmul.u32.u64.high 2863311531, %v6629_v59, %v6653_v49  ;;  %vm3971_vm10 = vcmp.lt.s32.totalorder %v3959_v53, 8 }
 0x240   : > { %vm3972_vm11 = vcmp.lt.s32.totalorder %v3960_v57, 8  ;;  %v3839_v55 = vsub.s32 %v6589_v40, %v3838_v5  ;;  %3760 = vst.msk [vmem:[%s5286_s20 + $0x48] sm:$0xff] %vm3702_vm4, %v6650_v18  ;;  %v4007_v54 = vsel %vm3971_vm10, %v6531_v63, 0.0  ;;  %v4062_v39 = vsel %vm3971_vm10, %v6597_v19, 0.0 }
 0x241   : > { %v4008_v2 = vsel %vm3972_vm11, %v6534_v10, 0.0  ;;  %v4063_v45 = vsel %vm3972_vm11, %v6601_v44, 0.0  ;;  %v4021_v62 = vsel %vm3702_vm4, %v4007_v54, 0.0  ;;  %v4076_v33 = vsel %vm3702_vm4, %v4062_v39, 0.0 }
 0x242   : > { %v4023_v36 = vsel %vm3702_vm4, %v4008_v2, 0.0  ;;  %v6668_v31 = vadd.s32 72, %v6525_v41  ;;  %v4022_v40 = vadd.f32 %v4021_v62, %v4020_v7  ;;  %v4078_v28 = vsel %vm3702_vm4, %v4063_v45, 0.0 }
 0x243   : > { %vm3913_vm12 = vcmp.ne.s32.totalorder %v3839_v55, 0  ;;  %vm3925_vm13 = vcmp.lt.s32.totalorder %v3839_v55, 0  ;;  %v3949_v63 = vadd.s32 12, %v3839_v55  ;;  %v3848_v10 = vshrl.u32 %v6654_v11, 3 }
 0x244   : > { %vm3937_vm14 = vmand %vm3925_vm13, %vm3913_vm12  ;;  %v6673_v19 = vmul.u32.u64.low 2863311531, %v6632_v56  ;;  %v6674_v44 = vmul.u32.u64.high 2863311531, %v6632_v56, %v6673_v19  ;;  %v4077_v23 = vadd.f32 %v4076_v33, %v4075_v30  ;;  %v4024_v0 = vadd.f32 %v4023_v36, %v4022_v40 }
 0x245   : > { %v6677_v4 = vmul.u32.u64.low 2863311531, %v6647_v38  ;;  %v6678_v8 = vmul.u32.u64.high 2863311531, %v6647_v38, %v6677_v4  ;;  %v3961_v50 = vsel %vm3937_vm14, %v3949_v63, %v3839_v55  ;;  %v3849_v20 = vmul.u32 12, %v3848_v10 }
 0x246   : > { %v6681_v17 = vmul.u32.u64.low 2863311531, %v6668_v31  ;;  %v6682_v48 = vmul.u32.u64.high 2863311531, %v6668_v31, %v6681_v17  ;;  %vm6684_vm15 = vcmp.lt.s32.totalorder %v3961_v50, 8  ;;  %v4053_v43 = vmul.f32 %v6546_v3, %v6546_v3 }
 0x247   : > { %v6691_v34 = vadd.f32 %v6517_v42, %v3730_v35  ;;  %v6694_v6 = vadd.s32 80, %v6525_v41  ;;  %v4009_v58 = vsel %vm6684_vm15, %v6543_v61, 0.0  ;;  %v4064_v24 = vsel %vm6684_vm15, %v6623_v29, 0.0  ;;  %v3731_v61 = vld [vmem:[#allocation2 + $0x58] sm:$0xf] }
 0x248   : > { %v3850_v25 = vsub.s32 %v6629_v59, %v3849_v20  ;;  %v3859_v26 = vshrl.u32 %v6674_v44, 3  ;;  %v4079_v13 = vadd.f32 %v4078_v28, %v4077_v23  ;;  %v4025_v32 = vsel %vm3702_vm4, %v4009_v58, 0.0 }
 0x249   : > { %v4054_v21 = vmul.f32 %v6604_v47, %v6604_v47  ;;  %v3870_v60 = vshrl.u32 %v6678_v8, 3  ;;  %3761 = vst.msk [vmem:[%s5286_s20 + $0x50] sm:$0xff] %vm3702_vm4, %v6691_v34  ;;  %v4026_v1 = vadd.f32 %v4025_v32, %v4024_v0  ;;  %v4080_v51 = vsel %vm3702_vm4, %v4064_v24, 0.0 }
 0x24a   : > { %vm3914_vm0 = vcmp.ne.s32.totalorder %v3850_v25, 0  ;;  %vm3926_vm1 = vcmp.lt.s32.totalorder %v3850_v25, 0  ;;  %v3950_v29 = vadd.s32 12, %v3850_v25  ;;  %v3860_v59 = vmul.u32 12, %v3859_v26 }
 0x24b   : > { %vm3938_vm2 = vmand %vm3926_vm1, %vm3914_vm0  ;;  %v3871_v22 = vmul.u32 12, %v3870_v60  ;;  %v3881_v14 = vshrl.u32 %v6682_v48, 3  ;;  %v6714_v9 = vmul.u32.u64.low 2863311531, %v6694_v6  ;;  %v6715_v16 = vmul.u32.u64.high 2863311531, %v6694_v6, %v6714_v9 }
 0x24c   : > { %v6718_v46 = vadd.f32 %v6517_v42, %v3731_v61  ;;  %v3775_v37 = vadd.s32 88, %v6525_v41  ;;  %v4081_v15 = vadd.f32 %v4080_v51, %v4079_v13  ;;  %v3962_v12 = vsel %vm3938_vm2, %v3950_v29, %v3850_v25 }
 0x24d   : > { %v3861_v7 = vsub.s32 %v6632_v56, %v3860_v59  ;;  %v3872_v5 = vsub.s32 %v6647_v38, %v3871_v22  ;;  %vm3974_vm3 = vcmp.lt.s32.totalorder %v3962_v12, 8  ;;  %v3882_v53 = vmul.u32 12, %v3881_v14 }
 0x24e   : > { %3762 = vst.msk [vmem:[%s5286_s20 + $0x58] sm:$0xf] %vm3714_vm5, %v6718_v46  ;;  %v6726_v57 = vmul.u32.u64.low 2863311531, %v3775_v37  ;;  %v6727_v49 = vmul.u32.u64.high 2863311531, %v3775_v37, %v6726_v57  ;;  %v4010_v11 = vsel %vm3974_vm3, %v6546_v3, 0.0  ;;  %v4065_v42 = vsel %vm3974_vm3, %v4053_v43, 0.0 }
 0x24f   : > { %vm3915_vm6 = vcmp.ne.s32.totalorder %v3861_v7, 0  ;;  %vm3927_vm7 = vcmp.lt.s32.totalorder %v3861_v7, 0  ;;  %v4027_v41 = vsel %vm3702_vm4, %v4010_v11, 0.0  ;;  %v4082_v30 = vsel %vm3702_vm4, %v4065_v42, 0.0 }
 0x250   : > { %vm3939_vm8 = vmand %vm3927_vm7, %vm3915_vm6  ;;  %v3951_v56 = vadd.s32 12, %v3861_v7  ;;  %vm3916_vm9 = vcmp.ne.s32.totalorder %v3872_v5, 0  ;;  %vm3928_vm10 = vcmp.lt.s32.totalorder %v3872_v5, 0  ;;  %v3952_v38 = vadd.s32 12, %v3872_v5 }
 0x251   : > { %v4055_v55 = vmul.f32 %v6609_v52, %v6609_v52  ;;  %v4056_v54 = vmul.f32 %v6650_v18, %v6650_v18  ;;  %v4028_v39 = vadd.f32 %v4027_v41, %v4026_v1  ;;  %v4083_v3 = vadd.f32 %v4082_v30, %v4081_v15  ;;  %vm3940_vm11 = vmand %vm3928_vm10, %vm3916_vm9 }
 0x252   : > { %v3963_v2 = vsel %vm3939_vm8, %v3951_v56, %v3861_v7  ;;  %v3883_v45 = vsub.s32 %v6668_v31, %v3882_v53  ;;  %v3964_v62 = vsel %vm3940_vm11, %v3952_v38, %v3872_v5  ;;  %v3892_v33 = vshrl.u32 %v6715_v16, 3 }
 0x253   : > { %vm3975_vm12 = vcmp.lt.s32.totalorder %v3963_v2, 8  ;;  %v3903_v36 = vshrl.u32 %v6727_v49, 3  ;;  %vm3976_vm13 = vcmp.lt.s32.totalorder %v3964_v62, 8  ;;  %v4058_v13 = vmul.f32 %v6718_v46, %v6718_v46 }
 0x254   : > { %v4011_v40 = vsel %vm3975_vm12, %v6604_v47, 0.0  ;;  %v4066_v28 = vsel %vm3975_vm12, %v4054_v21, 0.0  ;;  %vm3917_vm14 = vcmp.ne.s32.totalorder %v3883_v45, 0  ;;  %v4012_v19 = vsel %vm3976_vm13, %v6609_v52, 0.0 }
 0x255   : > { %v4029_v63 = vsel %vm3702_vm4, %v4011_v40, 0.0  ;;  %v4084_v10 = vsel %vm3702_vm4, %v4066_v28, 0.0  ;;  %v4067_v44 = vsel %vm3976_vm13, %v4055_v55, 0.0  ;;  %v4031_v23 = vsel %vm3702_vm4, %v4012_v19, 0.0 }
 0x256   : > { %v4030_v35 = vadd.f32 %v4029_v63, %v4028_v39  ;;  %v4085_v31 = vadd.f32 %v4084_v10, %v4083_v3  ;;  %v4086_v0 = vsel %vm3702_vm4, %v4067_v44, 0.0  ;;  %vm3929_vm15 = vcmp.lt.s32.totalorder %v3883_v45, 0 }
 0x257   : > { %v3953_v4 = vadd.s32 12, %v3883_v45  ;;  %v3893_v8 = vmul.u32 12, %v3892_v33  ;;  %v3904_v47 = vmul.u32 12, %v3903_v36  ;;  %vm3941_vm0 = vmand %vm3929_vm15, %vm3917_vm14  ;;  %v4057_v52 = vmul.f32 %v6691_v34, %v6691_v34 }
 0x258   : > { %v4032_v48 = vadd.f32 %v4031_v23, %v4030_v35  ;;  %v4087_v27 = vadd.f32 %v4086_v0, %v4085_v31 }
 0x259   : > { %v3965_v50 = vsel %vm3941_vm0, %v3953_v4, %v3883_v45  ;;  %v3894_v20 = vsub.s32 %v6694_v6, %v3893_v8  ;;  %v3905_v17 = vsub.s32 %v3775_v37, %v3904_v47 }
 0x25a   : > { %vm3977_vm1 = vcmp.lt.s32.totalorder %v3965_v50, 8 }
 0x25b   : > { %v4013_v43 = vsel %vm3977_vm1, %v6650_v18, 0.0  ;;  %v4068_v58 = vsel %vm3977_vm1, %v4056_v54, 0.0  ;;  %vm3918_vm2 = vcmp.ne.s32.totalorder %v3894_v20, 0  ;;  %vm3930_vm3 = vcmp.lt.s32.totalorder %v3894_v20, 0 }
 0x25c   : > { %v4033_v24 = vsel %vm3702_vm4, %v4013_v43, 0.0  ;;  %v4088_v25 = vsel %vm3702_vm4, %v4068_v58, 0.0  ;;  %vm3942_vm6 = vmand %vm3930_vm3, %vm3918_vm2  ;;  %v3954_v26 = vadd.s32 12, %v3894_v20  ;;  %vm3919_vm7 = vcmp.ne.s32.totalorder %v3905_v17, 0 }
 0x25d   : > { %vm3931_vm8 = vcmp.lt.s32.totalorder %v3905_v17, 0  ;;  %v3955_v6 = vadd.s32 12, %v3905_v17  ;;  %v4034_v32 = vadd.f32 %v4033_v24, %v4032_v48  ;;  %v4089_v60 = vadd.f32 %v4088_v25, %v4087_v27 }
 0x25e   : > { %v3966_v21 = vsel %vm3942_vm6, %v3954_v26, %v3894_v20  ;;  %vm3943_vm9 = vmand %vm3931_vm8, %vm3919_vm7 }
 0x25f   : > { %vm3978_vm10 = vcmp.lt.s32.totalorder %v3966_v21, 8  ;;  %v3967_v18 = vsel %vm3943_vm9, %v3955_v6, %v3905_v17 }
 0x260   : > { %v4014_v61 = vsel %vm3978_vm10, %v6691_v34, 0.0  ;;  %v4069_v1 = vsel %vm3978_vm10, %v4057_v52, 0.0  ;;  %vm3979_vm11 = vcmp.lt.s32.totalorder %v3967_v18, 8 }
 0x261   : > { %v4035_v51 = vsel %vm3702_vm4, %v4014_v61, 0.0  ;;  %v4015_v29 = vsel %vm3979_vm11, %v6718_v46, 0.0  ;;  %v4070_v59 = vsel %vm3979_vm11, %v4058_v13, 0.0  ;;  %v4090_v22 = vsel %vm3702_vm4, %v4069_v1, 0.0 }
 0x262   : > { %v4036_v14 = vadd.f32 %v4035_v51, %v4034_v32  ;;  %v4037_v9 = vsel %vm3714_vm5, %v4015_v29, 0.0  ;;  %v4091_v16 = vadd.f32 %v4090_v22, %v4089_v60  ;;  %v4092_v37 = vsel %vm3714_vm5, %v4070_v59, 0.0 }
 0x263   : > { %vm4045_vm4 = vcmask 8192  }
 0x264   : > { %v4038_v15 = vadd.f32 %v4037_v9, %v4036_v14  ;;  %v4093_v12 = vadd.f32 %v4092_v37, %v4091_v16 }
 0x266   : > { %v4039_v34 = vrot.slane %v4038_v15, 4  ;;  %v4094_v7 = vrot.slane %v4093_v12, 4 }
 0x268   : > { %v4040_v5 = vadd.f32 %v4039_v34, %v4038_v15  ;;  %v4095_v53 = vadd.f32 %v4094_v7, %v4093_v12 }
 0x26a   : > { %v4041_v57 = vrot.slane %v4040_v5, 2  ;;  %v4096_v49 = vrot.slane %v4095_v53, 2 }
 0x26c   : > { %v4042_v46 = vadd.f32 %v4041_v57, %v4040_v5  ;;  %v4097_v11 = vadd.f32 %v4096_v49, %v4095_v53 }
 0x26e   : > { %v4043_v42 = vrot.slane %v4042_v46, 1  ;;  %v4098_v41 = vrot.slane %v4097_v11, 1 }
 0x270   : > { %v4044_v30 = vadd.f32 %v4043_v42, %v4042_v46  ;;  %v4099_v56 = vadd.f32 %v4098_v41, %v4097_v11 }
 0x272   : > { %4046 = vst.msk [vmem:[%s324_s6] sm:$0x1] %vm4045_vm4, %v4044_v30  ;;  %4100 = vst.msk [vmem:[%s331_s10] sm:$0x1] %vm4045_vm4, %v4099_v56 }
 0x273 PF: > { %s16_s24 = sadd.s32 1, %s5178_s24   ;;  %s6915_s15 = sld [smem:[#allocation3_spill]] }
 0x274   : > { %p13_p12 = scmp.ge.s32.totalorder %s16_s24, 82   ;;  %s6916_s18 = smov %s5166_s21 }
 0x275   : > { %s6917_s19 = smov %s5170_s22  ;;  %s6918_s20 = smov %s5174_s23 }
 0x276   : > { %s6919_s21 = smov %s6923_s25  ;;  %s6920_s22 = smov %s6927_s26 }
 0x277   :  { %15 = sbr.rel (!%p13_p12) target bundleno = 4 (0x4), region = 121 }
 0x279   : > { %s6921_s23 = smov %s6915_s15 }

</bundles_post_ra>
